<compile_context>
chip_gen: v7x
topology: tpu7x:2x2x1
jax: 0.10.0
libtpu: 0.0.40
codegen_flags: <defaults>
</compile_context>

<pallas_src>
import functools
import math

import jax
import jax.numpy as jnp
from jax import lax
from jax.experimental import pallas as pl
from jax.experimental.pallas import tpu as pltpu


# ----------------------------- shared numerics ------------------------------

def _layernorm(x, g, b, eps=1e-5):
    mu = jnp.mean(x, axis=-1, keepdims=True)
    xc = x - mu
    var = jnp.mean(xc * xc, axis=-1, keepdims=True)
    return xc * lax.rsqrt(var + eps) * g + b


def _erf(x):
    # Abramowitz & Stegun 7.1.26 rational approximation (|err| <= 1.5e-7).
    # Used instead of lax.erf so the erf-GELU lowers on every Mosaic backend.
    a1, a2, a3, a4, a5 = (0.254829592, -0.284496736, 1.421413741,
                          -1.453152027, 1.061405429)
    p = 0.3275911
    ax = jnp.abs(x)
    t = 1.0 / (1.0 + p * ax)
    poly = ((((a5 * t + a4) * t + a3) * t + a2) * t + a1) * t
    y = 1.0 - poly * jnp.exp(-ax * ax)
    return jnp.where(x >= 0, y, -y)


def _gelu(x):
    # torch.nn.GELU default (erf based).
    return 0.5 * x * (1.0 + _erf(x * jnp.float32(1.0 / math.sqrt(2.0))))


# ------------------------------- the kernel ---------------------------------

def generator_kernel(nb, t_real, num_heads, mask_keys, mxu_dtype,
                     x_ref, cw_ref, cb_ref,
                     ln1g_ref, ln1b_ref,
                     wqkv_ref, bqkv_ref,
                     wo_ref, bo_ref,
                     ln2g_ref, ln2b_ref,
                     w1_ref, b1_ref, w2_ref, b2_ref,
                     dw_ref, db_ref,
                     out_ref,
                     h_ref):
    """Grid = (batch_blocks, depth).  One grid step applies one transformer
    layer to a folded (nb*Tp, E) activation slab kept in f32 VMEM scratch."""
    l = pl.program_id(1)
    n_layers = pl.num_programs(1)

    R, E = h_ref.shape                      # R = nb * Tp
    Tp = R // nb
    H = num_heads
    hd = E // H

    # ---- input embedding (1x1 conv): first depth step only -----------------
    @pl.when(l == 0)
    def _():
        x = x_ref[...].astype(mxu_dtype)                                # (R, C)
        h_ref[...] = (jnp.dot(x, cw_ref[...],
                              preferred_element_type=jnp.float32)
                      + cb_ref[...])                                    # (R, E)

    h = h_ref[...]                                                      # f32

    # ---- ResidualAdd( LayerNorm -> MultiHeadAttention -> Dropout ) ---------
    y = _layernorm(h, ln1g_ref[...], ln1b_ref[...]).astype(mxu_dtype)   # (R, E)

    # Fused QKV projection: one (R,E)@(E,3E) matmul.  The 1/sqrt(emb)
    # attention scale (TTS-GAN scales by sqrt(emb), not sqrt(head_dim)) is
    # folded into the Q weight/bias columns host-side.
    qkv = (jnp.dot(y, wqkv_ref[...], preferred_element_type=jnp.float32)
           + bqkv_ref[...])                                             # (R, 3E)
    q = qkv[:, 0 * E:1 * E].astype(mxu_dtype).reshape(nb, Tp, E)
    k = qkv[:, 1 * E:2 * E].astype(mxu_dtype).reshape(nb, Tp, E)
    v = qkv[:, 2 * E:3 * E].astype(mxu_dtype).reshape(nb, Tp, E)

    if mask_keys:
        kidx = lax.broadcasted_iota(jnp.int32, (1, 1, Tp), 2)
        key_ok = kidx < t_real              # padded key positions masked out

    o_heads = []
    for hh in range(H):                     # static loop; heads serialize on MXU anyway
        sl = slice(hh * hd, (hh + 1) * hd)
        qh, kh, vh = q[:, :, sl], k[:, :, sl], v[:, :, sl]
        e = jnp.einsum('bqd,bkd->bqk', qh, kh,
                       preferred_element_type=jnp.float32)              # (nb, Tp, Tp)
        if mask_keys:
            e = jnp.where(key_ok, e, jnp.float32(-1e30))
        e = e - jnp.max(e, axis=-1, keepdims=True)
        p_ = jnp.exp(e)
        att = p_ / jnp.sum(p_, axis=-1, keepdims=True)                  # exact softmax
        o_heads.append(jnp.einsum('bqk,bkd->bqd', att.astype(mxu_dtype), vh,
                                  preferred_element_type=jnp.float32))  # (nb, Tp, hd)

    # Recombine heads on lanes -> (R, E); single full-K output projection.
    o = jnp.concatenate(o_heads, axis=-1).reshape(R, E).astype(mxu_dtype)
    h = h + jnp.dot(o, wo_ref[...], preferred_element_type=jnp.float32) + bo_ref[...]
    # TODO(synk): nn.Dropout layers are identity here (inference semantics).

    # ---- ResidualAdd( LayerNorm -> FeedForward(GELU) -> Dropout ) ----------
    y = _layernorm(h, ln2g_ref[...], ln2b_ref[...]).astype(mxu_dtype)
    z = jnp.dot(y, w1_ref[...], preferred_element_type=jnp.float32) + b1_ref[...]
    z = _gelu(z).astype(mxu_dtype)
    z = jnp.dot(z, w2_ref[...], preferred_element_type=jnp.float32) + b2_ref[...]
    h = h + z
    h_ref[...] = h

    # ---- output embedding (1x1 deconv): last depth step only ---------------
    @pl.when(l == n_layers - 1)
    def _():
        out = (jnp.dot(h.astype(mxu_dtype), dw_ref[...],
                       preferred_element_type=jnp.float32) + db_ref[...])
        out_ref[...] = out.astype(out_ref.dtype)
        # TODO(synk): for T >= 128 a lane-dense (nb*C, Tp) output layout would
        # avoid masked partial stores; skipped here since C and T are small.


# ------------------------------ host wrapper --------------------------------

def _vmem_estimate(nb, tp, c, e, hid):
    """Rough per-block VMEM residency (bytes) for the blocking heuristic."""
    r = nb * tp
    h_scratch = r * e * 4
    layer_w = (3 * e * e + e * e + 2 * e * hid) * 2      # bf16 streamed per layer
    weights = 2 * layer_w                                 # double-buffered stream
    io = 2 * 2 * (r * c * 4)                              # x / out tiles, dbl-buffered
    temps = r * e * 4 * 8 + r * tp * 4 * 2                # qkv/o/y slabs + scores
    return h_scratch + weights + io + temps + (1 << 20)


def _select_blocking(n, tp, c, e, hid, batch_block=None):
    """Pick batch fold (nb) and vmem_limit_bytes, generation-aware."""
    try:
        cap = int(pltpu.get_tpu_info().vmem_capacity_bytes)
    except Exception:
        cap = 128 * 1024 * 1024
    small_vmem = cap <= 72 * 1024 * 1024                  # v7x-class: 64 MiB / TC
    limit = min(cap * 3 // 4, (48 if small_vmem else 100) * 1024 * 1024)

    if batch_block is not None:
        return batch_block, limit

    target_r = 256 if small_vmem else 512                 # fill MXU rows
    nb = max(1, min(n, max(1, target_r // tp)))
    if small_vmem and n >= 2:
        nb = max(1, min(nb, n // 2))                      # >=2 parallel blocks (2 TCs)
    while nb > 1 and (n % nb != 0 or _vmem_estimate(nb, tp, c, e, hid) > limit):
        nb -= 1
    return nb, limit


def generator_forward(data, params, *, depth, num_heads,
                      mxu_dtype=jnp.bfloat16, batch_block=None):
    """data: [N, C, 1, T] (PyTorch NCHW).  Returns [N, C, 1, T] in float32."""
    N, C, one, T = data.shape
    assert one == 1
    E = params["conv_w"].shape[1]
    HID = params["w1"].shape[-1]
    assert E % num_heads == 0

    # Pad sequence to a multiple of 8 (sublane tiling); padded keys are masked
    # out of attention and padded rows dropped from the output.
    Tp = ((T + 7) // 8) * 8
    pad = Tp - T

    nb, vmem_limit = _select_blocking(N, Tp, C, E, HID, batch_block)
    assert N % nb == 0
    R = nb * Tp
    n_bblocks = N // nb

    # [N, C, 1, T] -> [N*Tp, C]   (rows = folded batch*time, lanes = channels)
    x = data.reshape(N, C, T).transpose(0, 2, 1)          # (N, T, C)
    if pad:
        x = jnp.pad(x, ((0, 0), (0, pad), (0, 0)))
    x = x.reshape(N * Tp, C)

    mx = mxu_dtype
    inv_scale = jnp.float32(1.0 / math.sqrt(E))           # TTS-GAN: scale by sqrt(emb)

    # Fused QKV weights (scale folded into Q); every MXU operand cast to bf16.
    wqkv = jnp.concatenate([params["wq"] * inv_scale, params["wk"], params["wv"]],
                           axis=-1).astype(mx)            # (depth, E, 3E)
    bqkv = jnp.concatenate([params["bq"] * inv_scale, params["bk"], params["bv"]],
                           axis=-1)                       # (depth, 1, 3E)

    kp = dict(
        conv_w=params["conv_w"].astype(mx),  conv_b=params["conv_b"],
        ln1_g=params["ln1_g"],               ln1_b=params["ln1_b"],
        wqkv=wqkv,                           bqkv=bqkv,
        wo=params["wo"].astype(mx),          bo=params["bo"],
        ln2_g=params["ln2_g"],               ln2_b=params["ln2_b"],
        w1=params["w1"].astype(mx),          b1=params["b1"],
        w2=params["w2"].astype(mx),          b2=params["b2"],
        deconv_w=params["deconv_w"].astype(mx), deconv_b=params["deconv_b"],
    )

    kernel = functools.partial(generator_kernel, nb, T, num_heads, pad > 0, mx)

    def const(shape):            # whole array resident (tiny conv/deconv params)
        nd = len(shape)
        return pl.BlockSpec(shape, lambda b, l, nd=nd: (0,) * nd)

    def layer(shape):            # per-layer weight streamed over the depth axis
        nd = len(shape)
        return pl.BlockSpec((None,) + shape, lambda b, l, nd=nd: (l,) + (0,) * nd)

    in_specs = [
        pl.BlockSpec((R, C), lambda b, l: (b, 0)),         # x (resident over depth)
        const((C, E)), const((1, E)),                      # conv
        layer((1, E)), layer((1, E)),                      # ln1
        layer((E, 3 * E)), layer((1, 3 * E)),              # fused qkv
        layer((E, E)), layer((1, E)),                      # attention out projection
        layer((1, E)), layer((1, E)),                      # ln2
        layer((E, HID)), layer((1, HID)),                  # ffn up
        layer((HID, E)), layer((1, E)),                    # ffn down
        const((E, C)), const((1, C)),                      # deconv
    ]
    out_spec = pl.BlockSpec((R, C), lambda b, l: (b, 0))

    out_flat = pl.pallas_call(
        kernel,
        out_shape=jax.ShapeDtypeStruct((N * Tp, C), jnp.float32),
        grid_spec=pltpu.PrefetchScalarGridSpec(
            num_scalar_prefetch=0,
            grid=(n_bblocks, depth),
            in_specs=in_specs,
            out_specs=out_spec,
            scratch_shapes=[pltpu.VMEM((R, E), jnp.float32)],   # running `h`
        ),
        compiler_params=pltpu.CompilerParams(
            dimension_semantics=("parallel", "arbitrary"),
            vmem_limit_bytes=int(vmem_limit),
        ),
    )(x,
      kp["conv_w"], kp["conv_b"],
      kp["ln1_g"], kp["ln1_b"],
      kp["wqkv"], kp["bqkv"],
      kp["wo"], kp["bo"],
      kp["ln2_g"], kp["ln2_b"],
      kp["w1"], kp["b1"], kp["w2"], kp["b2"],
      kp["deconv_w"], kp["deconv_b"])

    # [N*Tp, C] -> [N, C, 1, T]  (drop padded rows)
    out = out_flat.reshape(N, Tp, C)[:, :T, :]
    return out.transpose(0, 2, 1)[:, :, None, :]


# --------------------------- deterministic params ---------------------------

def init_params(key, channels, emb, depth, expansion=4):
    hid = expansion * emb
    keys = iter(jax.random.split(key, 32))

    def n(shape, scale):
        return scale * jax.random.normal(next(keys), shape, jnp.float32)

    return dict(
        conv_w=n((channels, emb), 0.3),       conv_b=n((1, emb), 0.1),
        ln1_g=1.0 + n((depth, 1, emb), 0.05), ln1_b=n((depth, 1, emb), 0.05),
        wq=n((depth, emb, emb), 0.2),         bq=n((depth, 1, emb), 0.05),
        wk=n((depth, emb, emb), 0.2),         bk=n((depth, 1, emb), 0.05),
        wv=n((depth, emb, emb), 0.2),         bv=n((depth, 1, emb), 0.05),
        wo=n((depth, emb, emb), 0.2),         bo=n((depth, 1, emb), 0.05),
        ln2_g=1.0 + n((depth, 1, emb), 0.05), ln2_b=n((depth, 1, emb), 0.05),
        w1=n((depth, emb, hid), 0.2),         b1=n((depth, 1, hid), 0.05),
        w2=n((depth, hid, emb), 0.2),         b2=n((depth, 1, emb), 0.05),
        deconv_w=n((emb, channels), 0.3),     deconv_b=n((1, channels), 0.1),
    )


# ---------------------------- pure-JAX reference ----------------------------
# Mirrors the kernel's mixed precision (bf16 MXU inputs, f32 accumulation) so
# the comparison isolates kernel correctness.

def reference_forward(data, p, depth, num_heads, mxu_dtype=jnp.bfloat16):
    N, C, _, T = data.shape
    E = p["conv_w"].shape[1]
    hd = E // num_heads
    f32 = jnp.float32

    def mm(a, b):
        return jnp.dot(a.astype(mxu_dtype), b.astype(mxu_dtype),
                       preferred_element_type=f32)

    x = data.reshape(N, C, T).transpose(0, 2, 1)
    h = mm(x, p["conv_w"]) + p["conv_b"]

    for l in range(depth):
        res = h
        y = _layernorm(h, p["ln1_g"][l], p["ln1_b"][l])
        q = (mm(y, p["wq"][l]) + p["bq"][l]).reshape(N, T, num_heads, hd).transpose(0, 2, 1, 3)
        k = (mm(y, p["wk"][l]) + p["bk"][l]).reshape(N, T, num_heads, hd).transpose(0, 2, 1, 3)
        v = (mm(y, p["wv"][l]) + p["bv"][l]).reshape(N, T, num_heads, hd).transpose(0, 2, 1, 3)
        energy = jnp.einsum('bhqd,bhkd->bhqk', q.astype(mxu_dtype), k.astype(mxu_dtype),
                            preferred_element_type=f32) / (E ** 0.5)
        att = jax.nn.softmax(energy, axis=-1)
        o = jnp.einsum('bhqk,bhkd->bhqd', att.astype(mxu_dtype), v.astype(mxu_dtype),
                       preferred_element_type=f32)
        o = o.transpose(0, 2, 1, 3).reshape(N, T, E)
        h = res + mm(o, p["wo"][l]) + p["bo"][l]

        res = h
        y = _layernorm(h, p["ln2_g"][l], p["ln2_b"][l])
        z = _gelu(mm(y, p["w1"][l]) + p["b1"][l])
        h = res + mm(z, p["w2"][l]) + p["b2"][l]

    out = mm(h, p["deconv_w"]) + p["deconv_b"]
    return out.transpose(0, 2, 1)[:, :, None, :]


# ----------------------------------- main -----------------------------------

if __name__ == "__main__":
    # Small shapes consistent with the module: data = [N, ch, 1, t]
    N, C, T = 4, 4, 16
    EMB, DEPTH, HEADS = 16, 3, 4          # emb divisible by heads

    key = jax.random.PRNGKey(0)
    kd, kp = jax.random.split(key)
    data = jax.random.normal(kd, (N, C, 1, T), jnp.float32)
    params = init_params(kp, C, EMB, DEPTH)

    fwd = jax.jit(functools.partial(generator_forward, depth=DEPTH, num_heads=HEADS))
    out = jax.block_until_ready(fwd(data, params))
    assert out.shape == (N, C, 1, T), out.shape

    ref = reference_forward(data, params, DEPTH, HEADS)
    err = float(jnp.max(jnp.abs(out - ref) / (jnp.abs(ref) + 1.0)))
    assert err < 2e-2, f"mismatch vs reference: {err}"

    print("KERNEL_OK")
</pallas_src>

<mosaic_0001>
module attributes {stable_mosaic.version = 11 : i64} {
  func.func @generator_kernel(%arg0: i32, %arg1: i32, %arg2: memref<64x4xf32, #tpu.memory_space<vmem>>, %arg3: memref<4x16xbf16, #tpu.memory_space<vmem>>, %arg4: memref<1x16xf32, #tpu.memory_space<vmem>>, %arg5: memref<1x1x16xf32, #tpu.memory_space<vmem>>, %arg6: memref<1x1x16xf32, #tpu.memory_space<vmem>>, %arg7: memref<1x16x48xbf16, #tpu.memory_space<vmem>>, %arg8: memref<1x1x48xf32, #tpu.memory_space<vmem>>, %arg9: memref<1x16x16xbf16, #tpu.memory_space<vmem>>, %arg10: memref<1x1x16xf32, #tpu.memory_space<vmem>>, %arg11: memref<1x1x16xf32, #tpu.memory_space<vmem>>, %arg12: memref<1x1x16xf32, #tpu.memory_space<vmem>>, %arg13: memref<1x16x64xbf16, #tpu.memory_space<vmem>>, %arg14: memref<1x1x64xf32, #tpu.memory_space<vmem>>, %arg15: memref<1x64x16xbf16, #tpu.memory_space<vmem>>, %arg16: memref<1x1x16xf32, #tpu.memory_space<vmem>>, %arg17: memref<16x4xbf16, #tpu.memory_space<vmem>>, %arg18: memref<1x4xf32, #tpu.memory_space<vmem>>, %arg19: memref<64x4xf32, #tpu.memory_space<vmem>>, %arg20: memref<64x16xf32, #tpu.memory_space<vmem>>) attributes {dimension_semantics = [#tpu.dimension_semantics<parallel>, #tpu.dimension_semantics<arbitrary>], iteration_bounds = array<i64: 1, 3>, scalar_prefetch = 0 : i64, scratch_operands = 1 : i64, tpu.core_type = #tpu.core_type<tc>, window_params = [{transform_indices = @transform_0, window_bounds = array<i64: 64, 4>}, {pipeline_mode = #tpu.pipeline_mode<synchronous>, transform_indices = @transform_1, window_bounds = array<i64: 4, 16>}, {pipeline_mode = #tpu.pipeline_mode<synchronous>, transform_indices = @transform_2, window_bounds = array<i64: 1, 16>}, {transform_indices = @transform_3, window_bounds = array<i64: 1, 1, 16>}, {transform_indices = @transform_4, window_bounds = array<i64: 1, 1, 16>}, {transform_indices = @transform_5, window_bounds = array<i64: 1, 16, 48>}, {transform_indices = @transform_6, window_bounds = array<i64: 1, 1, 48>}, {transform_indices = @transform_7, window_bounds = array<i64: 1, 16, 16>}, {transform_indices = @transform_8, window_bounds = array<i64: 1, 1, 16>}, {transform_indices = @transform_9, window_bounds = array<i64: 1, 1, 16>}, {transform_indices = @transform_10, window_bounds = array<i64: 1, 1, 16>}, {transform_indices = @transform_11, window_bounds = array<i64: 1, 16, 64>}, {transform_indices = @transform_12, window_bounds = array<i64: 1, 1, 64>}, {transform_indices = @transform_13, window_bounds = array<i64: 1, 64, 16>}, {transform_indices = @transform_14, window_bounds = array<i64: 1, 1, 16>}, {pipeline_mode = #tpu.pipeline_mode<synchronous>, transform_indices = @transform_15, window_bounds = array<i64: 16, 4>}, {pipeline_mode = #tpu.pipeline_mode<synchronous>, transform_indices = @transform_16, window_bounds = array<i64: 1, 4>}, {transform_indices = @transform_17, window_bounds = array<i64: 64, 4>}]} {
    %c0_i32 = arith.constant 0 : i32
    %0 = arith.cmpi eq, %arg1, %c0_i32 : i32
    %1 = arith.extui %0 : i1 to i32
    %c0_i32_0 = arith.constant 0 : i32
    %2 = arith.cmpi ne, %1, %c0_i32_0 : i32
    scf.if %2 {
      %c0_85 = arith.constant 0 : index
      %c0_86 = arith.constant 0 : index
      %201 = vector.load %arg2[%c0_85, %c0_86] : memref<64x4xf32, #tpu.memory_space<vmem>>, vector<64x4xf32>
      %202 = arith.truncf %201 : vector<64x4xf32> to vector<64x4xbf16>
      %c0_87 = arith.constant 0 : index
      %c0_88 = arith.constant 0 : index
      %203 = vector.load %arg3[%c0_87, %c0_88] : memref<4x16xbf16, #tpu.memory_space<vmem>>, vector<4x16xbf16>
      %cst_89 = arith.constant dense<0.000000e+00> : vector<64x16xf32>
      %204 = tpu.matmul %202, %203, %cst_89 {dimension_numbers = #tpu.dot_dimension_numbers<[1], [0], [0], [1], [0, 0, 1, 1], [], []>} : vector<64x4xbf16>, vector<4x16xbf16>, vector<64x16xf32> -> vector<64x16xf32>
      %c0_90 = arith.constant 0 : index
      %c0_91 = arith.constant 0 : index
      %205 = vector.load %arg4[%c0_90, %c0_91] : memref<1x16xf32, #tpu.memory_space<vmem>>, vector<1x16xf32>
      %206 = vector.broadcast %205 : vector<1x16xf32> to vector<64x16xf32>
      %207 = arith.addf %204, %206 : vector<64x16xf32>
      %c0_92 = arith.constant 0 : index
      %c0_93 = arith.constant 0 : index
      %208 = vector.load %arg20[%c0_92, %c0_93] : memref<64x16xf32, #tpu.memory_space<vmem>>, vector<64x16xf32>
      tpu.vector_store %arg20[%c0_92, %c0_93], %207 {strides = array<i32>} : memref<64x16xf32, #tpu.memory_space<vmem>>, vector<64x16xf32>,
    } else {
    }
    %c0 = arith.constant 0 : index
    %c0_1 = arith.constant 0 : index
    %3 = vector.load %arg20[%c0, %c0_1] : memref<64x16xf32, #tpu.memory_space<vmem>>, vector<64x16xf32>
    %c0_2 = arith.constant 0 : index
    %c0_3 = arith.constant 0 : index
    %c0_4 = arith.constant 0 : index
    %4 = vector.load %arg5[%c0_2, %c0_3, %c0_4] : memref<1x1x16xf32, #tpu.memory_space<vmem>>, vector<1x1x16xf32>
    %5 = vector.shape_cast %4 : vector<1x1x16xf32> to vector<1x16xf32>
    %c0_5 = arith.constant 0 : index
    %c0_6 = arith.constant 0 : index
    %c0_7 = arith.constant 0 : index
    %6 = vector.load %arg6[%c0_5, %c0_6, %c0_7] : memref<1x1x16xf32, #tpu.memory_space<vmem>>, vector<1x1x16xf32>
    %7 = vector.shape_cast %6 : vector<1x1x16xf32> to vector<1x16xf32>
    %cst = arith.constant dense<0.000000e+00> : vector<64xf32>
    %8 = vector.multi_reduction <add>, %3, %cst [1] : vector<64x16xf32> to vector<64xf32>
    %9 = vector.shape_cast %8 : vector<64xf32> to vector<64x1xf32>
    %cst_8 = arith.constant 1.600000e+01 : f32
    %10 = vector.broadcast %cst_8 : f32 to vector<64x1xf32>
    %11 = arith.divf %9, %10 : vector<64x1xf32>
    %12 = vector.broadcast %11 : vector<64x1xf32> to vector<64x16xf32>
    %13 = arith.subf %3, %12 : vector<64x16xf32>
    %14 = arith.mulf %13, %13 : vector<64x16xf32>
    %cst_9 = arith.constant dense<0.000000e+00> : vector<64xf32>
    %15 = vector.multi_reduction <add>, %14, %cst_9 [1] : vector<64x16xf32> to vector<64xf32>
    %16 = vector.shape_cast %15 : vector<64xf32> to vector<64x1xf32>
    %cst_10 = arith.constant 1.600000e+01 : f32
    %17 = vector.broadcast %cst_10 : f32 to vector<64x1xf32>
    %18 = arith.divf %16, %17 : vector<64x1xf32>
    %cst_11 = arith.constant 9.99999974E-6 : f32
    %19 = vector.broadcast %cst_11 : f32 to vector<64x1xf32>
    %20 = arith.addf %18, %19 : vector<64x1xf32>
    %21 = math.rsqrt %20 : vector<64x1xf32>
    %22 = vector.broadcast %21 : vector<64x1xf32> to vector<64x16xf32>
    %23 = arith.mulf %13, %22 : vector<64x16xf32>
    %24 = vector.broadcast %5 : vector<1x16xf32> to vector<64x16xf32>
    %25 = arith.mulf %23, %24 : vector<64x16xf32>
    %26 = vector.broadcast %7 : vector<1x16xf32> to vector<64x16xf32>
    %27 = arith.addf %25, %26 : vector<64x16xf32>
    %28 = arith.truncf %27 : vector<64x16xf32> to vector<64x16xbf16>
    %c0_12 = arith.constant 0 : index
    %c0_13 = arith.constant 0 : index
    %c0_14 = arith.constant 0 : index
    %29 = vector.load %arg7[%c0_12, %c0_13, %c0_14] : memref<1x16x48xbf16, #tpu.memory_space<vmem>>, vector<1x16x48xbf16>
    %30 = vector.shape_cast %29 : vector<1x16x48xbf16> to vector<16x48xbf16>
    %cst_15 = arith.constant dense<0.000000e+00> : vector<64x48xf32>
    %31 = tpu.matmul %28, %30, %cst_15 {dimension_numbers = #tpu.dot_dimension_numbers<[1], [0], [0], [1], [0, 0, 1, 1], [], []>} : vector<64x16xbf16>, vector<16x48xbf16>, vector<64x48xf32> -> vector<64x48xf32>
    %c0_16 = arith.constant 0 : index
    %c0_17 = arith.constant 0 : index
    %c0_18 = arith.constant 0 : index
    %32 = vector.load %arg8[%c0_16, %c0_17, %c0_18] : memref<1x1x48xf32, #tpu.memory_space<vmem>>, vector<1x1x48xf32>
    %33 = vector.shape_cast %32 : vector<1x1x48xf32> to vector<1x48xf32>
    %34 = vector.broadcast %33 : vector<1x48xf32> to vector<64x48xf32>
    %35 = arith.addf %31, %34 : vector<64x48xf32>
    %36 = vector.extract_strided_slice %35 {offsets = [0, 0], sizes = [64, 16], strides = [1, 1]} : vector<64x48xf32> to vector<64x16xf32>
    %37 = arith.truncf %36 : vector<64x16xf32> to vector<64x16xbf16>
    %38 = vector.shape_cast %37 : vector<64x16xbf16> to vector<4x16x16xbf16>
    %39 = vector.extract_strided_slice %35 {offsets = [0, 16], sizes = [64, 16], strides = [1, 1]} : vector<64x48xf32> to vector<64x16xf32>
    %40 = arith.truncf %39 : vector<64x16xf32> to vector<64x16xbf16>
    %41 = vector.shape_cast %40 : vector<64x16xbf16> to vector<4x16x16xbf16>
    %42 = vector.extract_strided_slice %35 {offsets = [0, 32], sizes = [64, 16], strides = [1, 1]} : vector<64x48xf32> to vector<64x16xf32>
    %43 = arith.truncf %42 : vector<64x16xf32> to vector<64x16xbf16>
    %44 = vector.shape_cast %43 : vector<64x16xbf16> to vector<4x16x16xbf16>
    %45 = vector.extract_strided_slice %38 {offsets = [0, 0, 0], sizes = [4, 16, 4], strides = [1, 1, 1]} : vector<4x16x16xbf16> to vector<4x16x4xbf16>
    %46 = vector.extract_strided_slice %41 {offsets = [0, 0, 0], sizes = [4, 16, 4], strides = [1, 1, 1]} : vector<4x16x16xbf16> to vector<4x16x4xbf16>
    %47 = vector.extract_strided_slice %44 {offsets = [0, 0, 0], sizes = [4, 16, 4], strides = [1, 1, 1]} : vector<4x16x16xbf16> to vector<4x16x4xbf16>
    "tpu.trace_start"() <{level = 10 : i32, message = "bqd,bkd->bqk"}> : () -> ()
    %cst_19 = arith.constant dense<0.000000e+00> : vector<4x16x16xf32>
    %48 = tpu.matmul %45, %46, %cst_19 {dimension_numbers = #tpu.dot_dimension_numbers<[2], [2], [1], [1], [0, 0, 0, 1, 1, 1], [0], [0]>} : vector<4x16x4xbf16>, vector<4x16x4xbf16>, vector<4x16x16xf32> -> vector<4x16x16xf32>
    "tpu.trace_stop"() : () -> ()
    %cst_20 = arith.constant dense<0xFF800000> : vector<4x16xf32>
    %49 = vector.multi_reduction <maximumf>, %48, %cst_20 [2] : vector<4x16x16xf32> to vector<4x16xf32>
    %50 = vector.shape_cast %49 : vector<4x16xf32> to vector<4x16x1xf32>
    %51 = vector.broadcast %50 : vector<4x16x1xf32> to vector<4x16x16xf32>
    %52 = arith.subf %48, %51 : vector<4x16x16xf32>
    %53 = math.exp %52 : vector<4x16x16xf32>
    %cst_21 = arith.constant dense<0.000000e+00> : vector<4x16xf32>
    %54 = vector.multi_reduction <add>, %53, %cst_21 [2] : vector<4x16x16xf32> to vector<4x16xf32>
    %55 = vector.shape_cast %54 : vector<4x16xf32> to vector<4x16x1xf32>
    %56 = vector.broadcast %55 : vector<4x16x1xf32> to vector<4x16x16xf32>
    %57 = arith.divf %53, %56 : vector<4x16x16xf32>
    %58 = arith.truncf %57 : vector<4x16x16xf32> to vector<4x16x16xbf16>
    "tpu.trace_start"() <{level = 10 : i32, message = "bqk,bkd->bqd"}> : () -> ()
    %cst_22 = arith.constant dense<0.000000e+00> : vector<4x16x4xf32>
    %59 = tpu.matmul %58, %47, %cst_22 {dimension_numbers = #tpu.dot_dimension_numbers<[2], [1], [1], [2], [0, 0, 0, 1, 1, 2], [0], [0]>} : vector<4x16x16xbf16>, vector<4x16x4xbf16>, vector<4x16x4xf32> -> vector<4x16x4xf32>
    "tpu.trace_stop"() : () -> ()
    %60 = vector.extract_strided_slice %38 {offsets = [0, 0, 4], sizes = [4, 16, 4], strides = [1, 1, 1]} : vector<4x16x16xbf16> to vector<4x16x4xbf16>
    %61 = vector.extract_strided_slice %41 {offsets = [0, 0, 4], sizes = [4, 16, 4], strides = [1, 1, 1]} : vector<4x16x16xbf16> to vector<4x16x4xbf16>
    %62 = vector.extract_strided_slice %44 {offsets = [0, 0, 4], sizes = [4, 16, 4], strides = [1, 1, 1]} : vector<4x16x16xbf16> to vector<4x16x4xbf16>
    "tpu.trace_start"() <{level = 10 : i32, message = "bqd,bkd->bqk"}> : () -> ()
    %cst_23 = arith.constant dense<0.000000e+00> : vector<4x16x16xf32>
    %63 = tpu.matmul %60, %61, %cst_23 {dimension_numbers = #tpu.dot_dimension_numbers<[2], [2], [1], [1], [0, 0, 0, 1, 1, 1], [0], [0]>} : vector<4x16x4xbf16>, vector<4x16x4xbf16>, vector<4x16x16xf32> -> vector<4x16x16xf32>
    "tpu.trace_stop"() : () -> ()
    %cst_24 = arith.constant dense<0xFF800000> : vector<4x16xf32>
    %64 = vector.multi_reduction <maximumf>, %63, %cst_24 [2] : vector<4x16x16xf32> to vector<4x16xf32>
    %65 = vector.shape_cast %64 : vector<4x16xf32> to vector<4x16x1xf32>
    %66 = vector.broadcast %65 : vector<4x16x1xf32> to vector<4x16x16xf32>
    %67 = arith.subf %63, %66 : vector<4x16x16xf32>
    %68 = math.exp %67 : vector<4x16x16xf32>
    %cst_25 = arith.constant dense<0.000000e+00> : vector<4x16xf32>
    %69 = vector.multi_reduction <add>, %68, %cst_25 [2] : vector<4x16x16xf32> to vector<4x16xf32>
    %70 = vector.shape_cast %69 : vector<4x16xf32> to vector<4x16x1xf32>
    %71 = vector.broadcast %70 : vector<4x16x1xf32> to vector<4x16x16xf32>
    %72 = arith.divf %68, %71 : vector<4x16x16xf32>
    %73 = arith.truncf %72 : vector<4x16x16xf32> to vector<4x16x16xbf16>
    "tpu.trace_start"() <{level = 10 : i32, message = "bqk,bkd->bqd"}> : () -> ()
    %cst_26 = arith.constant dense<0.000000e+00> : vector<4x16x4xf32>
    %74 = tpu.matmul %73, %62, %cst_26 {dimension_numbers = #tpu.dot_dimension_numbers<[2], [1], [1], [2], [0, 0, 0, 1, 1, 2], [0], [0]>} : vector<4x16x16xbf16>, vector<4x16x4xbf16>, vector<4x16x4xf32> -> vector<4x16x4xf32>
    "tpu.trace_stop"() : () -> ()
    %75 = vector.extract_strided_slice %38 {offsets = [0, 0, 8], sizes = [4, 16, 4], strides = [1, 1, 1]} : vector<4x16x16xbf16> to vector<4x16x4xbf16>
    %76 = vector.extract_strided_slice %41 {offsets = [0, 0, 8], sizes = [4, 16, 4], strides = [1, 1, 1]} : vector<4x16x16xbf16> to vector<4x16x4xbf16>
    %77 = vector.extract_strided_slice %44 {offsets = [0, 0, 8], sizes = [4, 16, 4], strides = [1, 1, 1]} : vector<4x16x16xbf16> to vector<4x16x4xbf16>
    "tpu.trace_start"() <{level = 10 : i32, message = "bqd,bkd->bqk"}> : () -> ()
    %cst_27 = arith.constant dense<0.000000e+00> : vector<4x16x16xf32>
    %78 = tpu.matmul %75, %76, %cst_27 {dimension_numbers = #tpu.dot_dimension_numbers<[2], [2], [1], [1], [0, 0, 0, 1, 1, 1], [0], [0]>} : vector<4x16x4xbf16>, vector<4x16x4xbf16>, vector<4x16x16xf32> -> vector<4x16x16xf32>
    "tpu.trace_stop"() : () -> ()
    %cst_28 = arith.constant dense<0xFF800000> : vector<4x16xf32>
    %79 = vector.multi_reduction <maximumf>, %78, %cst_28 [2] : vector<4x16x16xf32> to vector<4x16xf32>
    %80 = vector.shape_cast %79 : vector<4x16xf32> to vector<4x16x1xf32>
    %81 = vector.broadcast %80 : vector<4x16x1xf32> to vector<4x16x16xf32>
    %82 = arith.subf %78, %81 : vector<4x16x16xf32>
    %83 = math.exp %82 : vector<4x16x16xf32>
    %cst_29 = arith.constant dense<0.000000e+00> : vector<4x16xf32>
    %84 = vector.multi_reduction <add>, %83, %cst_29 [2] : vector<4x16x16xf32> to vector<4x16xf32>
    %85 = vector.shape_cast %84 : vector<4x16xf32> to vector<4x16x1xf32>
    %86 = vector.broadcast %85 : vector<4x16x1xf32> to vector<4x16x16xf32>
    %87 = arith.divf %83, %86 : vector<4x16x16xf32>
    %88 = arith.truncf %87 : vector<4x16x16xf32> to vector<4x16x16xbf16>
    "tpu.trace_start"() <{level = 10 : i32, message = "bqk,bkd->bqd"}> : () -> ()
    %cst_30 = arith.constant dense<0.000000e+00> : vector<4x16x4xf32>
    %89 = tpu.matmul %88, %77, %cst_30 {dimension_numbers = #tpu.dot_dimension_numbers<[2], [1], [1], [2], [0, 0, 0, 1, 1, 2], [0], [0]>} : vector<4x16x16xbf16>, vector<4x16x4xbf16>, vector<4x16x4xf32> -> vector<4x16x4xf32>
    "tpu.trace_stop"() : () -> ()
    %90 = vector.extract_strided_slice %38 {offsets = [0, 0, 12], sizes = [4, 16, 4], strides = [1, 1, 1]} : vector<4x16x16xbf16> to vector<4x16x4xbf16>
    %91 = vector.extract_strided_slice %41 {offsets = [0, 0, 12], sizes = [4, 16, 4], strides = [1, 1, 1]} : vector<4x16x16xbf16> to vector<4x16x4xbf16>
    %92 = vector.extract_strided_slice %44 {offsets = [0, 0, 12], sizes = [4, 16, 4], strides = [1, 1, 1]} : vector<4x16x16xbf16> to vector<4x16x4xbf16>
    "tpu.trace_start"() <{level = 10 : i32, message = "bqd,bkd->bqk"}> : () -> ()
    %cst_31 = arith.constant dense<0.000000e+00> : vector<4x16x16xf32>
    %93 = tpu.matmul %90, %91, %cst_31 {dimension_numbers = #tpu.dot_dimension_numbers<[2], [2], [1], [1], [0, 0, 0, 1, 1, 1], [0], [0]>} : vector<4x16x4xbf16>, vector<4x16x4xbf16>, vector<4x16x16xf32> -> vector<4x16x16xf32>
    "tpu.trace_stop"() : () -> ()
    %cst_32 = arith.constant dense<0xFF800000> : vector<4x16xf32>
    %94 = vector.multi_reduction <maximumf>, %93, %cst_32 [2] : vector<4x16x16xf32> to vector<4x16xf32>
    %95 = vector.shape_cast %94 : vector<4x16xf32> to vector<4x16x1xf32>
    %96 = vector.broadcast %95 : vector<4x16x1xf32> to vector<4x16x16xf32>
    %97 = arith.subf %93, %96 : vector<4x16x16xf32>
    %98 = math.exp %97 : vector<4x16x16xf32>
    %cst_33 = arith.constant dense<0.000000e+00> : vector<4x16xf32>
    %99 = vector.multi_reduction <add>, %98, %cst_33 [2] : vector<4x16x16xf32> to vector<4x16xf32>
    %100 = vector.shape_cast %99 : vector<4x16xf32> to vector<4x16x1xf32>
    %101 = vector.broadcast %100 : vector<4x16x1xf32> to vector<4x16x16xf32>
    %102 = arith.divf %98, %101 : vector<4x16x16xf32>
    %103 = arith.truncf %102 : vector<4x16x16xf32> to vector<4x16x16xbf16>
    "tpu.trace_start"() <{level = 10 : i32, message = "bqk,bkd->bqd"}> : () -> ()
    %cst_34 = arith.constant dense<0.000000e+00> : vector<4x16x4xf32>
    %104 = tpu.matmul %103, %92, %cst_34 {dimension_numbers = #tpu.dot_dimension_numbers<[2], [1], [1], [2], [0, 0, 0, 1, 1, 2], [0], [0]>} : vector<4x16x16xbf16>, vector<4x16x4xbf16>, vector<4x16x4xf32> -> vector<4x16x4xf32>
    "tpu.trace_stop"() : () -> ()
    %105 = tpu.concatenate %59, %74, %89, %104 in 2 : vector<4x16x4xf32>, vector<4x16x4xf32>, vector<4x16x4xf32>, vector<4x16x4xf32> -> vector<4x16x16xf32>
    %106 = vector.shape_cast %105 : vector<4x16x16xf32> to vector<64x16xf32>
    %107 = arith.truncf %106 : vector<64x16xf32> to vector<64x16xbf16>
    %c0_35 = arith.constant 0 : index
    %c0_36 = arith.constant 0 : index
    %c0_37 = arith.constant 0 : index
    %108 = vector.load %arg9[%c0_35, %c0_36, %c0_37] : memref<1x16x16xbf16, #tpu.memory_space<vmem>>, vector<1x16x16xbf16>
    %109 = vector.shape_cast %108 : vector<1x16x16xbf16> to vector<16x16xbf16>
    %cst_38 = arith.constant dense<0.000000e+00> : vector<64x16xf32>
    %110 = tpu.matmul %107, %109, %cst_38 {dimension_numbers = #tpu.dot_dimension_numbers<[1], [0], [0], [1], [0, 0, 1, 1], [], []>} : vector<64x16xbf16>, vector<16x16xbf16>, vector<64x16xf32> -> vector<64x16xf32>
    %111 = arith.addf %3, %110 : vector<64x16xf32>
    %c0_39 = arith.constant 0 : index
    %c0_40 = arith.constant 0 : index
    %c0_41 = arith.constant 0 : index
    %112 = vector.load %arg10[%c0_39, %c0_40, %c0_41] : memref<1x1x16xf32, #tpu.memory_space<vmem>>, vector<1x1x16xf32>
    %113 = vector.shape_cast %112 : vector<1x1x16xf32> to vector<1x16xf32>
    %114 = vector.broadcast %113 : vector<1x16xf32> to vector<64x16xf32>
    %115 = arith.addf %111, %114 : vector<64x16xf32>
    %c0_42 = arith.constant 0 : index
    %c0_43 = arith.constant 0 : index
    %c0_44 = arith.constant 0 : index
    %116 = vector.load %arg11[%c0_42, %c0_43, %c0_44] : memref<1x1x16xf32, #tpu.memory_space<vmem>>, vector<1x1x16xf32>
    %117 = vector.shape_cast %116 : vector<1x1x16xf32> to vector<1x16xf32>
    %c0_45 = arith.constant 0 : index
    %c0_46 = arith.constant 0 : index
    %c0_47 = arith.constant 0 : index
    %118 = vector.load %arg12[%c0_45, %c0_46, %c0_47] : memref<1x1x16xf32, #tpu.memory_space<vmem>>, vector<1x1x16xf32>
    %119 = vector.shape_cast %118 : vector<1x1x16xf32> to vector<1x16xf32>
    %cst_48 = arith.constant dense<0.000000e+00> : vector<64xf32>
    %120 = vector.multi_reduction <add>, %115, %cst_48 [1] : vector<64x16xf32> to vector<64xf32>
    %121 = vector.shape_cast %120 : vector<64xf32> to vector<64x1xf32>
    %cst_49 = arith.constant 1.600000e+01 : f32
    %122 = vector.broadcast %cst_49 : f32 to vector<64x1xf32>
    %123 = arith.divf %121, %122 : vector<64x1xf32>
    %124 = vector.broadcast %123 : vector<64x1xf32> to vector<64x16xf32>
    %125 = arith.subf %115, %124 : vector<64x16xf32>
    %126 = arith.mulf %125, %125 : vector<64x16xf32>
    %cst_50 = arith.constant dense<0.000000e+00> : vector<64xf32>
    %127 = vector.multi_reduction <add>, %126, %cst_50 [1] : vector<64x16xf32> to vector<64xf32>
    %128 = vector.shape_cast %127 : vector<64xf32> to vector<64x1xf32>
    %cst_51 = arith.constant 1.600000e+01 : f32
    %129 = vector.broadcast %cst_51 : f32 to vector<64x1xf32>
    %130 = arith.divf %128, %129 : vector<64x1xf32>
    %cst_52 = arith.constant 9.99999974E-6 : f32
    %131 = vector.broadcast %cst_52 : f32 to vector<64x1xf32>
    %132 = arith.addf %130, %131 : vector<64x1xf32>
    %133 = math.rsqrt %132 : vector<64x1xf32>
    %134 = vector.broadcast %133 : vector<64x1xf32> to vector<64x16xf32>
    %135 = arith.mulf %125, %134 : vector<64x16xf32>
    %136 = vector.broadcast %117 : vector<1x16xf32> to vector<64x16xf32>
    %137 = arith.mulf %135, %136 : vector<64x16xf32>
    %138 = vector.broadcast %119 : vector<1x16xf32> to vector<64x16xf32>
    %139 = arith.addf %137, %138 : vector<64x16xf32>
    %140 = arith.truncf %139 : vector<64x16xf32> to vector<64x16xbf16>
    %c0_53 = arith.constant 0 : index
    %c0_54 = arith.constant 0 : index
    %c0_55 = arith.constant 0 : index
    %141 = vector.load %arg13[%c0_53, %c0_54, %c0_55] : memref<1x16x64xbf16, #tpu.memory_space<vmem>>, vector<1x16x64xbf16>
    %142 = vector.shape_cast %141 : vector<1x16x64xbf16> to vector<16x64xbf16>
    %cst_56 = arith.constant dense<0.000000e+00> : vector<64x64xf32>
    %143 = tpu.matmul %140, %142, %cst_56 {dimension_numbers = #tpu.dot_dimension_numbers<[1], [0], [0], [1], [0, 0, 1, 1], [], []>} : vector<64x16xbf16>, vector<16x64xbf16>, vector<64x64xf32> -> vector<64x64xf32>
    %c0_57 = arith.constant 0 : index
    %c0_58 = arith.constant 0 : index
    %c0_59 = arith.constant 0 : index
    %144 = vector.load %arg14[%c0_57, %c0_58, %c0_59] : memref<1x1x64xf32, #tpu.memory_space<vmem>>, vector<1x1x64xf32>
    %145 = vector.shape_cast %144 : vector<1x1x64xf32> to vector<1x64xf32>
    %146 = vector.broadcast %145 : vector<1x64xf32> to vector<64x64xf32>
    %147 = arith.addf %143, %146 : vector<64x64xf32>
    %cst_60 = arith.constant 5.000000e-01 : f32
    %148 = vector.broadcast %cst_60 : f32 to vector<64x64xf32>
    %149 = arith.mulf %148, %147 : vector<64x64xf32>
    %cst_61 = arith.constant 0.707106769 : f32
    %150 = vector.broadcast %cst_61 : f32 to vector<64x64xf32>
    %151 = arith.mulf %147, %150 : vector<64x64xf32>
    %152 = math.absf %151 : vector<64x64xf32>
    %cst_62 = arith.constant 0.327591091 : f32
    %153 = vector.broadcast %cst_62 : f32 to vector<64x64xf32>
    %154 = arith.mulf %153, %152 : vector<64x64xf32>
    %cst_63 = arith.constant 1.000000e+00 : f32
    %155 = vector.broadcast %cst_63 : f32 to vector<64x64xf32>
    %156 = arith.addf %155, %154 : vector<64x64xf32>
    %cst_64 = arith.constant 1.000000e+00 : f32
    %157 = vector.broadcast %cst_64 : f32 to vector<64x64xf32>
    %158 = arith.divf %157, %156 : vector<64x64xf32>
    %cst_65 = arith.constant 1.06140542 : f32
    %159 = vector.broadcast %cst_65 : f32 to vector<64x64xf32>
    %160 = arith.mulf %159, %158 : vector<64x64xf32>
    %cst_66 = arith.constant -1.45315206 : f32
    %161 = vector.broadcast %cst_66 : f32 to vector<64x64xf32>
    %162 = arith.addf %160, %161 : vector<64x64xf32>
    %163 = arith.mulf %162, %158 : vector<64x64xf32>
    %cst_67 = arith.constant 1.42141378 : f32
    %164 = vector.broadcast %cst_67 : f32 to vector<64x64xf32>
    %165 = arith.addf %163, %164 : vector<64x64xf32>
    %166 = arith.mulf %165, %158 : vector<64x64xf32>
    %cst_68 = arith.constant -0.284496725 : f32
    %167 = vector.broadcast %cst_68 : f32 to vector<64x64xf32>
    %168 = arith.addf %166, %167 : vector<64x64xf32>
    %169 = arith.mulf %168, %158 : vector<64x64xf32>
    %cst_69 = arith.constant 0.254829586 : f32
    %170 = vector.broadcast %cst_69 : f32 to vector<64x64xf32>
    %171 = arith.addf %169, %170 : vector<64x64xf32>
    %172 = arith.mulf %171, %158 : vector<64x64xf32>
    %cst_70 = arith.constant 0.000000e+00 : f32
    %173 = vector.broadcast %cst_70 : f32 to vector<64x64xf32>
    %174 = arith.subf %173, %152 : vector<64x64xf32>
    %175 = arith.mulf %174, %152 : vector<64x64xf32>
    %176 = math.exp %175 : vector<64x64xf32>
    %177 = arith.mulf %172, %176 : vector<64x64xf32>
    %cst_71 = arith.constant 1.000000e+00 : f32
    %178 = vector.broadcast %cst_71 : f32 to vector<64x64xf32>
    %179 = arith.subf %178, %177 : vector<64x64xf32>
    %cst_72 = arith.constant 0.000000e+00 : f32
    %180 = vector.broadcast %cst_72 : f32 to vector<64x64xf32>
    %181 = arith.cmpf oge, %151, %180 : vector<64x64xf32>
    %cst_73 = arith.constant 0.000000e+00 : f32
    %182 = vector.broadcast %cst_73 : f32 to vector<64x64xf32>
    %183 = arith.subf %182, %179 : vector<64x64xf32>
    %184 = arith.select %181, %179, %183 : vector<64x64xi1>, vector<64x64xf32>
    %cst_74 = arith.constant 1.000000e+00 : f32
    %185 = vector.broadcast %cst_74 : f32 to vector<64x64xf32>
    %186 = arith.addf %185, %184 : vector<64x64xf32>
    %187 = arith.mulf %149, %186 : vector<64x64xf32>
    %188 = arith.truncf %187 : vector<64x64xf32> to vector<64x64xbf16>
    %c0_75 = arith.constant 0 : index
    %c0_76 = arith.constant 0 : index
    %c0_77 = arith.constant 0 : index
    %189 = vector.load %arg15[%c0_75, %c0_76, %c0_77] : memref<1x64x16xbf16, #tpu.memory_space<vmem>>, vector<1x64x16xbf16>
    %190 = vector.shape_cast %189 : vector<1x64x16xbf16> to vector<64x16xbf16>
    %cst_78 = arith.constant dense<0.000000e+00> : vector<64x16xf32>
    %191 = tpu.matmul %188, %190, %cst_78 {dimension_numbers = #tpu.dot_dimension_numbers<[1], [0], [0], [1], [0, 0, 1, 1], [], []>} : vector<64x64xbf16>, vector<64x16xbf16>, vector<64x16xf32> -> vector<64x16xf32>
    %c0_79 = arith.constant 0 : index
    %c0_80 = arith.constant 0 : index
    %c0_81 = arith.constant 0 : index
    %192 = vector.load %arg16[%c0_79, %c0_80, %c0_81] : memref<1x1x16xf32, #tpu.memory_space<vmem>>, vector<1x1x16xf32>
    %193 = vector.shape_cast %192 : vector<1x1x16xf32> to vector<1x16xf32>
    %194 = vector.broadcast %193 : vector<1x16xf32> to vector<64x16xf32>
    %195 = arith.addf %191, %194 : vector<64x16xf32>
    %196 = arith.addf %115, %195 : vector<64x16xf32>
    %c0_82 = arith.constant 0 : index
    %c0_83 = arith.constant 0 : index
    %197 = vector.load %arg20[%c0_82, %c0_83] : memref<64x16xf32, #tpu.memory_space<vmem>>, vector<64x16xf32>
    tpu.vector_store %arg20[%c0_82, %c0_83], %196 {strides = array<i32>} : memref<64x16xf32, #tpu.memory_space<vmem>>, vector<64x16xf32>,
    %c2_i32 = arith.constant 2 : i32
    %198 = arith.cmpi eq, %arg1, %c2_i32 : i32
    %199 = arith.extui %198 : i1 to i32
    %c0_i32_84 = arith.constant 0 : i32
    %200 = arith.cmpi ne, %199, %c0_i32_84 : i32
    scf.if %200 {
      %201 = arith.truncf %196 : vector<64x16xf32> to vector<64x16xbf16>
      %c0_85 = arith.constant 0 : index
      %c0_86 = arith.constant 0 : index
      %202 = vector.load %arg17[%c0_85, %c0_86] : memref<16x4xbf16, #tpu.memory_space<vmem>>, vector<16x4xbf16>
      %cst_87 = arith.constant dense<0.000000e+00> : vector<64x4xf32>
      %203 = tpu.matmul %201, %202, %cst_87 {dimension_numbers = #tpu.dot_dimension_numbers<[1], [0], [0], [1], [0, 0, 1, 1], [], []>} : vector<64x16xbf16>, vector<16x4xbf16>, vector<64x4xf32> -> vector<64x4xf32>
      %c0_88 = arith.constant 0 : index
      %c0_89 = arith.constant 0 : index
      %204 = vector.load %arg18[%c0_88, %c0_89] : memref<1x4xf32, #tpu.memory_space<vmem>>, vector<1x4xf32>
      %205 = vector.broadcast %204 : vector<1x4xf32> to vector<64x4xf32>
      %206 = arith.addf %203, %205 : vector<64x4xf32>
      %c0_90 = arith.constant 0 : index
      %c0_91 = arith.constant 0 : index
      %207 = vector.load %arg19[%c0_90, %c0_91] : memref<64x4xf32, #tpu.memory_space<vmem>>, vector<64x4xf32>
      tpu.vector_store %arg19[%c0_90, %c0_91], %206 {strides = array<i32>} : memref<64x4xf32, #tpu.memory_space<vmem>>, vector<64x4xf32>,
    } else {
    }
    return
  }
  func.func @transform_0(%arg0: i32, %arg1: i32) -> (i32, i32) {
    %c0_i32 = arith.constant 0 : i32
    %c0_i32_0 = arith.constant 0 : i32
    return %arg0, %c0_i32 : i32, i32
  }
  func.func @transform_1(%arg0: i32, %arg1: i32) -> (i32, i32) {
    %c0_i32 = arith.constant 0 : i32
    %c0_i32_0 = arith.constant 0 : i32
    %c0_i32_1 = arith.constant 0 : i32
    return %c0_i32, %c0_i32_0 : i32, i32
  }
  func.func @transform_2(%arg0: i32, %arg1: i32) -> (i32, i32) {
    %c0_i32 = arith.constant 0 : i32
    %c0_i32_0 = arith.constant 0 : i32
    %c0_i32_1 = arith.constant 0 : i32
    return %c0_i32, %c0_i32_0 : i32, i32
  }
  func.func @transform_3(%arg0: i32, %arg1: i32) -> (i32, i32, i32) {
    %c0_i32 = arith.constant 0 : i32
    %c0_i32_0 = arith.constant 0 : i32
    %c0_i32_1 = arith.constant 0 : i32
    return %arg1, %c0_i32, %c0_i32_0 : i32, i32, i32
  }
  func.func @transform_4(%arg0: i32, %arg1: i32) -> (i32, i32, i32) {
    %c0_i32 = arith.constant 0 : i32
    %c0_i32_0 = arith.constant 0 : i32
    %c0_i32_1 = arith.constant 0 : i32
    return %arg1, %c0_i32, %c0_i32_0 : i32, i32, i32
  }
  func.func @transform_5(%arg0: i32, %arg1: i32) -> (i32, i32, i32) {
    %c0_i32 = arith.constant 0 : i32
    %c0_i32_0 = arith.constant 0 : i32
    %c0_i32_1 = arith.constant 0 : i32
    return %arg1, %c0_i32, %c0_i32_0 : i32, i32, i32
  }
  func.func @transform_6(%arg0: i32, %arg1: i32) -> (i32, i32, i32) {
    %c0_i32 = arith.constant 0 : i32
    %c0_i32_0 = arith.constant 0 : i32
    %c0_i32_1 = arith.constant 0 : i32
    return %arg1, %c0_i32, %c0_i32_0 : i32, i32, i32
  }
  func.func @transform_7(%arg0: i32, %arg1: i32) -> (i32, i32, i32) {
    %c0_i32 = arith.constant 0 : i32
    %c0_i32_0 = arith.constant 0 : i32
    %c0_i32_1 = arith.constant 0 : i32
    return %arg1, %c0_i32, %c0_i32_0 : i32, i32, i32
  }
  func.func @transform_8(%arg0: i32, %arg1: i32) -> (i32, i32, i32) {
    %c0_i32 = arith.constant 0 : i32
    %c0_i32_0 = arith.constant 0 : i32
    %c0_i32_1 = arith.constant 0 : i32
    return %arg1, %c0_i32, %c0_i32_0 : i32, i32, i32
  }
  func.func @transform_9(%arg0: i32, %arg1: i32) -> (i32, i32, i32) {
    %c0_i32 = arith.constant 0 : i32
    %c0_i32_0 = arith.constant 0 : i32
    %c0_i32_1 = arith.constant 0 : i32
    return %arg1, %c0_i32, %c0_i32_0 : i32, i32, i32
  }
  func.func @transform_10(%arg0: i32, %arg1: i32) -> (i32, i32, i32) {
    %c0_i32 = arith.constant 0 : i32
    %c0_i32_0 = arith.constant 0 : i32
    %c0_i32_1 = arith.constant 0 : i32
    return %arg1, %c0_i32, %c0_i32_0 : i32, i32, i32
  }
  func.func @transform_11(%arg0: i32, %arg1: i32) -> (i32, i32, i32) {
    %c0_i32 = arith.constant 0 : i32
    %c0_i32_0 = arith.constant 0 : i32
    %c0_i32_1 = arith.constant 0 : i32
    return %arg1, %c0_i32, %c0_i32_0 : i32, i32, i32
  }
  func.func @transform_12(%arg0: i32, %arg1: i32) -> (i32, i32, i32) {
    %c0_i32 = arith.constant 0 : i32
    %c0_i32_0 = arith.constant 0 : i32
    %c0_i32_1 = arith.constant 0 : i32
    return %arg1, %c0_i32, %c0_i32_0 : i32, i32, i32
  }
  func.func @transform_13(%arg0: i32, %arg1: i32) -> (i32, i32, i32) {
    %c0_i32 = arith.constant 0 : i32
    %c0_i32_0 = arith.constant 0 : i32
    %c0_i32_1 = arith.constant 0 : i32
    return %arg1, %c0_i32, %c0_i32_0 : i32, i32, i32
  }
  func.func @transform_14(%arg0: i32, %arg1: i32) -> (i32, i32, i32) {
    %c0_i32 = arith.constant 0 : i32
    %c0_i32_0 = arith.constant 0 : i32
    %c0_i32_1 = arith.constant 0 : i32
    return %arg1, %c0_i32, %c0_i32_0 : i32, i32, i32
  }
  func.func @transform_15(%arg0: i32, %arg1: i32) -> (i32, i32) {
    %c0_i32 = arith.constant 0 : i32
    %c0_i32_0 = arith.constant 0 : i32
    %c0_i32_1 = arith.constant 0 : i32
    return %c0_i32, %c0_i32_0 : i32, i32
  }
  func.func @transform_16(%arg0: i32, %arg1: i32) -> (i32, i32) {
    %c0_i32 = arith.constant 0 : i32
    %c0_i32_0 = arith.constant 0 : i32
    %c0_i32_1 = arith.constant 0 : i32
    return %c0_i32, %c0_i32_0 : i32, i32
  }
  func.func @transform_17(%arg0: i32, %arg1: i32) -> (i32, i32) {
    %c0_i32 = arith.constant 0 : i32
    %c0_i32_0 = arith.constant 0 : i32
    return %arg0, %c0_i32 : i32, i32
  }
}

</mosaic_0001>

<bundles_post_ra>
// kernel: generator_forward.1
= control target key start
LH: loop header
LB: loop body
LE: loop exit
PB: predicated region body
PF: predicated region fallthrough
CT: control target
= control target key end

     0   :  { %s7727_s0 = inlined_call_operand.hbm [shape: f32[64,4], index: 0, kind: input, shape index: {}]   ;;  %s7728_s1 = inlined_call_operand.hbm [shape: bf16[4,16], index: 1, kind: input, shape index: {}]   ;;  %s7729_s2 = inlined_call_operand.hbm [shape: f32[1,16], index: 2, kind: input, shape index: {}]   ;;  %s7730_s3 = inlined_call_operand.hbm [shape: f32[3,1,16], index: 3, kind: input, shape index: {}]   ;;  %s7731_s4 = inlined_call_operand.hbm [shape: f32[3,1,16], index: 4, kind: input, shape index: {}]   ;;  %s7732_s5 = inlined_call_operand.hbm [shape: bf16[3,16,48], index: 5, kind: input, shape index: {}]   ;;  %s7733_s6 = inlined_call_operand.hbm [shape: f32[3,1,48], index: 6, kind: input, shape index: {}]   ;;  %s7734_s7 = inlined_call_operand.hbm [shape: bf16[3,16,16], index: 7, kind: input, shape index: {}]   ;;  %s7735_s8 = inlined_call_operand.hbm [shape: f32[3,1,16], index: 8, kind: input, shape index: {}]   ;;  %s7736_s9 = inlined_call_operand.hbm [shape: f32[3,1,16], index: 9, kind: input, shape index: {}]   ;;  %s7737_s10 = inlined_call_operand.hbm [shape: f32[3,1,16], index: 10, kind: input, shape index: {}]   ;;  %s7738_s11 = inlined_call_operand.hbm [shape: bf16[3,16,64], index: 11, kind: input, shape index: {}]   ;;  %s7739_s12 = inlined_call_operand.hbm [shape: f32[3,1,64], index: 12, kind: input, shape index: {}]   ;;  %s7740_s13 = inlined_call_operand.hbm [shape: bf16[3,64,16], index: 13, kind: input, shape index: {}]   ;;  %s7741_s14 = inlined_call_operand.hbm [shape: f32[3,1,16], index: 14, kind: input, shape index: {}]   ;;  %s7742_s15 = inlined_call_operand.hbm [shape: bf16[16,4], index: 15, kind: input, shape index: {}]   ;;  %s7743_s16 = inlined_call_operand.hbm [shape: f32[1,4], index: 16, kind: input, shape index: {}]   ;;  %s7744_s17 = inlined_call_operand.hbm [shape: f32[64,4], index: 17, kind: output, shape index: {}]  }
   0x1   :  { %7782 = sst [smem:[#allocation50_spill]] %s7727_s0 }
   0x2   :  { %7783 = sst [smem:[#allocation51_spill]] %s7728_s1 }
   0x3   :  { %7784 = sst [smem:[#allocation52_spill]] %s7730_s3 }
   0x4   :  { %7785 = sst [smem:[#allocation53_spill]] %s7732_s5 }
   0x5   :  { %7786 = sst [smem:[#allocation54_spill]] %s7734_s7 }
   0x6   :  { %7787 = sst [smem:[#allocation55_spill]] %s7736_s9 }
   0x7   :  { %7788 = sst [smem:[#allocation56_spill]] %s7737_s10 }
   0x8   :  { %7789 = sst [smem:[#allocation57_spill]] %s7738_s11 }
   0x9   :  { %7790 = sst [smem:[#allocation58_spill]] %s7739_s12 }
   0xa   :  { %7791 = sst [smem:[#allocation59_spill]] %s7741_s14 }
   0xb   :  { %7792 = sst [smem:[#allocation60_spill]] %s7742_s15 }
   0xc   :  { %7793 = sst [smem:[#allocation61_spill]] %s7744_s17 }
   0xd   :  { %22 = vsyncpa [#allocation4], 0 }
   0xe   :  { %23 = vsyncpa [#allocation7], 0 }
   0xf   :  { %24 = vsyncpa [#allocation10], 0 }
  0x10   :  { %26 = vsyncpa [#allocation10 + $0x1], 0 }
  0x11   :  { %27 = vsyncpa [#allocation13], 0 }
  0x12   :  { %29 = vsyncpa [#allocation13 + $0x1], 0 }
  0x13   :  { %30 = vsyncpa [#allocation16], 0 }
  0x14   :  { %32 = vsyncpa [#allocation16 + $0x1], 0 }
  0x15   :  { %33 = vsyncpa [#allocation19], 0 }
  0x16   :  { %35 = vsyncpa [#allocation19 + $0x1], 0 }
  0x17   :  { %36 = vsyncpa [#allocation22], 0 }
  0x18   :  { %38 = vsyncpa [#allocation22 + $0x1], 0 }
  0x19   :  { %39 = vsyncpa [#allocation25], 0 }
  0x1a   :  { %41 = vsyncpa [#allocation25 + $0x1], 0 }
  0x1b   :  { %42 = vsyncpa [#allocation28], 0 }
  0x1c   :  { %43 = vsyncpa [#allocation5], 0  ;;  %s6262_s24 = smov 0   ;;  %s6264_s25 = smov 0  }
  0x1d   :  { %s6266_s26 = smov 0   ;;  %s6268_s27 = smov 0  }
  0x1e   :  { %s6270_s28 = smov 0   ;;  %s6272_s29 = smov 0  }
  0x1f LB: > { %7794 = sst [smem:[#allocation41_spill]] %s6115_s25  ;;  %s6291_s0 = sadd.s32 4294967295, %s6131_s29   ;;  %s6131_s29 = sphi %s6272_s29, %s49_s29   ;;  %s6127_s28 = sphi %s6270_s28, %s7869_s28   ;;  %s6123_s27 = sphi %s6268_s27, %s7868_s27   ;;  %s6119_s26 = sphi %s6266_s26, %s7866_s26   ;;  %s6115_s25 = sphi %s6264_s25, %s7865_s25   ;;  %s6111_s24 = sphi %s6262_s24, %s7864_s24  }
  0x20   : > { %7795 = sst [smem:[#allocation42_spill]] %s6119_s26  ;;  %p143_p0 = scmp.ne.s32.totalorder %s6119_s26, %s6115_s25 }
  0x21   : > { %7796 = sst [smem:[#allocation43_spill]] %s6123_s27  ;;  %p144_p1 = scmp.eq.s32.totalorder %s6131_s29, 0 }
  0x22   : > { %7797 = sst [smem:[#allocation44_spill]] %s6131_s29  ;;  %p149_p2 = scmp.ne.s32.totalorder %s6115_s25, %s6111_s24 }
  0x23   : > { %7798 = sst [smem:[#allocation45_spill]] %s6291_s0  ;;  %p7757_p3 = scmp.eq.s32.totalorder %s6291_s0, 0 }
  0x24   : > { %p145_p4 = por %p144_p1, %p143_p0  ;;  %p4578_p5 = scmp.ge.s32.totalorder %s6131_s29, 1 }
  0x25   : > { %p6302_p6 = por %p7757_p3, %p149_p2  ;;  %p514_p7 = scmp.lt.s32.totalorder %s6131_s29, 4 }
  0x26   : > { %s6133_s1 = smov [#allocation6]   ;;  %p5168_p10 = scmp.lt.s32.totalorder %s6131_s29, 3 }
  0x27   : > { %s7799_s18 = scalar_select %p6302_p6, 1, 0 }
  0x28   : > { %p6307_p8 = pnand %p4578_p5, %p514_p7  ;;  %s543_s20 = sshll.u32 %s6133_s1, 4  ;;  %s544_s20 = int_to_ptr.vmem [resolvable:$true] %s543_s20 }
  0x29   : > { %7800 = sst [smem:[#allocation46_spill]] %s7799_s18  ;;  %p6320_p12 = pnand %p5168_p10, %p145_p4 }
  0x2a   : > { %s7801_s19 = scalar_select %p6307_p8, 1, 0 }
  0x2b   : > { %p5110_p9 = pneg %p6307_p8  ;;  %s6134_s23 = smov [#allocation27]  }
  0x2c   : > { %7802 = sst [smem:[#allocation47_spill]] %s7801_s19  ;;  %s564_s24 = sshll.u32 %s6134_s23, 4  ;;  %s565_s24 = int_to_ptr.vmem [resolvable:$true] %s564_s24 }
  0x2d   : > { %p6316_p11 = pnand %p5110_p9, %p7757_p3  ;;  %s7805_s27 = sld [smem:[#allocation51_spill]] }
  0x2e   : > { %s7804_s22 = scalar_select %p6320_p12, 1, 0 }
  0x2f   : > { %s7803_s21 = scalar_select %p6316_p11, 1, 0 }
  0x30   : > { %p6332_p0 = pneg %p6316_p11 }
  0x32   : > { %s7807_s0 = scalar_select %p6332_p0, 1, 0 }
  0x33   : > { %s7806_s18 = smov %s7805_s27  ;;  %s5519_s1 = scalar_lea.hbm %s7805_s27, 32 }
  0x34   : > { %p5520_p13 = scmp.ne.s32.totalorder %s7806_s18, %s5519_s1  ;;  %p5526_p4 = scmp.lt.u32.totalorder %s5519_s1, %s7806_s18 }
  0x36   : > { %p5522_p1 = pnand %p6332_p0, %p5520_p13 }
  0x38   : > { %p5523_p2 = pneg %p5522_p1 }
  0x3a   : > { %p5528_p5 = pnand %p5526_p4, %p5523_p2 }
  0x3c   : > { %5531 = shalt.err (!%p5528_p5)
}
  0x3d   : > { %s5532_s17 = scalar_lea.vmem %s544_s20, 32  ;;  %p5540_p3 = scmp.lt.s32.totalorder %s544_s20, %s544_s20 }
  0x3e   : > { %p5533_p7 = scmp.ne.s32.totalorder %s544_s20, %s5532_s17  ;;  %p5541_p6 = scmp.lt.s32.totalorder %s5532_s17, %s5532_s17 }
  0x40   : > { %p5535_p9 = pnand %p5533_p7, %p6332_p0  ;;  %p5542_p8 = por %p5541_p6, %p5540_p3 }
  0x42   : > { %p5536_p10 = pneg %p5535_p9 }
  0x44   : > { %p5543_p12 = pnand %p5542_p8, %p5536_p10 }
  0x46   : > { %5546 = shalt.err (!%p5543_p12)
}
  0x47   : > { %5116 = dma.hbm_to_vmem [thread:$0]  (!%p6316_p11), %s7806_s18, 32, %s544_s20, [#allocation7]  }
  0x48   : > { %s7808_s15 = sld [smem:[#allocation60_spill]] }
  0x4e   : > { %s5547_s30 = scalar_lea.hbm %s7808_s15, 128 }
  0x4f   : > { %p5548_p13 = scmp.ne.s32.totalorder %s7808_s15, %s5547_s30  ;;  %p5554_p8 = scmp.lt.u32.totalorder %s5547_s30, %s7808_s15 }
  0x51   : > { %p5550_p3 = pnand %p5548_p13, %p6332_p0 }
  0x53   : > { %p5551_p6 = pneg %p5550_p3 }
  0x55   : > { %p5556_p12 = pnand %p5554_p8, %p5551_p6 }
  0x57   : > { %5559 = shalt.err (!%p5556_p12)
}
  0x58   : > { %s5560_s25 = scalar_lea.vmem %s565_s24, 128  ;;  %p5568_p5 = scmp.lt.s32.totalorder %s565_s24, %s565_s24 }
  0x59   : > { %p5561_p1 = scmp.ne.s32.totalorder %s565_s24, %s5560_s25  ;;  %p5569_p7 = scmp.lt.s32.totalorder %s5560_s25, %s5560_s25 }
  0x5b   : > { %p5563_p2 = pnand %p5561_p1, %p6332_p0  ;;  %p5570_p9 = por %p5569_p7, %p5568_p5 }
  0x5d   : > { %p5564_p4 = pneg %p5563_p2 }
  0x5f   : > { %p5571_p10 = pnand %p5570_p9, %p5564_p4 }
  0x61   : > { %5574 = shalt.err (!%p5571_p10)
}
  0x62   : > { %s7761_s20 = smov 64   ;;  %s7763_s27 = smov 4  }
  0x63   : > { %5122 = dma.hbm_to_vmem [thread:$0]  (!%p6316_p11), %s7808_s15, 128, %s565_s24, [#allocation28], %s7761_s20, %s7761_s20, %s7763_s27  }
  0x64   : > { %s6370_s30 = sand.u32 1, %s6131_s29   ;;  %s58_s19 = sadd.s32 1, %s6127_s28 }
  0x65   : > { %p59_p13 = scmp.ge.s32.totalorder %s58_s19, 3  ;;  %s6374_s23 = sand.u32 1, %s6119_s26  }
  0x66   : > { %s6377_s1 = sshll.u32 %s6127_s28, 4  ;;  %s7810_s3 = sld [smem:[#allocation52_spill]] }
  0x67   : > { %s7871_s19 = smov (%p59_p13, %s58_s19), 0  ;;  %s592_s24 = scalar_lea.vmem [#allocation9], %s6374_s23 }
  0x68   : > { %7809 = sst [smem:[#allocation48_spill]] %s7871_s19  ;;  %s599_s14 = sshll.u32 %s592_s24, 4  ;;  %s6390_s14 = int_to_ptr.vmem [resolvable:$true] %s599_s14 }
  0x69   : > { %s133_s20 = ssub.s32 %s6127_s28, %s7871_s19  ;;  %p7812_p8 = scmp.ne.s32.totalorder %s7804_s22, 0 }
  0x6a   : > { %p6392_p3 = scmp.eq.s32.totalorder %s133_s20, 0 }
  0x6b   : > { %p6401_p12 = pneg %p7812_p8 }
  0x6c   : > { %s6385_s12 = scalar_lea.hbm %s7810_s3, %s6377_s1  ;;  %s5580_s19 = scalar_lea.hbm %s7810_s3, 48 }
  0x6d   : > { %s7811_s27 = scalar_select %p6392_p3, 1, 0 }
  0x6e   : > { %s5575_s18 = scalar_lea.hbm %s6385_s12, 16  ;;  %p5581_p4 = scmp.lt.u32.totalorder %s6385_s12, %s7810_s3 }
  0x6f   : > { %p5576_p6 = scmp.ne.s32.totalorder %s6385_s12, %s5575_s18  ;;  %p5582_p5 = scmp.lt.u32.totalorder %s5580_s19, %s5575_s18 }
  0x70   : > { %s7813_s17 = scalar_select %p6401_p12, 1, 0 }
  0x71   : > { %p5578_p1 = pnand %p6401_p12, %p5576_p6  ;;  %p5583_p7 = por %p5582_p5, %p5581_p4 }
  0x72   : > { %p5584_p9 = scmp.lt.u32.totalorder %s5575_s18, %s6385_s12 }
  0x73   : > { %p5579_p2 = pneg %p5578_p1 }
  0x74   : > { %p5585_p10 = por %p5584_p9, %p5583_p7 }
  0x76   : > { %p5586_p13 = pnand %p5585_p10, %p5579_p2 }
  0x78   : > { %5589 = shalt.err (!%p5586_p13)
}
  0x79   : > { %s5590_s15 = scalar_lea.vmem %s6390_s14, 16  ;;  %s6137_s25 = smov [#allocation9]  }
  0x7a   : > { %p5591_p6 = scmp.ne.s32.totalorder %s6390_s14, %s5590_s15  ;;  %s5595_s24 = sshll.u32 %s6137_s25, 4  ;;  %s5596_s24 = int_to_ptr.vmem [resolvable:$false] %s5595_s24 }
  0x7b   : > { %s5597_s29 = scalar_lea.vmem %s5596_s24, 32  ;;  %p5598_p0 = scmp.lt.s32.totalorder %s6390_s14, %s5596_s24 }
  0x7c   : > { %p5593_p1 = pnand %p5591_p6, %p6401_p12  ;;  %p5599_p3 = scmp.lt.s32.totalorder %s5597_s29, %s5590_s15 }
  0x7e   : > { %p5594_p11 = pneg %p5593_p1  ;;  %p5600_p4 = por %p5599_p3, %p5598_p0 }
  0x80   : > { %p5601_p5 = pnand %p5600_p4, %p5594_p11 }
  0x82   : > { %5604 = shalt.err (!%p5601_p5)
}
  0x83   : > { %s7814_s18 = scalar_lea.sflag [#allocation10], %s6370_s30  ;;  %s7815_s19 = sadd.s32 1, %s6119_s26 }
  0x84   : > { %5129 = dma.hbm_to_vmem [thread:$0]  (!%p7812_p8), %s6385_s12, 16, %s6390_s14, %s7814_s18  }
  0x85   : > { %p7816_p2 = scmp.ne.s32.totalorder %s7811_s27, 0  ;;  %s6434_s20 = sshll.u32 %s6374_s23, 3 }
  0x86   : > { %s6437_s25 = sshll.u32 %s6127_s28, 7  ;;  %s7818_s5 = sld [smem:[#allocation53_spill]] }
  0x87   : > { %s6431_s15 = scalar_select %p7816_p2, %s6119_s26, %s7815_s19  }
  0x88   : > { %s627_s12 = scalar_lea.vmem [#allocation12], %s6434_s20  ;;  %s7774_s27 = scalar_lea.sflag [#allocation13], %s6370_s30 }
  0x89   : > { %7817 = sst [smem:[#allocation49_spill]] %s6431_s15  ;;  %s634_s14 = sshll.u32 %s627_s12, 4  ;;  %s6446_s14 = int_to_ptr.vmem [resolvable:$true] %s634_s14 }
  0x8c   : > { %s6443_s3 = scalar_lea.hbm %s7818_s5, %s6437_s25  ;;  %s5610_s24 = scalar_lea.hbm %s7818_s5, 384 }
  0x8d   : > { %s5605_s18 = scalar_lea.hbm %s6443_s3, 128  ;;  %p5611_p7 = scmp.lt.u32.totalorder %s6443_s3, %s7818_s5 }
  0x8e   : > { %p5606_p11 = scmp.ne.s32.totalorder %s6443_s3, %s5605_s18  ;;  %p5612_p9 = scmp.lt.u32.totalorder %s5610_s24, %s5605_s18 }
  0x8f   : > { %p5614_p13 = scmp.lt.u32.totalorder %s5605_s18, %s6443_s3 }
  0x90   : > { %p5608_p0 = pnand %p5606_p11, %p6401_p12  ;;  %p5613_p10 = por %p5612_p9, %p5611_p7 }
  0x92   : > { %p5609_p3 = pneg %p5608_p0  ;;  %p5615_p6 = por %p5614_p13, %p5613_p10 }
  0x94   : > { %p5616_p1 = pnand %p5615_p6, %p5609_p3 }
  0x96   : > { %5619 = shalt.err (!%p5616_p1)
}
  0x97   : > { %s5620_s12 = scalar_lea.vmem %s6446_s14, 128  ;;  %s6138_s15 = smov [#allocation12]  }
  0x98   : > { %p5621_p4 = scmp.ne.s32.totalorder %s6446_s14, %s5620_s12  ;;  %s5625_s19 = sshll.u32 %s6138_s15, 4  ;;  %s5626_s19 = int_to_ptr.vmem [resolvable:$false] %s5625_s19 }
  0x99   : > { %s5627_s26 = scalar_lea.vmem %s5626_s19, 256  ;;  %p5628_p11 = scmp.lt.s32.totalorder %s6446_s14, %s5626_s19 }
  0x9a   : > { %p5623_p5 = pnand %p5621_p4, %p6401_p12  ;;  %p5629_p0 = scmp.lt.s32.totalorder %s5627_s26, %s5620_s12 }
  0x9c   : > { %p5624_p2 = pneg %p5623_p5  ;;  %p5630_p7 = por %p5629_p0, %p5628_p11 }
  0x9e   : > { %p5631_p9 = pnand %p5630_p7, %p5624_p2 }
  0xa0   : > { %5634 = shalt.err (!%p5631_p9)
}
  0xa1   : > { %s7819_s18 = smov 4   ;;  %s7820_s24 = smov 64  }
  0xa2   : > { %5135 = dma.hbm_to_vmem [thread:$0]  (!%p7812_p8), %s6443_s3, 128, %s6446_s14, %s7774_s27, %s7820_s24, %s7820_s24, %s7819_s18  }
  0xa3   : > { %s7821_s7 = sld [smem:[#allocation54_spill]]  ;;  %s665_s19 = scalar_lea.vmem [#allocation15], %s6434_s20 }
  0xa4   : > { %s672_s26 = sshll.u32 %s665_s19, 4  ;;  %s7775_s5 = scalar_lea.sflag [#allocation16], %s6370_s30  ;;  %s6482_s26 = int_to_ptr.vmem [resolvable:$true] %s672_s26 }
  0xa9   : > { %s6479_s12 = scalar_lea.hbm %s7821_s7, %s6437_s25  ;;  %s5640_s29 = scalar_lea.hbm %s7821_s7, 384 }
  0xaa   : > { %s5635_s10 = scalar_lea.hbm %s6479_s12, 128  ;;  %p5641_p6 = scmp.lt.u32.totalorder %s6479_s12, %s7821_s7 }
  0xab   : > { %p5636_p3 = scmp.ne.s32.totalorder %s6479_s12, %s5635_s10  ;;  %p5642_p1 = scmp.lt.u32.totalorder %s5640_s29, %s5635_s10 }
  0xac   : > { %p5644_p5 = scmp.lt.u32.totalorder %s5635_s10, %s6479_s12 }
  0xad   : > { %p5638_p10 = pnand %p5636_p3, %p6401_p12  ;;  %p5643_p4 = por %p5642_p1, %p5641_p6 }
  0xaf   : > { %p5639_p13 = pneg %p5638_p10  ;;  %p5645_p2 = por %p5644_p5, %p5643_p4 }
  0xb1   : > { %p5646_p11 = pnand %p5645_p2, %p5639_p13 }
  0xb3   : > { %5649 = shalt.err (!%p5646_p11)
}
  0xb4   : > { %s5650_s19 = scalar_lea.vmem %s6482_s26, 128  ;;  %s6139_s3 = smov [#allocation15]  }
  0xb5   : > { %p5651_p0 = scmp.ne.s32.totalorder %s6482_s26, %s5650_s19  ;;  %s5655_s14 = sshll.u32 %s6139_s3, 4  ;;  %s5656_s14 = int_to_ptr.vmem [resolvable:$false] %s5655_s14 }
  0xb6   : > { %s5657_s27 = scalar_lea.vmem %s5656_s14, 256  ;;  %p5658_p3 = scmp.lt.s32.totalorder %s6482_s26, %s5656_s14 }
  0xb7   : > { %p5653_p7 = pnand %p5651_p0, %p6401_p12  ;;  %p5659_p10 = scmp.lt.s32.totalorder %s5657_s27, %s5650_s19 }
  0xb9   : > { %p5654_p9 = pneg %p5653_p7  ;;  %p5660_p6 = por %p5659_p10, %p5658_p3 }
  0xbb   : > { %p5661_p1 = pnand %p5660_p6, %p5654_p9 }
  0xbd   : > { %5664 = shalt.err (!%p5661_p1)
}
  0xbe   : > { %5141 = dma.hbm_to_vmem [thread:$0]  (!%p7812_p8), %s6479_s12, 128, %s6482_s26, %s7775_s5, %s7820_s24, %s7820_s24, %s7819_s18  }
  0xbf   : > { %s7822_s9 = sld [smem:[#allocation55_spill]]  ;;  %s702_s19 = scalar_lea.vmem [#allocation18], %s6374_s23 }
  0xc0   : > { %s709_s3 = sshll.u32 %s702_s19, 4  ;;  %s710_s3 = int_to_ptr.vmem [resolvable:$true] %s709_s3 }
  0xc5   : > { %s6515_s15 = scalar_lea.hbm %s7822_s9, %s6377_s1  ;;  %s5670_s26 = scalar_lea.hbm %s7822_s9, 48 }
  0xc6   : > { %s5665_s27 = scalar_lea.hbm %s6515_s15, 16  ;;  %p5671_p2 = scmp.lt.u32.totalorder %s6515_s15, %s7822_s9 }
  0xc7   : > { %p5666_p13 = scmp.ne.s32.totalorder %s6515_s15, %s5665_s27  ;;  %p5672_p11 = scmp.lt.u32.totalorder %s5670_s26, %s5665_s27 }
  0xc8   : > { %p5674_p7 = scmp.lt.u32.totalorder %s5665_s27, %s6515_s15 }
  0xc9   : > { %p5668_p4 = pnand %p5666_p13, %p6401_p12  ;;  %p5673_p0 = por %p5672_p11, %p5671_p2 }
  0xcb   : > { %p5669_p5 = pneg %p5668_p4  ;;  %p5675_p9 = por %p5674_p7, %p5673_p0 }
  0xcd   : > { %p5676_p3 = pnand %p5675_p9, %p5669_p5 }
  0xcf   : > { %5679 = shalt.err (!%p5676_p3)
}
  0xd0   : > { %s5680_s19 = scalar_lea.vmem %s710_s3, 16  ;;  %s6140_s5 = smov [#allocation18]  }
  0xd1   : > { %p5681_p10 = scmp.ne.s32.totalorder %s710_s3, %s5680_s19  ;;  %s5685_s14 = sshll.u32 %s6140_s5, 4  ;;  %s5686_s14 = int_to_ptr.vmem [resolvable:$false] %s5685_s14 }
  0xd2   : > { %s5687_s7 = scalar_lea.vmem %s5686_s14, 32  ;;  %p5688_p13 = scmp.lt.s32.totalorder %s710_s3, %s5686_s14 }
  0xd3   : > { %p5683_p6 = pnand %p5681_p10, %p6401_p12  ;;  %p5689_p4 = scmp.lt.s32.totalorder %s5687_s7, %s5680_s19 }
  0xd5   : > { %p5684_p1 = pneg %p5683_p6  ;;  %p5690_p8 = por %p5689_p4, %p5688_p13 }
  0xd7   : > { %p5691_p2 = pnand %p5690_p8, %p5684_p1 }
  0xd9   : > { %5694 = shalt.err (!%p5691_p2)
}
  0xda   : > { %p7823_p11 = scmp.ne.s32.totalorder %s7804_s22, 0  ;;  %s7824_s27 = scalar_lea.sflag [#allocation19], %s6370_s30 }
  0xdb   : > { %s7825_s11 = sld [smem:[#allocation57_spill]]  ;;  %s737_s14 = scalar_lea.vmem [#allocation21], %s6434_s20 }
  0xdc   : > { %5147 = dma.hbm_to_vmem [thread:$0]  (!%p7823_p11), %s6515_s15, 16, %s710_s3, %s7824_s27  }
  0xdd   : > { %s744_s10 = sshll.u32 %s737_s14, 4  ;;  %s7777_s29 = scalar_lea.sflag [#allocation22], %s6370_s30  ;;  %s6545_s10 = int_to_ptr.vmem [resolvable:$true] %s744_s10 }
  0xe1   : > { %s6542_s5 = scalar_lea.hbm %s7825_s11, %s6437_s25  ;;  %s5700_s7 = scalar_lea.hbm %s7825_s11, 384 }
  0xe2   : > { %s5695_s19 = scalar_lea.hbm %s6542_s5, 128  ;;  %p5701_p7 = scmp.lt.u32.totalorder %s6542_s5, %s7825_s11 }
  0xe3   : > { %p5696_p8 = scmp.ne.s32.totalorder %s6542_s5, %s5695_s19  ;;  %p5702_p9 = scmp.lt.u32.totalorder %s5700_s7, %s5695_s19 }
  0xe4   : > { %p5704_p10 = scmp.lt.u32.totalorder %s5695_s19, %s6542_s5 }
  0xe5   : > { %p5698_p5 = pnand %p5696_p8, %p6401_p12  ;;  %p5703_p3 = por %p5702_p9, %p5701_p7 }
  0xe7   : > { %p5699_p0 = pneg %p5698_p5  ;;  %p5705_p6 = por %p5704_p10, %p5703_p3 }
  0xe9   : > { %p5706_p1 = pnand %p5705_p6, %p5699_p0 }
  0xeb   : > { %5709 = shalt.err (!%p5706_p1)
}
  0xec   : > { %s5710_s20 = scalar_lea.vmem %s6545_s10, 128  ;;  %s6141_s12 = smov [#allocation21]  }
  0xed   : > { %p5711_p13 = scmp.ne.s32.totalorder %s6545_s10, %s5710_s20  ;;  %s5715_s26 = sshll.u32 %s6141_s12, 4  ;;  %s5716_s26 = int_to_ptr.vmem [resolvable:$false] %s5715_s26 }
  0xee   : > { %s5717_s14 = scalar_lea.vmem %s5716_s26, 256  ;;  %p5718_p8 = scmp.lt.s32.totalorder %s6545_s10, %s5716_s26 }
  0xef   : > { %p5713_p4 = pnand %p5711_p13, %p6401_p12  ;;  %p5719_p5 = scmp.lt.s32.totalorder %s5717_s14, %s5710_s20 }
  0xf1   : > { %p5714_p2 = pneg %p5713_p4  ;;  %p5720_p7 = por %p5719_p5, %p5718_p8 }
  0xf3   : > { %p5721_p9 = pnand %p5720_p7, %p5714_p2 }
  0xf5   : > { %5724 = shalt.err (!%p5721_p9)
}
  0xf6   : > { %5153 = dma.hbm_to_vmem [thread:$0]  (!%p7823_p11), %s6542_s5, 128, %s6545_s10, %s7777_s29, %s7820_s24, %s7820_s24, %s7819_s18  }
  0xf7   : > { %s4601_s19 = sshll.u32 %s6374_s23, 5  ;;  %s4698_s15 = sshll.u32 %s6127_s28, 9 }
  0xf8   : > { %s6579_s25 = scalar_lea.hbm %s7740_s13, %s4698_s15  ;;  %s775_s27 = scalar_lea.vmem [#allocation24], %s4601_s19 }
  0xf9   : > { %s782_s20 = sshll.u32 %s775_s27, 4  ;;  %s7779_s12 = scalar_lea.sflag [#allocation25], %s6370_s30  ;;  %s6581_s20 = int_to_ptr.vmem [resolvable:$true] %s782_s20 }
  0xfa   : > { %s5725_s26 = scalar_lea.hbm %s6579_s25, 512  ;;  %s5730_s14 = scalar_lea.hbm %s7740_s13, 1536 }
  0xfb   : > { %p5726_p0 = scmp.ne.s32.totalorder %s6579_s25, %s5725_s26  ;;  %p5731_p6 = scmp.lt.u32.totalorder %s6579_s25, %s7740_s13 }
  0xfc   : > { %p5732_p1 = scmp.lt.u32.totalorder %s5730_s14, %s5725_s26  ;;  %p5734_p4 = scmp.lt.u32.totalorder %s5725_s26, %s6579_s25 }
  0xfd   : > { %p5728_p3 = pnand %p5726_p0, %p6401_p12 }
  0xfe   : > { %p5733_p13 = por %p5732_p1, %p5731_p6 }
  0xff   : > { %p5729_p10 = pneg %p5728_p3 }
 0x100   : > { %p5735_p2 = por %p5734_p4, %p5733_p13 }
 0x102   : > { %p5736_p8 = pnand %p5735_p2, %p5729_p10 }
 0x104   : > { %5739 = shalt.err (!%p5736_p8)
}
 0x105   : > { %s5740_s19 = scalar_lea.vmem %s6581_s20, 512  ;;  %s6142_s7 = smov [#allocation24]  }
 0x106   : > { %p5741_p5 = scmp.ne.s32.totalorder %s6581_s20, %s5740_s19  ;;  %s5745_s27 = sshll.u32 %s6142_s7, 4  ;;  %s5746_s27 = int_to_ptr.vmem [resolvable:$false] %s5745_s27 }
 0x107   : > { %s5747_s5 = scalar_lea.vmem %s5746_s27, 1024  ;;  %p5748_p0 = scmp.lt.s32.totalorder %s6581_s20, %s5746_s27 }
 0x108   : > { %p5743_p7 = pnand %p5741_p5, %p6401_p12  ;;  %p5749_p3 = scmp.lt.s32.totalorder %s5747_s5, %s5740_s19 }
 0x10a   : > { %p5744_p9 = pneg %p5743_p7  ;;  %p5750_p6 = por %p5749_p3, %p5748_p0 }
 0x10c   : > { %p5751_p1 = pnand %p5750_p6, %p5744_p9 }
 0x10e   : > { %5754 = shalt.err (!%p5751_p1)
}
 0x10f   : > { %5159 = dma.hbm_to_vmem [thread:$0]  (!%p7823_p11), %s6579_s25, 512, %s6581_s20, %s7779_s12, %s7820_s24, %s7820_s24, %s7819_s18  }
 0x110   : > { %s6143_s26 = smov [#allocation3]   ;;  %s7826_s3 = sld [smem:[#allocation50_spill]] }
 0x111   : > { %s529_s10 = sshll.u32 %s6143_s26, 4  ;;  %p7827_p13 = scmp.ne.s32.totalorder %s7807_s0, 0  ;;  %s530_s10 = int_to_ptr.vmem [resolvable:$true] %s529_s10 }
 0x116   : > { %s5755_s19 = scalar_lea.hbm %s7826_s3, 1024 }
 0x117   : > { %p5756_p10 = scmp.ne.s32.totalorder %s7826_s3, %s5755_s19  ;;  %p5762_p8 = scmp.lt.u32.totalorder %s5755_s19, %s7826_s3 }
 0x119   : > { %p5758_p4 = pnand %p5756_p10, %p7827_p13 }
 0x11b   : > { %p5759_p2 = pneg %p5758_p4 }
 0x11d   : > { %p5764_p5 = pnand %p5762_p8, %p5759_p2 }
 0x11f   : > { %5767 = shalt.err (!%p5764_p5)
}
 0x120   : > { %s5768_s18 = scalar_lea.vmem %s530_s10, 1024  ;;  %p5776_p3 = scmp.lt.s32.totalorder %s530_s10, %s530_s10 }
 0x121   : > { %p5769_p7 = scmp.ne.s32.totalorder %s530_s10, %s5768_s18  ;;  %p5777_p6 = scmp.lt.s32.totalorder %s5768_s18, %s5768_s18 }
 0x123   : > { %p5771_p9 = pnand %p5769_p7, %p7827_p13  ;;  %p5778_p1 = por %p5777_p6, %p5776_p3 }
 0x125   : > { %p5772_p0 = pneg %p5771_p9 }
 0x127   : > { %p5779_p11 = pnand %p5778_p1, %p5772_p0 }
 0x129   : > { %5782 = shalt.err (!%p5779_p11)
}
 0x12a   : > { %s6144_s24 = smov 128   ;;  %s6145_s25 = smov 8  }
 0x12b   : > { %p7828_p10 = scmp.ne.s32.totalorder %s7803_s21, 0  ;;  %s6146_s26 = smov [#allocation8]  }
 0x12c   : > { %s554_s14 = sshll.u32 %s6146_s26, 4  ;;  %s6147_s15 = smov [#allocation29]   ;;  %s555_s14 = int_to_ptr.vmem [resolvable:$true] %s554_s14 }
 0x12d   : > { %5113 = dma.hbm_to_vmem [thread:$0]  (!%p7828_p10), %s7826_s3, 1024, %s530_s10, [#allocation4], %s6144_s24, %s6144_s24, %s6145_s25  }
 0x12e   : > { %s578_s19 = sshll.u32 %s6147_s15, 4  ;;  %s5783_s5 = scalar_lea.hbm %s7729_s2, 16  ;;  %s579_s19 = int_to_ptr.vmem [resolvable:$true] %s578_s19 }
 0x12f   : > { %p5784_p11 = scmp.ne.s32.totalorder %s7729_s2, %s5783_s5  ;;  %p5790_p8 = scmp.lt.u32.totalorder %s5783_s5, %s7729_s2 }
 0x131   : > { %p5786_p4 = pnand %p5784_p11, %p7827_p13 }
 0x133   : > { %p5787_p2 = pneg %p5786_p4 }
 0x135   : > { %p5792_p5 = pnand %p5790_p8, %p5787_p2 }
 0x137   : > { %5795 = shalt.err (!%p5792_p5)
}
 0x138   : > { %s5796_s10 = scalar_lea.vmem %s555_s14, 16  ;;  %s5803_s24 = scalar_lea.vmem %s555_s14, 32 }
 0x139   : > { %p5797_p7 = scmp.ne.s32.totalorder %s555_s14, %s5796_s10  ;;  %p5804_p3 = scmp.lt.s32.totalorder %s555_s14, %s555_s14 }
 0x13a   : > { %p5805_p6 = scmp.lt.s32.totalorder %s5803_s24, %s5796_s10 }
 0x13b   : > { %p5799_p9 = pnand %p5797_p7, %p7827_p13 }
 0x13c   : > { %p5806_p1 = por %p5805_p6, %p5804_p3 }
 0x13d   : > { %p5800_p0 = pneg %p5799_p9 }
 0x13f   : > { %p5807_p12 = pnand %p5806_p1, %p5800_p0 }
 0x141   : > { %5810 = shalt.err (!%p5807_p12)
}
 0x142   : > { %5119 = dma.hbm_to_vmem [thread:$0]  (!%p7828_p10), %s7729_s2, 16, %s555_s14, [#allocation7]  }
 0x143   : > { %s5811_s29 = scalar_lea.hbm %s7743_s16, 16 }
 0x144   : > { %p5812_p11 = scmp.ne.s32.totalorder %s7743_s16, %s5811_s29  ;;  %p5818_p12 = scmp.lt.u32.totalorder %s5811_s29, %s7743_s16 }
 0x146   : > { %p5814_p4 = pnand %p5812_p11, %p7827_p13 }
 0x148   : > { %p5815_p2 = pneg %p5814_p4 }
 0x14a   : > { %p5820_p8 = pnand %p5818_p12, %p5815_p2 }
 0x14c   : > { %5823 = shalt.err (!%p5820_p8)
}
 0x14d   : > { %s5824_s27 = scalar_lea.vmem %s579_s19, 16  ;;  %s5831_s14 = scalar_lea.vmem %s579_s19, 32 }
 0x14e   : > { %p5825_p5 = scmp.ne.s32.totalorder %s579_s19, %s5824_s27  ;;  %p5832_p0 = scmp.lt.s32.totalorder %s579_s19, %s579_s19 }
 0x14f   : > { %p5833_p3 = scmp.lt.s32.totalorder %s5831_s14, %s5824_s27 }
 0x150   : > { %p5827_p7 = pnand %p5825_p5, %p7827_p13 }
 0x151   : > { %p5834_p6 = por %p5833_p3, %p5832_p0 }
 0x152   : > { %p5828_p9 = pneg %p5827_p7 }
 0x154   : > { %p5835_p1 = pnand %p5834_p6, %p5828_p9 }
 0x156   : > { %5838 = shalt.err (!%p5835_p1)
}
 0x157   : > { %5125 = dma.hbm_to_vmem [thread:$0]  (!%p7828_p10), %s7743_s16, 16, %s579_s19, [#allocation28]  }
 0x158   : > { %s6668_s0 = scalar_lea.hbm %s7731_s4, %s6377_s1  ;;  %s609_s12 = scalar_lea.vmem [#allocation11], %s6374_s23 }
 0x159   : > { %s616_s25 = sshll.u32 %s609_s12, 4  ;;  %s5839_s21 = scalar_lea.hbm %s6668_s0, 16  ;;  %s617_s25 = int_to_ptr.vmem [resolvable:$true] %s616_s25 }
 0x15a   : > { %p5840_p13 = scmp.ne.s32.totalorder %s6668_s0, %s5839_s21  ;;  %p7829_p11 = scmp.ne.s32.totalorder %s7813_s17, 0 }
 0x15b   : > { %s5844_s19 = scalar_lea.hbm %s7731_s4, 48  ;;  %p5845_p10 = scmp.lt.u32.totalorder %s6668_s0, %s7731_s4 }
 0x15c   : > { %p5842_p4 = pnand %p5840_p13, %p7829_p11  ;;  %p5846_p12 = scmp.lt.u32.totalorder %s5844_s19, %s5839_s21 }
 0x15d   : > { %p5848_p5 = scmp.lt.u32.totalorder %s5839_s21, %s6668_s0 }
 0x15e   : > { %p5843_p2 = pneg %p5842_p4  ;;  %p5847_p8 = por %p5846_p12, %p5845_p10 }
 0x160   : > { %p5849_p7 = por %p5848_p5, %p5847_p8 }
 0x162   : > { %p5850_p9 = pnand %p5849_p7, %p5843_p2 }
 0x164   : > { %5853 = shalt.err (!%p5850_p9)
}
 0x165   : > { %s5854_s26 = scalar_lea.vmem %s617_s25, 16  ;;  %s6148_s15 = smov [#allocation11]  }
 0x166   : > { %p5855_p0 = scmp.ne.s32.totalorder %s617_s25, %s5854_s26  ;;  %s5859_s7 = sshll.u32 %s6148_s15, 4  ;;  %s5860_s7 = int_to_ptr.vmem [resolvable:$false] %s5859_s7 }
 0x167   : > { %s5861_s27 = scalar_lea.vmem %s5860_s7, 32  ;;  %p5862_p1 = scmp.lt.s32.totalorder %s617_s25, %s5860_s7 }
 0x168   : > { %p5857_p3 = pnand %p5855_p0, %p7829_p11  ;;  %p5863_p13 = scmp.lt.s32.totalorder %s5861_s27, %s5854_s26 }
 0x16a   : > { %p5858_p6 = pneg %p5857_p3  ;;  %p5864_p4 = por %p5863_p13, %p5862_p1 }
 0x16c   : > { %p5865_p10 = pnand %p5864_p4, %p5858_p6 }
 0x16e   : > { %5868 = shalt.err (!%p5865_p10)
}
 0x16f   : > { %p7830_p12 = scmp.ne.s32.totalorder %s7804_s22, 0  ;;  %s7831_s14 = scalar_lea.sflag [#allocation10], %s6370_s30 }
 0x170   : > { %s6694_s10 = scalar_lea.hbm %s7733_s6, %s6377_s1  ;;  %s647_s24 = scalar_lea.vmem [#allocation14], %s6374_s23 }
 0x171   : > { %5132 = dma.hbm_to_vmem [thread:$0]  (!%p7830_p12), %s6668_s0, 16, %s617_s25, %s7831_s14  }
 0x172   : > { %s654_s12 = sshll.u32 %s647_s24, 4  ;;  %s5869_s21 = scalar_lea.hbm %s6694_s10, 16  ;;  %s655_s12 = int_to_ptr.vmem [resolvable:$true] %s654_s12 }
 0x173   : > { %p5870_p2 = scmp.ne.s32.totalorder %s6694_s10, %s5869_s21  ;;  %s5874_s0 = scalar_lea.hbm %s7733_s6, 48 }
 0x174   : > { %p5875_p7 = scmp.lt.u32.totalorder %s6694_s10, %s7733_s6  ;;  %p5876_p9 = scmp.lt.u32.totalorder %s5874_s0, %s5869_s21 }
 0x175   : > { %p5872_p8 = pnand %p5870_p2, %p7829_p11  ;;  %p5878_p3 = scmp.lt.u32.totalorder %s5869_s21, %s6694_s10 }
 0x176   : > { %p5877_p0 = por %p5876_p9, %p5875_p7 }
 0x177   : > { %p5873_p5 = pneg %p5872_p8 }
 0x178   : > { %p5879_p6 = por %p5878_p3, %p5877_p0 }
 0x17a   : > { %p5880_p1 = pnand %p5879_p6, %p5873_p5 }
 0x17c   : > { %5883 = shalt.err (!%p5880_p1)
}
 0x17d   : > { %s5884_s29 = scalar_lea.vmem %s655_s12, 16  ;;  %s6149_s20 = smov [#allocation14]  }
 0x17e   : > { %p5885_p13 = scmp.ne.s32.totalorder %s655_s12, %s5884_s29  ;;  %s5889_s26 = sshll.u32 %s6149_s20, 4  ;;  %s5890_s26 = int_to_ptr.vmem [resolvable:$false] %s5889_s26 }
 0x17f   : > { %s5891_s15 = scalar_lea.vmem %s5890_s26, 32  ;;  %p5892_p2 = scmp.lt.s32.totalorder %s655_s12, %s5890_s26 }
 0x180   : > { %p5887_p4 = pnand %p5885_p13, %p7829_p11  ;;  %p5893_p8 = scmp.lt.s32.totalorder %s5891_s15, %s5884_s29 }
 0x182   : > { %p5888_p10 = pneg %p5887_p4  ;;  %p5894_p12 = por %p5893_p8, %p5892_p2 }
 0x184   : > { %p5895_p7 = pnand %p5894_p12, %p5888_p10 }
 0x186   : > { %5898 = shalt.err (!%p5895_p7)
}
 0x187   : > { %p7832_p9 = scmp.ne.s32.totalorder %s7804_s22, 0  ;;  %s7833_s7 = scalar_lea.sflag [#allocation13], %s6370_s30 }
 0x188   : > { %s6720_s5 = scalar_lea.hbm %s7735_s8, %s6377_s1  ;;  %s685_s18 = scalar_lea.vmem [#allocation17], %s6374_s23 }
 0x189   : > { %5138 = dma.hbm_to_vmem [thread:$0]  (!%p7832_p9), %s6694_s10, 16, %s655_s12, %s7833_s7  }
 0x18a   : > { %s692_s24 = sshll.u32 %s685_s18, 4  ;;  %s5899_s21 = scalar_lea.hbm %s6720_s5, 16  ;;  %s693_s24 = int_to_ptr.vmem [resolvable:$true] %s692_s24 }
 0x18b   : > { %p5900_p12 = scmp.ne.s32.totalorder %s6720_s5, %s5899_s21  ;;  %s5904_s10 = scalar_lea.hbm %s7735_s8, 48 }
 0x18c   : > { %p5905_p3 = scmp.lt.u32.totalorder %s6720_s5, %s7735_s8  ;;  %p5906_p6 = scmp.lt.u32.totalorder %s5904_s10, %s5899_s21 }
 0x18d   : > { %p5902_p5 = pnand %p5900_p12, %p7829_p11  ;;  %p5908_p13 = scmp.lt.u32.totalorder %s5899_s21, %s6720_s5 }
 0x18e   : > { %p5907_p1 = por %p5906_p6, %p5905_p3 }
 0x18f   : > { %p5903_p0 = pneg %p5902_p5 }
 0x190   : > { %p5909_p4 = por %p5908_p13, %p5907_p1 }
 0x192   : > { %p5910_p10 = pnand %p5909_p4, %p5903_p0 }
 0x194   : > { %5913 = shalt.err (!%p5910_p10)
}
 0x195   : > { %s5914_s25 = scalar_lea.vmem %s693_s24, 16  ;;  %s6150_s19 = smov [#allocation17]  }
 0x196   : > { %p5915_p2 = scmp.ne.s32.totalorder %s693_s24, %s5914_s25  ;;  %s5919_s29 = sshll.u32 %s6150_s19, 4  ;;  %s5920_s29 = int_to_ptr.vmem [resolvable:$false] %s5919_s29 }
 0x197   : > { %s5921_s20 = scalar_lea.vmem %s5920_s29, 32  ;;  %p5922_p12 = scmp.lt.s32.totalorder %s693_s24, %s5920_s29 }
 0x198   : > { %p5917_p8 = pnand %p5915_p2, %p7829_p11  ;;  %p5923_p5 = scmp.lt.s32.totalorder %s5921_s20, %s5914_s25 }
 0x19a   : > { %p5918_p7 = pneg %p5917_p8  ;;  %p5924_p9 = por %p5923_p5, %p5922_p12 }
 0x19c   : > { %p5925_p3 = pnand %p5924_p9, %p5918_p7 }
 0x19e   : > { %5928 = shalt.err (!%p5925_p3)
}
 0x19f   : > { %p7834_p6 = scmp.ne.s32.totalorder %s7804_s22, 0  ;;  %s7835_s26 = scalar_lea.sflag [#allocation16], %s6370_s30 }
 0x1a0   : > { %s7836_s27 = sld [smem:[#allocation56_spill]]  ;;  %s719_s21 = scalar_lea.vmem [#allocation20], %s6374_s23 }
 0x1a1   : > { %5144 = dma.hbm_to_vmem [thread:$0]  (!%p7834_p6), %s6720_s5, 16, %s693_s24, %s7835_s26  }
 0x1a2   : > { %s726_s9 = sshll.u32 %s719_s21, 4  ;;  %s727_s9 = int_to_ptr.vmem [resolvable:$true] %s726_s9 }
 0x1a6   : > { %s7837_s14 = smov %s7836_s27  ;;  %s6746_s18 = scalar_lea.hbm %s7836_s27, %s6377_s1 }
 0x1a7   : > { %s5929_s11 = scalar_lea.hbm %s6746_s18, 16  ;;  %s5934_s5 = scalar_lea.hbm %s7837_s14, 48 }
 0x1a8   : > { %p5930_p9 = scmp.ne.s32.totalorder %s6746_s18, %s5929_s11  ;;  %p5935_p13 = scmp.lt.u32.totalorder %s6746_s18, %s7837_s14 }
 0x1a9   : > { %p5936_p4 = scmp.lt.u32.totalorder %s5934_s5, %s5929_s11  ;;  %p5938_p2 = scmp.lt.u32.totalorder %s5929_s11, %s6746_s18 }
 0x1aa   : > { %p5932_p0 = pnand %p5930_p9, %p7829_p11 }
 0x1ab   : > { %p5937_p10 = por %p5936_p4, %p5935_p13 }
 0x1ac   : > { %p5933_p1 = pneg %p5932_p0 }
 0x1ad   : > { %p5939_p8 = por %p5938_p2, %p5937_p10 }
 0x1af   : > { %p5940_p7 = pnand %p5939_p8, %p5933_p1 }
 0x1b1   : > { %5943 = shalt.err (!%p5940_p7)
}
 0x1b2   : > { %s5944_s25 = scalar_lea.vmem %s727_s9, 16  ;;  %s6151_s19 = smov [#allocation20]  }
 0x1b3   : > { %p5945_p12 = scmp.ne.s32.totalorder %s727_s9, %s5944_s25  ;;  %s5949_s29 = sshll.u32 %s6151_s19, 4  ;;  %s5950_s29 = int_to_ptr.vmem [resolvable:$false] %s5949_s29 }
 0x1b4   : > { %s5951_s20 = scalar_lea.vmem %s5950_s29, 32  ;;  %p5952_p9 = scmp.lt.s32.totalorder %s727_s9, %s5950_s29 }
 0x1b5   : > { %p5947_p5 = pnand %p5945_p12, %p7829_p11  ;;  %p5953_p0 = scmp.lt.s32.totalorder %s5951_s20, %s5944_s25 }
 0x1b7   : > { %p5948_p3 = pneg %p5947_p5  ;;  %p5954_p6 = por %p5953_p0, %p5952_p9 }
 0x1b9   : > { %p5955_p4 = pnand %p5954_p6, %p5948_p3 }
 0x1bb   : > { %5958 = shalt.err (!%p5955_p4)
}
 0x1bc   : > { %p7838_p13 = scmp.ne.s32.totalorder %s7804_s22, 0  ;;  %s7839_s26 = scalar_lea.sflag [#allocation19], %s6370_s30 }
 0x1bd   : > { %s7840_s27 = sld [smem:[#allocation58_spill]]  ;;  %s757_s10 = scalar_lea.vmem [#allocation23], %s6374_s23 }
 0x1be   : > { %5150 = dma.hbm_to_vmem [thread:$0]  (!%p7838_p13), %s6746_s18, 16, %s727_s9, %s7839_s26  }
 0x1bf   : > { %s764_s12 = sshll.u32 %s757_s10, 4  ;;  %s765_s12 = int_to_ptr.vmem [resolvable:$true] %s764_s12 }
 0x1c3   : > { %s7841_s21 = smov %s7840_s27  ;;  %s6772_s11 = scalar_lea.hbm %s7840_s27, %s6377_s1 }
 0x1c4   : > { %s5959_s5 = scalar_lea.hbm %s6772_s11, 16  ;;  %s5964_s18 = scalar_lea.hbm %s7841_s21, 48 }
 0x1c5   : > { %p5960_p6 = scmp.ne.s32.totalorder %s6772_s11, %s5959_s5  ;;  %p5965_p2 = scmp.lt.u32.totalorder %s6772_s11, %s7841_s21 }
 0x1c6   : > { %p5966_p8 = scmp.lt.u32.totalorder %s5964_s18, %s5959_s5  ;;  %p5968_p12 = scmp.lt.u32.totalorder %s5959_s5, %s6772_s11 }
 0x1c7   : > { %p5962_p1 = pnand %p5960_p6, %p7829_p11 }
 0x1c8   : > { %p5967_p7 = por %p5966_p8, %p5965_p2 }
 0x1c9   : > { %p5963_p10 = pneg %p5962_p1 }
 0x1ca   : > { %p5969_p5 = por %p5968_p12, %p5967_p7 }
 0x1cc   : > { %p5970_p3 = pnand %p5969_p5, %p5963_p10 }
 0x1ce   : > { %5973 = shalt.err (!%p5970_p3)
}
 0x1cf   : > { %s5974_s19 = scalar_lea.vmem %s765_s12, 16  ;;  %s6152_s29 = smov [#allocation23]  }
 0x1d0   : > { %p5975_p9 = scmp.ne.s32.totalorder %s765_s12, %s5974_s19  ;;  %s5979_s20 = sshll.u32 %s6152_s29, 4  ;;  %s5980_s20 = int_to_ptr.vmem [resolvable:$false] %s5979_s20 }
 0x1d1   : > { %s5981_s26 = scalar_lea.vmem %s5980_s20, 32  ;;  %p5982_p6 = scmp.lt.s32.totalorder %s765_s12, %s5980_s20 }
 0x1d2   : > { %p5977_p0 = pnand %p5975_p9, %p7829_p11  ;;  %p5983_p1 = scmp.lt.s32.totalorder %s5981_s26, %s5974_s19 }
 0x1d4   : > { %p5978_p4 = pneg %p5977_p0  ;;  %p5984_p13 = por %p5983_p1, %p5982_p6 }
 0x1d6   : > { %p5985_p2 = pnand %p5984_p13, %p5978_p4 }
 0x1d8   : > { %5988 = shalt.err (!%p5985_p2)
}
 0x1d9   : > { %p7842_p8 = scmp.ne.s32.totalorder %s7804_s22, 0  ;;  %s7843_s15 = scalar_lea.sflag [#allocation22], %s6370_s30 }
 0x1da   : > { %s7844_s10 = sld [smem:[#allocation59_spill]]  ;;  %s795_s24 = scalar_lea.vmem [#allocation26], %s6374_s23 }
 0x1db   : > { %5156 = dma.hbm_to_vmem [thread:$0]  (!%p7842_p8), %s6772_s11, 16, %s765_s12, %s7843_s15  }
 0x1dc   : > { %s802_s0 = sshll.u32 %s795_s24, 4  ;;  %s803_s0 = int_to_ptr.vmem [resolvable:$true] %s802_s0 }
 0x1e0   : > { %s6798_s5 = scalar_lea.hbm %s7844_s10, %s6377_s1  ;;  %s5994_s11 = scalar_lea.hbm %s7844_s10, 48 }
 0x1e1   : > { %s5989_s18 = scalar_lea.hbm %s6798_s5, 16  ;;  %p5995_p12 = scmp.lt.u32.totalorder %s6798_s5, %s7844_s10 }
 0x1e2   : > { %p5990_p13 = scmp.ne.s32.totalorder %s6798_s5, %s5989_s18  ;;  %p5996_p5 = scmp.lt.u32.totalorder %s5994_s11, %s5989_s18 }
 0x1e3   : > { %p5998_p9 = scmp.lt.u32.totalorder %s5989_s18, %s6798_s5 }
 0x1e4   : > { %p5992_p10 = pnand %p5990_p13, %p7829_p11  ;;  %p5997_p3 = por %p5996_p5, %p5995_p12 }
 0x1e6   : > { %p5993_p7 = pneg %p5992_p10  ;;  %p5999_p0 = por %p5998_p9, %p5997_p3 }
 0x1e8   : > { %p6000_p4 = pnand %p5999_p0, %p5993_p7 }
 0x1ea   : > { %6003 = shalt.err (!%p6000_p4)
}
 0x1eb   : > { %s6004_s23 = scalar_lea.vmem %s803_s0, 16  ;;  %s6153_s1 = smov [#allocation26]  }
 0x1ec   : > { %p6005_p6 = scmp.ne.s32.totalorder %s803_s0, %s6004_s23  ;;  %s6009_s29 = sshll.u32 %s6153_s1, 4  ;;  %s6010_s29 = int_to_ptr.vmem [resolvable:$false] %s6009_s29 }
 0x1ed   : > { %s6011_s20 = scalar_lea.vmem %s6010_s29, 32  ;;  %p6012_p13 = scmp.lt.s32.totalorder %s803_s0, %s6010_s29 }
 0x1ee   : > { %p6007_p1 = pnand %p6005_p6, %p7829_p11  ;;  %p6013_p10 = scmp.lt.s32.totalorder %s6011_s20, %s6004_s23 }
 0x1f0   : > { %p6008_p2 = pneg %p6007_p1  ;;  %p6014_p8 = por %p6013_p10, %p6012_p13 }
 0x1f2   : > { %p6015_p5 = pnand %p6014_p8, %p6008_p2 }
 0x1f4   : > { %6018 = shalt.err (!%p6015_p5)
}
 0x1f5   : > { %p7845_p12 = scmp.ne.s32.totalorder %s7804_s22, 0  ;;  %s7846_s26 = scalar_lea.sflag [#allocation25], %s6370_s30 }
 0x1f6   : > { %s7847_s15 = sld [smem:[#allocation47_spill]] }
 0x1f7   : > { %5162 = dma.hbm_to_vmem [thread:$0]  (!%p7845_p12), %s6798_s5, 16, %s803_s0, %s7846_s26  }
 0x1fc   : > { %p7848_p7 = scmp.ne.s32.totalorder %s7847_s15, 0 }
 0x1fd   : > { %s7849_s17 = sld [smem:[#allocation45_spill]] (!%p7848_p7) }
 0x1fe   : > { %811 = sbr.rel (%p7848_p7) target bundleno = 5513 (0x1589), region = 88 }
 0x203   : > { %p7850_p11 = scmp.eq.s32.totalorder (!%p7848_p7), %s7849_s17, 0 }
 0x205   : > { %6070 = dma.done.wait (%p7850_p11), [#allocation4], 1024   ;;  %p7851_p3 = pmov %p7850_p11 }
 0x207   : > { %6072 = vsyncadd (%p7851_p3), [#allocation4], 4294966272  ;;  %p7852_p9 = pmov %p7851_p3 }
 0x208   : > { %p7853_p8 = pmov %p7851_p3 }
 0x209   : > { %6074 = dma.done.wait (%p7852_p9), [#allocation7], 48  }
 0x20a   : > { %6076 = vsyncadd (%p7853_p8), [#allocation7], 4294967248  ;;  %s7854_s22 = sld [smem:[#allocation41_spill]]  ;;  %s7855_s30 = sld [smem:[#allocation46_spill]] }
 0x20b   : > { %s6831_s7 = sand.u32 1, %s7849_s17  }
 0x20c   : > { %s826_s5 = scalar_lea.sflag [#allocation10], %s6831_s7 }
 0x210   : > { %s6834_s27 = sand.u32 1, %s7854_s22   ;;  %p7856_p0 = scmp.ne.s32.totalorder %s7855_s30, 0 }
 0x211   : > { %s828_s24 = scalar_lea.vmem [#allocation9], %s6834_s27 }
 0x212   : > { %6078 = dma.done.wait (%p7856_p0), %s826_s5, 32  }
 0x213   : > { %6080 = vsyncadd (%p7856_p0), %s826_s5, 4294967264  ;;  %s6843_s0 = sshll.u32 %s6834_s27, 3  ;;  %s836_s18 = scalar_lea.vmem [#allocation11], %s6834_s27 }
 0x214   : > { %s842_s9 = scalar_lea.sflag [#allocation13], %s6831_s7  ;;  %s845_s25 = scalar_lea.vmem [#allocation12], %s6843_s0 }
 0x215   : > { %6082 = dma.done.wait (%p7856_p0), %s842_s9, 144  }
 0x216   : > { %6084 = vsyncadd (%p7856_p0), %s842_s9, 4294967152  ;;  %s853_s11 = scalar_lea.vmem [#allocation14], %s6834_s27  ;;  %s859_s12 = scalar_lea.sflag [#allocation16], %s6831_s7 }
 0x217   : > { %s862_s19 = scalar_lea.vmem [#allocation15], %s6843_s0 }
 0x218   : > { %6086 = dma.done.wait (%p7856_p0), %s859_s12, 144  }
 0x219   : > { %6088 = vsyncadd (%p7856_p0), %s859_s12, 4294967152  ;;  %s870_s23 = scalar_lea.vmem [#allocation17], %s6834_s27  ;;  %s876_s1 = scalar_lea.sflag [#allocation19], %s6831_s7 }
 0x21a   : > { %s878_s29 = scalar_lea.vmem [#allocation18], %s6834_s27 }
 0x21b   : > { %6090 = dma.done.wait (%p7856_p0), %s876_s1, 32  }
 0x21c   : > { %6092 = vsyncadd (%p7856_p0), %s876_s1, 4294967264  ;;  %s886_s20 = scalar_lea.vmem [#allocation20], %s6834_s27  ;;  %s892_s26 = scalar_lea.sflag [#allocation22], %s6831_s7 }
 0x21d   : > { %s895_s15 = scalar_lea.vmem [#allocation21], %s6843_s0 }
 0x21e   : > { %6094 = dma.done.wait (%p7856_p0), %s892_s26, 144  }
 0x21f   : > { %6096 = vsyncadd (%p7856_p0), %s892_s26, 4294967152  ;;  %s4612_s22 = sshll.u32 %s6834_s27, 5  ;;  %s903_s5 = scalar_lea.vmem [#allocation23], %s6834_s27 }
 0x220   : > { %s909_s9 = scalar_lea.sflag [#allocation25], %s6831_s7  ;;  %s6876_s12 = scalar_lea.vmem [#allocation24], %s4612_s22 }
 0x221   : > { %6098 = dma.done.wait (%p7856_p0), %s909_s9, 528  }
 0x222   : > { %6100 = vsyncadd (%p7856_p0), %s909_s9, 4294966768  ;;  %s920_s1 = scalar_lea.vmem [#allocation26], %s6834_s27  ;;  %p7857_p4 = pmov %p7851_p3 }
 0x223   : > { %p7858_p6 = pmov %p7851_p3 }
 0x224   : > { %6102 = dma.done.wait (%p7857_p4), [#allocation28], 144  }
 0x225   : > { %6104 = vsyncadd (%p7858_p6), [#allocation28], 4294967152  ;;  %s7859_s26 = sld [smem:[#allocation43_spill]] }
 0x22b   : > { %p4615_p1 = scmp.ne.s32.totalorder %s7859_s26, 0 }
 0x22c   : > { %v1040_v0 = vld [vmem:[#allocation6] sm:$0x3] (!%p4615_p1)  ;;  %vm1061_vm0 = vcmask (!%p4615_p1), 1041408   ;;  %v1029_v2 = vld [vmem:[#allocation3 + $0x8] sm:$0xff] (!%p4615_p1)  ;;  %vm1048_vm1 = vcmask (!%p4615_p1), 31744   ;;  %v1030_v7 = vld [vmem:[#allocation3 + $0x10] sm:$0xff] (!%p4615_p1) }
 0x22d   : > { %1027 = sbr.rel (%p4615_p1) target bundleno = 780 (0x30c), region = 160  ;;  %v1028_v1 = vld [vmem:[#allocation3] sm:$0xff] (!%p4615_p1)  ;;  %5060 = vmatprep.subr.msk.bf16.mxu0 (!%p4615_p1), %vm1061_vm0, %v1040_v0  ;;  %5061 = vmatprep.subr.msk.bf16.mxu1 (!%p4615_p1), %vm1061_vm0, %v1040_v0  ;;  %v1063_v3 = vsel (!%p4615_p1), %vm1061_vm0, %v1040_v0, 0  ;;  %v1033_v6 = vld [vmem:[#allocation3 + $0x28] sm:$0xff] (!%p4615_p1)  ;;  %v1031_v9 = vld [vmem:[#allocation3 + $0x18] sm:$0xff] (!%p4615_p1)  ;;  %vm1130_vm2 = vcmask (!%p4615_p1), 130048  }
 0x22e   : > { %v1036_v4 = vpack.c.bf16 (!%p4615_p1), %v1029_v2, %v1028_v1  ;;  %v1032_v5 = vld [vmem:[#allocation3 + $0x20] sm:$0xff] (!%p4615_p1)  ;;  %4797 = vmatpush3.bf16.msra.mxu0 (!%p4615_p1), %v1063_v3  ;;  %5055 = vmatpush3.bf16.msra.mxu1 (!%p4615_p1), %v1063_v3  ;;  %v1034_v10 = vld [vmem:[#allocation3 + $0x30] sm:$0xff] (!%p4615_p1)  ;;  %v1035_v11 = vld [vmem:[#allocation3 + $0x38] sm:$0xff] (!%p4615_p1)  ;;  %v1037_v12 = vpack.c.bf16 (!%p4615_p1), %v1031_v9, %v1030_v7 }
 0x22f   : > { %v1038_v8 = vpack.c.bf16 (!%p4615_p1), %v1033_v6, %v1032_v5  ;;  %v1039_v13 = vpack.c.bf16 (!%p4615_p1), %v1035_v11, %v1034_v10  ;;  %v4616_v14 = vld [vmem:[#allocation8] ss:$0 sm:$0xff] (!%p4615_p1) }
 0x230   : > { %4798 = vmatprep.mubr.msk.bf16.mxu0 (!%p4615_p1), %vm1048_vm1, %v1036_v4 }
 0x231   : > { %4802 = vmatprep.mubr.msk.bf16.mxu1 (!%p4615_p1), %vm1048_vm1, %v1038_v8  ;;  %4799 = vmatmul.mubr.msk.bf16.vlgmr.msra.gmra.mrb[0].mxu0 (!%p4615_p1), %vm1048_vm1, %v1037_v12 }
 0x232   : > { %4803 = vmatmul.mubr.msk.bf16.vlgmr.msra.gmra.mrb[0].mxu1 (!%p4615_p1), %vm1048_vm1, %v1039_v13 }
 0x304   : > { %v4800_v15 = vpop.f32.mrb[0].mxu0 }
 0x305   : > { %v4804_v16 = vpop.f32.mrb[0].mxu1  ;;  %v1108_v17 = vadd.f32 %v4800_v15, %v4616_v14  ;;  %v1099_v19 = vpop.f32.mrb[1].mxu0 }
 0x306   : > { %v1124_v18 = vadd.f32 %v4804_v16, %v4616_v14  ;;  %v1115_v20 = vpop.f32.mrb[1].mxu1  ;;  %v1100_v21 = vadd.f32 %v4616_v14, %v1099_v19  ;;  %v4801_v23 = vpop.f32.mrb[2].mxu0 }
 0x307   : > { %v1116_v22 = vadd.f32 %v4616_v14, %v1115_v20  ;;  %v4805_v24 = vpop.f32.mrb[2].mxu1  ;;  %1133 = vst.msk [vmem:[#allocation2 + $0x10] sm:$0xff] %vm1130_vm2, %v1108_v17  ;;  %v1111_v25 = vadd.f32 %v4801_v23, %v4616_v14  ;;  %v1102_v27 = vpop.f32.mrb[3].mxu0 }
 0x308   : > { %1137 = vst.msk [vmem:[#allocation2 + $0x30] sm:$0xff] %vm1130_vm2, %v1124_v18  ;;  %v1127_v26 = vadd.f32 %v4805_v24, %v4616_v14  ;;  %v1118_v28 = vpop.f32.mrb[3].mxu1  ;;  %1131 = vst.msk [vmem:[#allocation2] sm:$0xff] %vm1130_vm2, %v1100_v21  ;;  %v1103_v29 = vadd.f32 %v4616_v14, %v1102_v27 }
 0x309   : > { %1135 = vst.msk [vmem:[#allocation2 + $0x20] sm:$0xff] %vm1130_vm2, %v1116_v22  ;;  %v1119_v30 = vadd.f32 %v4616_v14, %v1118_v28  ;;  %1134 = vst.msk [vmem:[#allocation2 + $0x18] sm:$0xff] %vm1130_vm2, %v1111_v25 }
 0x30a   : > { %1138 = vst.msk [vmem:[#allocation2 + $0x38] sm:$0xff] %vm1130_vm2, %v1127_v26  ;;  %1132 = vst.msk [vmem:[#allocation2 + $0x8] sm:$0xff] %vm1130_vm2, %v1103_v29 }
 0x30b   : > { %1136 = vst.msk [vmem:[#allocation2 + $0x28] sm:$0xff] %vm1130_vm2, %v1119_v30 }
 0x30c PF: > { %vm1149_vm3 = vcmask 130048   ;;  %v5311_v23 = vld [vmem:[%s845_s25] sm:$0xff]   ;;  %vm6155_vm4 = vmmov 0   ;;  %s6156_s17 = smov 112   ;;  %vm1386_vm5 = vcmask 31744   ;;  %s6157_s30 = smov 96  }
 0x30d   : > { %4806 = vmatprep.subr.bf16.mxu0 %v5311_v23  ;;  %5056 = vmatprep.subr.bf16.mxu1 %v5311_v23  ;;  %s6158_s7 = smov 108   ;;  %s6161_s25 = smov 104   ;;  %vm3420_vm6 = vcmask 64512   ;;  %vm3429_vm7 = vcmask 97280   ;;  %vm4039_vm12 = vcmask 523264  }
 0x30e   : > { %v1141_v32 = vld [vmem:[#allocation2 + $0x10] sm:$0xff]  ;;  %4807 = vmatpush3.bf16.msra.mxu0 %v5311_v23  ;;  %5057 = vmatpush3.bf16.msra.mxu1 %v5311_v23  ;;  %s6163_s22 = smov 88   ;;  %s6164_s9 = smov 100  }
 0x30f   : > { %v1139_v31 = vld [vmem:[#allocation2] sm:$0xff]  ;;  %v1156_v35 = vsel %vm1149_vm3, %v1141_v32, 0.0  ;;  %v1145_v43 = vld [vmem:[#allocation2 + $0x30] sm:$0xff]  ;;  %s6165_s26 = smov 116   ;;  %s7860_s27 = sld [smem:[#allocation43_spill]] }
 0x310   : > { %v1150_v34 = vsel %vm1149_vm3, %v1139_v31, 0.0  ;;  %v1142_v36 = vld [vmem:[#allocation2 + $0x18] sm:$0xff]  ;;  %v1143_v37 = vld [vmem:[#allocation2 + $0x20] sm:$0xff]  ;;  %1157 = vadd.xlane.f32.xlu1 %v1156_v35  ;;  %v1168_v45 = vsel %vm1149_vm3, %v1145_v43, 0.0 }
 0x311   : > { %v1140_v33 = vld [vmem:[#allocation2 + $0x8] sm:$0xff]  ;;  %1151 = vadd.xlane.f32.xlu0 %v1150_v34  ;;  %v1159_v40 = vsel %vm1149_vm3, %v1142_v36, 0.0  ;;  %v1162_v41 = vsel %vm1149_vm3, %v1143_v37, 0.0  ;;  %v1146_v44 = vld [vmem:[#allocation2 + $0x38] sm:$0xff] }
 0x312   : > { %v1144_v38 = vld [vmem:[#allocation2 + $0x28] sm:$0xff]  ;;  %v1153_v39 = vsel %vm1149_vm3, %v1140_v33, 0.0  ;;  %v1171_v46 = vsel %vm1149_vm3, %v1146_v44, 0.0 }
 0x313   : > { %v1165_v42 = vsel %vm1149_vm3, %v1144_v38, 0.0 }
 0x314   : > { %1160 = vadd.xlane.f32.xlu1 %v1159_v40 }
 0x315   : > { %1154 = vadd.xlane.f32.xlu0 %v1153_v39  ;;  %p4684_p2 = scmp.ne.s32.totalorder %s7860_s27, 2 }
 0x318   : > { %1166 = vadd.xlane.f32.xlu1 %v1165_v42 }
 0x319   : > { %1163 = vadd.xlane.f32.xlu0 %v1162_v41 }
 0x31c   : > { %1172 = vadd.xlane.f32.xlu1 %v1171_v46 }
 0x31d   : > { %1169 = vadd.xlane.f32.xlu0 %v1168_v45 }
 0x39d   : > { %v1158_v48 = vpop.xlane.xlu1 %1157 }
 0x39e   : > { %v1152_v47 = vpop.xlane.xlu0 %1151  ;;  %v1177_v50 = vmul.f32 0.0625, %v1158_v48 }
 0x39f   : > { %v1175_v49 = vmul.f32 0.0625, %v1152_v47 }
 0x3a0   : > { %v6910_v52 = vsub.f32 %v1141_v32, %v1177_v50 }
 0x3a1   : > { %v6908_v51 = vsub.f32 %v1139_v31, %v1175_v49  ;;  %v1161_v54 = vpop.xlane.xlu1 %1160  ;;  %v4621_v49 = vld [vmem:[%s828_s24] ss:$0 sm:$0xff]  ;;  %s6159_s24 = smov 124  }
 0x3a2   : > { %v1155_v53 = vpop.xlane.xlu0 %1154  ;;  %v1178_v56 = vmul.f32 0.0625, %v1161_v54  ;;  %v1193_v58 = vmul.f32 %v6910_v52, %v6910_v52 }
 0x3a3   : > { %v1176_v55 = vmul.f32 0.0625, %v1155_v53  ;;  %v1191_v57 = vmul.f32 %v6908_v51, %v6908_v51 }
 0x3a4   : > { %v6918_v60 = vsub.f32 %v1142_v36, %v1178_v56  ;;  %v1205_v0 = vsel %vm1149_vm3, %v1193_v58, 0.0 }
 0x3a5   : > { %v6916_v59 = vsub.f32 %v1140_v33, %v1176_v55  ;;  %v1199_v61 = vsel %vm1149_vm3, %v1191_v57, 0.0  ;;  %v1167_v63 = vpop.xlane.xlu1 %1166  ;;  %v4622_v57 = vld [vmem:[%s836_s18] ss:$0 sm:$0xff]  ;;  %s6160_s18 = smov 92  }
 0x3a6   : > { %1200 = vadd.xlane.f32.xlu0 %v1199_v61  ;;  %v1164_v62 = vpop.xlane.xlu0 %1163  ;;  %v1180_v2 = vmul.f32 0.0625, %v1167_v63  ;;  %v1194_v4 = vmul.f32 %v6918_v60, %v6918_v60 }
 0x3a7   : > { %v1179_v1 = vmul.f32 0.0625, %v1164_v62  ;;  %v1192_v3 = vmul.f32 %v6916_v59, %v6916_v59 }
 0x3a8   : > { %v6928_v6 = vsub.f32 %v1144_v38, %v1180_v2  ;;  %v1208_v10 = vsel %vm1149_vm3, %v1194_v4, 0.0 }
 0x3a9   : > { %v6926_v5 = vsub.f32 %v1143_v37, %v1179_v1  ;;  %v1202_v7 = vsel %vm1149_vm3, %v1192_v3, 0.0  ;;  %v1173_v9 = vpop.xlane.xlu1 %1172 }
 0x3aa   : > { %1206 = vadd.xlane.f32.xlu0 %v1205_v0  ;;  %1203 = vadd.xlane.f32.xlu1 %v1202_v7  ;;  %v1170_v8 = vpop.xlane.xlu0 %1169  ;;  %v1182_v12 = vmul.f32 0.0625, %v1173_v9  ;;  %v1196_v14 = vmul.f32 %v6928_v6, %v6928_v6 }
 0x3ab   : > { %v1181_v11 = vmul.f32 0.0625, %v1170_v8  ;;  %v1195_v13 = vmul.f32 %v6926_v5, %v6926_v5 }
 0x3ac   : > { %v6938_v16 = vsub.f32 %v1146_v44, %v1182_v12  ;;  %v1214_v18 = vsel %vm1149_vm3, %v1196_v14, 0.0 }
 0x3ad   : > { %v6936_v15 = vsub.f32 %v1145_v43, %v1181_v11  ;;  %v1211_v17 = vsel %vm1149_vm3, %v1195_v13, 0.0 }
 0x3ae   : > { %1209 = vadd.xlane.f32.xlu1 %v1208_v10  ;;  %1212 = vadd.xlane.f32.xlu0 %v1211_v17  ;;  %v1198_v20 = vmul.f32 %v6938_v16, %v6938_v16 }
 0x3af   : > { %v1197_v19 = vmul.f32 %v6936_v15, %v6936_v15 }
 0x3b0   : > { %v1220_v22 = vsel %vm1149_vm3, %v1198_v20, 0.0 }
 0x3b1   : > { %v1217_v21 = vsel %vm1149_vm3, %v1197_v19, 0.0 }
 0x3b2   : > { %1215 = vadd.xlane.f32.xlu1 %v1214_v18  ;;  %1218 = vadd.xlane.f32.xlu0 %v1217_v21 }
 0x3b6   : > { %1221 = vadd.xlane.f32.xlu1 %v1220_v22 }
 0x433   : > { %v1201_v24 = vpop.xlane.xlu0 %1200 }
 0x434   : > { %v1223_v25 = vmul.f32 0.0625, %v1201_v24  ;;  %v4623_v24 = vld [vmem:[%s853_s11] ss:$0 sm:$0xff]  ;;  %s6162_s11 = smov 120  }
 0x436   : > { %v1231_v26 = vadd.f32 1e-05, %v1223_v25 }
 0x437   : > { %v1204_v27 = vpop.xlane.xlu1 %1203  ;;  %v1207_v28 = vpop.xlane.xlu0 %1206 }
 0x438   : > { %5318 = vrsqrt.f32 %v1231_v26  ;;  %v1224_v29 = vmul.f32 0.0625, %v1204_v27  ;;  %v1225_v30 = vmul.f32 0.0625, %v1207_v28 }
 0x43a   : > { %v1232_v31 = vadd.f32 1e-05, %v1224_v29  ;;  %v1233_v32 = vadd.f32 1e-05, %v1225_v30 }
 0x43b   : > { %v1210_v33 = vpop.xlane.xlu1 %1209  ;;  %v1213_v34 = vpop.xlane.xlu0 %1212 }
 0x43c   : > { %5320 = vrsqrt.f32 %v1232_v31  ;;  %v1226_v35 = vmul.f32 0.0625, %v1210_v33  ;;  %v1227_v36 = vmul.f32 0.0625, %v1213_v34 }
 0x43d   : > { %5322 = vrsqrt.f32 %v1233_v32 }
 0x43e   : > { %v1234_v37 = vadd.f32 1e-05, %v1226_v35  ;;  %v1235_v38 = vadd.f32 1e-05, %v1227_v36 }
 0x43f   : > { %v1216_v39 = vpop.xlane.xlu1 %1215  ;;  %v1219_v40 = vpop.xlane.xlu0 %1218 }
 0x440   : > { %5324 = vrsqrt.f32 %v1234_v37  ;;  %v1228_v41 = vmul.f32 0.0625, %v1216_v39  ;;  %v1229_v42 = vmul.f32 0.0625, %v1219_v40 }
 0x441   : > { %5326 = vrsqrt.f32 %v1235_v38 }
 0x442   : > { %v5319_v43 = vpop.eup %5318  ;;  %v1236_v44 = vadd.f32 1e-05, %v1228_v41  ;;  %v1237_v45 = vadd.f32 1e-05, %v1229_v42 }
 0x443   : > { %v1222_v46 = vpop.xlane.xlu1 %1221  ;;  %v1247_v47 = vmul.f32 %v5319_v43, %v6908_v51 }
 0x444   : > { %5328 = vrsqrt.f32 %v1236_v44  ;;  %v1230_v48 = vmul.f32 0.0625, %v1222_v46 }
 0x445   : > { %5330 = vrsqrt.f32 %v1237_v45  ;;  %v1261_v56 = vmul.f32 %v4621_v49, %v1247_v47 }
 0x446   : > { %v5321_v50 = vpop.eup %5320  ;;  %v1238_v53 = vadd.f32 1e-05, %v1230_v48 }
 0x447   : > { %v5323_v54 = vpop.eup %5322  ;;  %v1248_v55 = vmul.f32 %v5321_v50, %v6916_v59  ;;  %v1275_v51 = vadd.f32 %v4622_v57, %v1261_v56 }
 0x448   : > { %5332 = vrsqrt.f32 %v1238_v53  ;;  %v1249_v58 = vmul.f32 %v5323_v54, %v6910_v52 }
 0x449   : > { %v1262_v61 = vmul.f32 %v4621_v49, %v1248_v55 }
 0x44a   : > { %v5325_v62 = vpop.eup %5324  ;;  %v1263_v2 = vmul.f32 %v4621_v49, %v1249_v58 }
 0x44b   : > { %v5327_v63 = vpop.eup %5326  ;;  %v1276_v0 = vadd.f32 %v4622_v57, %v1262_v61  ;;  %v1250_v1 = vmul.f32 %v5325_v62, %v6918_v60 }
 0x44c   : > { %v1251_v3 = vmul.f32 %v5327_v63, %v6926_v5  ;;  %v1277_v9 = vadd.f32 %v4622_v57, %v1263_v2 }
 0x44d   : > { %v1283_v4 = vpack.c.bf16 %v1276_v0, %v1275_v51  ;;  %v1264_v7 = vmul.f32 %v4621_v49, %v1250_v1 }
 0x44e   : > { %v5329_v8 = vpop.eup %5328  ;;  %v1265_v11 = vmul.f32 %v4621_v49, %v1251_v3 }
 0x44f   : > { %v5331_v59 = vpop.eup %5330  ;;  %4808 = vmatprep.mubr.msk.bf16.mxu0 %vm1149_vm3, %v1283_v4  ;;  %v1278_v10 = vadd.f32 %v4622_v57, %v1264_v7  ;;  %v1252_v52 = vmul.f32 %v5329_v8, %v6928_v6 }
 0x450   : > { %v1253_v12 = vmul.f32 %v5331_v59, %v6936_v15  ;;  %v1279_v60 = vadd.f32 %v4622_v57, %v1265_v11  ;;  %v6154_v15 = vmov 0.0  }
 0x451   : > { %v1284_v13 = vpack.c.bf16 %v1278_v10, %v1277_v9  ;;  %v1266_v14 = vmul.f32 %v4621_v49, %v1252_v52  ;;  %4816 = vmatprep.subr.bf16.mxu1 %v6154_v15  ;;  %4828 = vmatprep.subr.bf16.mxu0 %v6154_v15 }
 0x452   : > { %v5333_v17 = vpop.eup %5332  ;;  %v1267_v19 = vmul.f32 %v4621_v49, %v1253_v12 }
 0x453   : > { %4809 = vmatmul.mubr.msk.bf16.vlgmr.msra.gmra.mrb[0].mxu0 %vm1149_vm3, %v1284_v13  ;;  %v1280_v5 = vadd.f32 %v4622_v57, %v1266_v14  ;;  %v1254_v18 = vmul.f32 %v5333_v17, %v6938_v16 }
 0x454   : > { %v1281_v22 = vadd.f32 %v4622_v57, %v1267_v19  ;;  %4830 = vmatprep.mubr.msk.bf16.mxu0 %vm6155_vm4, %v6154_v15 }
 0x455   : > { %v1285_v20 = vpack.c.bf16 %v1280_v5, %v1279_v60  ;;  %v1268_v21 = vmul.f32 %v4621_v49, %v1254_v18 }
 0x457   : > { %4812 = vmatprep.mubr.msk.bf16.mxu1 %vm1149_vm3, %v1285_v20  ;;  %v1282_v6 = vadd.f32 %v4622_v57, %v1268_v21 }
 0x459   : > { %v1286_v23 = vpack.c.bf16 %v1282_v6, %v1281_v22 }
 0x45b   : > { %4813 = vmatmul.mubr.msk.bf16.vlgmr.msra.gmra.mrb[0].mxu1 %vm1149_vm3, %v1286_v23 }
 0x45c   : > { %4818 = vmatprep.mubr.msk.bf16.mxu1 %vm6155_vm4, %v6154_v15 }
 0x526   : > { %v4810_v16 = vpop.f32.mrb[0].mxu0 }
 0x527   : > { %v1348_v25 = vpop.f32.mrb[1].mxu0  ;;  %v1357_v27 = vadd.f32 %v4810_v16, %v4623_v24 }
 0x528   : > { %v4811_v26 = vpop.f32.mrb[2].mxu0  ;;  %v1349_v30 = vadd.f32 %v4623_v24, %v1348_v25 }
 0x529   : > { %v1360_v28 = vadd.f32 %v4811_v26, %v4623_v24  ;;  %v1351_v29 = vpop.f32.mrb[3].mxu0 }
 0x52a   : > { %v1352_v31 = vadd.f32 %v4623_v24, %v1351_v29 }
 0x52b   : > { %v6974_v32 = vpack.c.bf16 %v1360_v28, %v1357_v27 }
 0x52c   : > { %v6976_v33 = vpack.c.bf16 %v1352_v31, %v1349_v30 }
 0x52d   : > { %1435 = vrot.lane.b32.xlu1 %v6974_v32, %s6156_s17 }
 0x52e   : > { %1384 = vrot.lane.b32.xlu0 %v6976_v33, %s6156_s17  ;;  %v4814_v34 = vpop.f32.mrb[0].mxu1 }
 0x52f   : > { %v1364_v35 = vpop.f32.mrb[1].mxu1  ;;  %v1373_v37 = vadd.f32 %v4814_v34, %v4623_v24 }
 0x530   : > { %v4815_v36 = vpop.f32.mrb[2].mxu1  ;;  %v1365_v40 = vadd.f32 %v4623_v24, %v1364_v35 }
 0x531   : > { %v1376_v38 = vadd.f32 %v4815_v36, %v4623_v24  ;;  %v1367_v39 = vpop.f32.mrb[3].mxu1 }
 0x532   : > { %v1368_v41 = vadd.f32 %v4623_v24, %v1367_v39 }
 0x533   : > { %v6980_v42 = vpack.c.bf16 %v1376_v38, %v1373_v37 }
 0x534   : > { %v6982_v43 = vpack.c.bf16 %v1368_v41, %v1365_v40 }
 0x536   : > { %1485 = vrot.lane.b32.xlu1 %v6982_v43, %s6156_s17 }
 0x53a   : > { %1535 = vrot.lane.b32.xlu1 %v6980_v42, %s6156_s17  ;;  %s6166_s17 = smov 84  }
 0x59f   : > { %v1436_v46 = vpop.permute.xlu1 %1435 }
 0x5a0   : > { %v1385_v44 = vpop.permute.xlu0 %1384  ;;  %v1441_v48 = vsel %vm1386_vm5, %v1436_v46, 0 }
 0x5a1   : > { %v1391_v45 = vsel %vm1386_vm5, %v1385_v44, 0 }
 0x5a2   : > { %4817 = vmatpush3.bf16.xpose.msra.mxu1 %v1391_v45 }
 0x5a3   : > { %4822 = vmatprep.subr.bf16.mxu1 %v6154_v15 }
 0x5a8   : > { %v1486_v47 = vpop.permute.xlu1 %1485 }
 0x5a9   : > { %v1491_v49 = vsel %vm1386_vm5, %v1486_v47, 0  ;;  %4819 = vmatmul.mubr.msk.bf16.vlgmr.msra.gmra.mrb[4].mxu1 %vm1386_vm5, %v6976_v33 }
 0x5aa   : > { %4823 = vmatpush3.bf16.xpose.msra.mxu1 %v1441_v48  ;;  %4829 = vmatpush3.bf16.xpose.msra.mxu0 %v1491_v49 }
 0x5ab   : > { %4824 = vmatprep.mubr.msk.bf16.mxu1 %vm6155_vm4, %v6154_v15  ;;  %4834 = vmatprep.subr.bf16.mxu1 %v6154_v15 }
 0x5ac   : > { %4840 = vmatprep.subr.bf16.mxu0 %v6154_v15  ;;  %v1536_v50 = vpop.permute.xlu1 %1535 }
 0x5ad   : > { %v1541_v53 = vsel %vm1386_vm5, %v1536_v50, 0 }
 0x5b1   : > { %4825 = vmatmul.mubr.msk.bf16.vlgmr.msra.gmra.mrb[8].mxu1 %vm1386_vm5, %v6974_v32  ;;  %4831 = vmatmul.mubr.msk.bf16.vlgmr.msra.gmra.mrb[4].mxu0 %vm1386_vm5, %v6982_v43 }
 0x5b2   : > { %4835 = vmatpush3.bf16.xpose.msra.mxu1 %v1541_v53  ;;  %4836 = vmatprep.mubr.msk.bf16.mxu1 %vm6155_vm4, %v6154_v15 }
 0x5b3   : > { %4846 = vmatprep.subr.bf16.mxu1 %v6154_v15  ;;  %4842 = vmatprep.mubr.msk.bf16.mxu0 %vm6155_vm4, %v6154_v15 }
 0x5b9   : > { %4837 = vmatmul.mubr.msk.bf16.vlgmr.msra.gmra.mrb[12].mxu1 %vm1386_vm5, %v6980_v42 }
 0x5ba   : > { %4848 = vmatprep.mubr.msk.bf16.mxu1 %vm6155_vm4, %v6154_v15 }
 0x67c   : > { %v1427_v54 = vpop.f32.mrb[4].mxu1 }
 0x67d   : > { %v4820_v55 = vpop.f32.mrb[5].mxu1  ;;  %v1584_v56 = vsel %vm1149_vm3, %v1427_v54, -inf }
 0x67e   : > { %1585 = vmax.xlane.f32.xlu0 %v1584_v56  ;;  %v1430_v57 = vpop.f32.mrb[6].mxu1 }
 0x67f   : > { %v4821_v58 = vpop.f32.mrb[7].mxu1  ;;  %v1587_v61 = vsel %vm1149_vm3, %v1430_v57, -inf }
 0x680   : > { %1588 = vmax.xlane.f32.xlu1 %v1587_v61 }
 0x684   : > { %v1477_v62 = vpop.f32.mrb[8].mxu1  ;;  %v1527_v63 = vpop.f32.mrb[4].mxu0 }
 0x685   : > { %v4826_v51 = vpop.f32.mrb[9].mxu1  ;;  %v4832_v0 = vpop.f32.mrb[5].mxu0  ;;  %v1590_v1 = vsel %vm1149_vm3, %v1477_v62, -inf  ;;  %v1596_v52 = vsel %vm1149_vm3, %v1527_v63, -inf }
 0x686   : > { %v1530_v2 = vpop.f32.mrb[6].mxu0  ;;  %1591 = vmax.xlane.f32.xlu0 %v1590_v1  ;;  %v1480_v3 = vpop.f32.mrb[10].mxu1 }
 0x687   : > { %v4827_v4 = vpop.f32.mrb[11].mxu1  ;;  %v4833_v7 = vpop.f32.mrb[7].mxu0  ;;  %v1599_v8 = vsel %vm1149_vm3, %v1530_v2, -inf  ;;  %v1593_v59 = vsel %vm1149_vm3, %v1480_v3, -inf }
 0x688   : > { %1600 = vmax.xlane.f32.xlu1 %v1599_v8 }
 0x68a   : > { %1594 = vmax.xlane.f32.xlu0 %v1593_v59 }
 0x68c   : > { %v1577_v9 = vpop.f32.mrb[12].mxu1 }
 0x68d   : > { %v4838_v10 = vpop.f32.mrb[13].mxu1  ;;  %v1602_v14 = vsel %vm1149_vm3, %v1577_v9, -inf }
 0x68e   : > { %1597 = vmax.xlane.f32.xlu0 %v1596_v52  ;;  %v7016_v11 = vpop.f32.mrb[14].mxu1 }
 0x68f   : > { %v4839_v12 = vpop.f32.mrb[15].mxu1  ;;  %v1605_v13 = vsel %vm1149_vm3, %v7016_v11, -inf }
 0x690   : > { %1606 = vmax.xlane.f32.xlu1 %v1605_v13 }
 0x692   : > { %1603 = vmax.xlane.f32.xlu0 %v1602_v14 }
 0x70b   : > { %v1586_v17 = vpop.xlane.xlu0 %1585 }
 0x70c   : > { %v1608_v60 = vsub.f32 %v1427_v54, %v1586_v17 }
 0x70d   : > { %v1589_v5 = vpop.xlane.xlu1 %1588 }
 0x70e   : > { %v1616_v18 = vmul.f32 1.442695, %v1608_v60  ;;  %v1609_v19 = vsub.f32 %v1430_v57, %v1589_v5 }
 0x710   : > { %5334 = vpow2.f32 %v1616_v18  ;;  %v1618_v20 = vmul.f32 1.442695, %v1609_v19 }
 0x712   : > { %5336 = vpow2.f32 %v1618_v20 }
 0x713   : > { %v1592_v21 = vpop.xlane.xlu0 %1591 }
 0x714   : > { %v1610_v25 = vsub.f32 %v1477_v62, %v1592_v21 }
 0x715   : > { %v1601_v22 = vpop.xlane.xlu1 %1600 }
 0x716   : > { %v1613_v6 = vsub.f32 %v1530_v2, %v1601_v22  ;;  %v1620_v31 = vmul.f32 1.442695, %v1610_v25 }
 0x717   : > { %v1595_v23 = vpop.xlane.xlu0 %1594 }
 0x718   : > { %v1626_v16 = vmul.f32 1.442695, %v1613_v6  ;;  %v1611_v44 = vsub.f32 %v1480_v3, %v1595_v23 }
 0x71a   : > { %v7021_v24 = vpop.eup %5334  ;;  %5338 = vpow2.f32 %v1626_v16  ;;  %v1622_v46 = vmul.f32 1.442695, %v1611_v44 }
 0x71b   : > { %v1598_v26 = vpop.xlane.xlu0 %1597  ;;  %v1632_v27 = vsel %vm1149_vm3, %v7021_v24, 0.0 }
 0x71c   : > { %v7025_v28 = vpop.eup %5336  ;;  %v1612_v29 = vsub.f32 %v1527_v63, %v1598_v26  ;;  %1633 = vadd.xlane.f32.xlu0 %v1632_v27 }
 0x71d   : > { %v1635_v30 = vsel %vm1149_vm3, %v7025_v28, 0.0  ;;  %v1607_v54 = vpop.xlane.xlu1 %1606 }
 0x71e   : > { %v1624_v34 = vmul.f32 1.442695, %v1612_v29  ;;  %1636 = vadd.xlane.f32.xlu1 %v1635_v30  ;;  %v1615_v55 = vsub.f32 %v7016_v11, %v1607_v54 }
 0x71f   : > { %v1604_v41 = vpop.xlane.xlu0 %1603 }
 0x720   : > { %5340 = vpow2.f32 %v1624_v34  ;;  %v1614_v45 = vsub.f32 %v1577_v9, %v1604_v41  ;;  %v1630_v56 = vmul.f32 1.442695, %v1615_v55 }
 0x721   : > { %5342 = vpow2.f32 %v1620_v31 }
 0x722   : > { %v1628_v47 = vmul.f32 1.442695, %v1614_v45  ;;  %5344 = vpow2.f32 %v1622_v46 }
 0x724   : > { %v7029_v35 = vpop.eup %5338  ;;  %5346 = vpow2.f32 %v1628_v47 }
 0x725   : > { %v1647_v36 = vsel %vm1149_vm3, %v7029_v35, 0.0  ;;  %5348 = vpow2.f32 %v1630_v56 }
 0x726   : > { %1648 = vadd.xlane.f32.xlu1 %v1647_v36 }
 0x72a   : > { %v7033_v37 = vpop.eup %5340 }
 0x72b   : > { %v1644_v38 = vsel %vm1149_vm3, %v7033_v37, 0.0  ;;  %v7037_v39 = vpop.eup %5342 }
 0x72c   : > { %1645 = vadd.xlane.f32.xlu0 %v1644_v38  ;;  %v1638_v40 = vsel %vm1149_vm3, %v7037_v39, 0.0  ;;  %v7045_v48 = vpop.eup %5344 }
 0x72d   : > { %v1641_v50 = vsel %vm1149_vm3, %v7045_v48, 0.0 }
 0x72e   : > { %v7047_v49 = vpop.eup %5346 }
 0x72f   : > { %v1650_v53 = vsel %vm1149_vm3, %v7047_v49, 0.0  ;;  %v7059_v57 = vpop.eup %5348 }
 0x730   : > { %1639 = vadd.xlane.f32.xlu0 %v1638_v40  ;;  %v1653_v58 = vsel %vm1149_vm3, %v7059_v57, 0.0 }
 0x737   : > { %1723 = vrot.lane.b32.xlu1 %v6974_v32, %s6157_s30 }
 0x73b   : > { %1770 = vrot.lane.b32.xlu1 %v6982_v43, %s6157_s30 }
 0x73f   : > { %1817 = vrot.lane.b32.xlu1 %v6980_v42, %s6157_s30 }
 0x746   : > { %1676 = vrot.lane.b32.xlu0 %v6976_v33, %s6157_s30  ;;  %s6167_s30 = smov 4  }
 0x763   : > { %1642 = vadd.xlane.f32.xlu1 %v1641_v50 }
 0x765   : > { %1651 = vadd.xlane.f32.xlu0 %v1650_v53 }
 0x774   : > { %1917 = vrot.lane.b32.xlu1 %v6974_v32, %s6158_s7 }
 0x77b   : > { %1866 = vrot.lane.b32.xlu0 %v6976_v33, %s6158_s7 }
 0x77f   : > { %1864 = vrot.lane.b32.xlu0 %v6976_v33, %s6159_s24 }
 0x783   : > { %1915 = vrot.lane.b32.xlu0 %v6974_v32, %s6159_s24 }
 0x787   : > { %1966 = vrot.lane.b32.xlu0 %v6982_v43, %s6159_s24 }
 0x798   : > { %1654 = vadd.xlane.f32.xlu1 %v1653_v58 }
 0x7a9   : > { %1968 = vrot.lane.b32.xlu1 %v6982_v43, %s6158_s7  ;;  %v1634_v62 = vpop.xlane.xlu0 %1633 }
 0x7ab   : > { %v1637_v61 = vpop.xlane.xlu1 %1636 }
 0x7ac   : > { %5350 = vrcp.f32 %v1637_v61 }
 0x7ad   : > { %2019 = vrot.lane.b32.xlu1 %v6980_v42, %s6158_s7  ;;  %5352 = vrcp.f32 %v1634_v62  ;;  %s6168_s7 = smov 8  }
 0x7b1   : > { %2017 = vrot.lane.b32.xlu1 %v6980_v42, %s6159_s24  ;;  %s6169_s24 = smov 12  }
 0x7b3   : > { %v1649_v63 = vpop.xlane.xlu1 %1648 }
 0x7b6   : > { %v5351_v1 = vpop.eup %5350 }
 0x7b7   : > { %v1724_v51 = vpop.permute.xlu1 %1723  ;;  %v5353_v3 = vpop.eup %5352  ;;  %v1659_v4 = vmul.f32 %v5351_v1, %v7025_v28 }
 0x7b8   : > { %4847 = vmatpush3.bf16.msra.mxu1 %v1724_v51  ;;  %v1657_v7 = vmul.f32 %v5353_v3, %v7021_v24 }
 0x7b9   : > { %v1646_v0 = vpop.xlane.xlu0 %1645  ;;  %4858 = vmatprep.subr.bf16.mxu1 %v6154_v15 }
 0x7ba   : > { %5354 = vrcp.f32 %v1646_v0  ;;  %v1672_v59 = vpack.c.bf16 %v1659_v4, %v1657_v7 }
 0x7bb   : > { %5356 = vrcp.f32 %v1649_v63  ;;  %v1771_v10 = vpop.permute.xlu1 %1770 }
 0x7bd   : > { %v1640_v2 = vpop.xlane.xlu0 %1639 }
 0x7be   : > { %5358 = vrcp.f32 %v1640_v2 }
 0x7bf   : > { %v1818_v14 = vpop.permute.xlu1 %1817 }
 0x7c1   : > { %v1677_v8 = vpop.permute.xlu0 %1676 }
 0x7c2   : > { %4841 = vmatpush3.bf16.msra.mxu0 %v1677_v8 }
 0x7c3   : > { %4852 = vmatprep.subr.bf16.mxu0 %v6154_v15 }
 0x7c4   : > { %v5355_v9 = vpop.eup %5354 }
 0x7c5   : > { %4843 = vmatmul.mubr.msk.bf16.vlgmr.msra.gmra.mrb[8].mxu0 %vm1149_vm3, %v1672_v59  ;;  %v5357_v52 = vpop.eup %5356  ;;  %v1665_v11 = vmul.f32 %v5355_v9, %v7033_v37 }
 0x7c6   : > { %4853 = vmatpush3.bf16.msra.mxu0 %v1771_v10  ;;  %4854 = vmatprep.mubr.msk.bf16.mxu0 %vm6155_vm4, %v6154_v15  ;;  %v1667_v12 = vmul.f32 %v5357_v52, %v7029_v35 }
 0x7c7   : > { %4864 = vmatprep.subr.bf16.mxu0 %v6154_v15 }
 0x7c8   : > { %v1674_v13 = vpack.c.bf16 %v1667_v12, %v1665_v11  ;;  %v5359_v19 = vpop.eup %5358 }
 0x7c9   : > { %v1661_v21 = vmul.f32 %v5359_v19, %v7037_v39 }
 0x7cd   : > { %4855 = vmatmul.mubr.msk.bf16.vlgmr.msra.gmra.mrb[12].mxu0 %vm1149_vm3, %v1674_v13 }
 0x7ce   : > { %4866 = vmatprep.mubr.msk.bf16.mxu0 %vm6155_vm4, %v6154_v15 }
 0x7f0   : > { %v1643_v17 = vpop.xlane.xlu1 %1642 }
 0x7f1   : > { %5360 = vrcp.f32 %v1643_v17 }
 0x7f2   : > { %v1652_v60 = vpop.xlane.xlu0 %1651 }
 0x7f3   : > { %5362 = vrcp.f32 %v1652_v60 }
 0x7f4   : > { %v1918_v16 = vpop.permute.xlu1 %1917 }
 0x7f5   : > { %v1923_v36 = vsel %vm1386_vm5, %v1918_v16, 0 }
 0x7f6   : > { %v1867_v5 = vpop.permute.xlu0 %1866 }
 0x7f7   : > { %v1872_v18 = vsel %vm1386_vm5, %v1867_v5, 0 }
 0x7f8   : > { %4865 = vmatpush3.bf16.xpose.msra.mxu0 %v1872_v18 }
 0x7f9   : > { %4876 = vmatprep.subr.bf16.mxu0 %v6154_v15 }
 0x7fa   : > { %v1865_v6 = vpop.permute.xlu0 %1864 }
 0x7fb   : > { %v5361_v20 = vpop.eup %5360 }
 0x7fc   : > { %v1663_v22 = vmul.f32 %v5361_v20, %v7045_v48 }
 0x7fd   : > { %v5363_v28 = vpop.eup %5362 }
 0x7fe   : > { %v1673_v23 = vpack.c.bf16 %v1663_v22, %v1661_v21  ;;  %v1916_v27 = vpop.permute.xlu0 %1915  ;;  %v1669_v30 = vmul.f32 %v5363_v28, %v7047_v49 }
 0x7ff   : > { %4867 = vmatmul.mubr.msk.bf16.vlgmr.msra.gmra.mrb[16].mxu0 %vm1386_vm5, %v1865_v6 }
 0x800   : > { %4849 = vmatmul.mubr.msk.bf16.vlgmr.msra.gmra.mrb[16].mxu1 %vm1149_vm3, %v1673_v23  ;;  %4878 = vmatprep.mubr.msk.bf16.mxu0 %vm6155_vm4, %v6154_v15 }
 0x801   : > { %4859 = vmatpush3.bf16.msra.mxu1 %v1818_v14  ;;  %4860 = vmatprep.mubr.msk.bf16.mxu1 %vm6155_vm4, %v6154_v15 }
 0x802   : > { %4870 = vmatprep.subr.bf16.mxu1 %v6154_v15  ;;  %v1967_v31 = vpop.permute.xlu0 %1966 }
 0x825   : > { %v1655_v24 = vpop.xlane.xlu1 %1654 }
 0x826   : > { %5364 = vrcp.f32 %v1655_v24 }
 0x829   : > { %v1969_v25 = vpop.permute.xlu1 %1968 }
 0x82a   : > { %v1974_v26 = vsel %vm1386_vm5, %v1969_v25, 0 }
 0x82b   : > { %4877 = vmatpush3.bf16.xpose.msra.mxu0 %v1974_v26 }
 0x82c   : > { %4888 = vmatprep.subr.bf16.mxu0 %v6154_v15 }
 0x82d   : > { %v2020_v37 = vpop.permute.xlu1 %2019 }
 0x82e   : > { %v2025_v38 = vsel %vm1386_vm5, %v2020_v37, 0 }
 0x830   : > { %v5365_v29 = vpop.eup %5364 }
 0x831   : > { %v1671_v34 = vmul.f32 %v5365_v29, %v7059_v57  ;;  %v2018_v39 = vpop.permute.xlu1 %2017 }
 0x832   : > { %4879 = vmatmul.mubr.msk.bf16.vlgmr.msra.gmra.mrb[20].mxu0 %vm1386_vm5, %v1967_v31 }
 0x833   : > { %v1675_v35 = vpack.c.bf16 %v1671_v34, %v1669_v30  ;;  %4890 = vmatprep.mubr.msk.bf16.mxu0 %vm6155_vm4, %v6154_v15 }
 0x835   : > { %4861 = vmatmul.mubr.msk.bf16.vlgmr.msra.gmra.mrb[20].mxu1 %vm1149_vm3, %v1675_v35 }
 0x836   : > { %4871 = vmatpush3.bf16.xpose.msra.mxu1 %v1923_v36  ;;  %4872 = vmatprep.mubr.msk.bf16.mxu1 %vm6155_vm4, %v6154_v15 }
 0x837   : > { %4882 = vmatprep.subr.bf16.mxu1 %v6154_v15 }
 0x83d   : > { %4873 = vmatmul.mubr.msk.bf16.vlgmr.msra.gmra.mrb[24].mxu1 %vm1386_vm5, %v1916_v27 }
 0x83e   : > { %4883 = vmatpush3.bf16.xpose.msra.mxu1 %v2025_v38  ;;  %4884 = vmatprep.mubr.msk.bf16.mxu1 %vm6155_vm4, %v6154_v15 }
 0x83f   : > { %4894 = vmatprep.subr.bf16.mxu1 %v6154_v15 }
 0x845   : > { %4885 = vmatmul.mubr.msk.bf16.vlgmr.msra.gmra.mrb[28].mxu1 %vm1386_vm5, %v2018_v39 }
 0x846   : > { %4896 = vmatprep.mubr.msk.bf16.mxu1 %vm6155_vm4, %v6154_v15 }
 0x898   : > { %v7110_v40 = vpop.f32.mrb[8].mxu0 }
 0x899   : > { %v4844_v41 = vpop.f32.mrb[9].mxu0 }
 0x89a   : > { %v7112_v44 = vpop.f32.mrb[10].mxu0 }
 0x89b   : > { %v4845_v45 = vpop.f32.mrb[11].mxu0 }
 0x8a0   : > { %v7114_v46 = vpop.f32.mrb[12].mxu0 }
 0x8a1   : > { %v4856_v47 = vpop.f32.mrb[13].mxu0 }
 0x8a2   : > { %v7116_v48 = vpop.f32.mrb[14].mxu0 }
 0x8a3   : > { %v4857_v49 = vpop.f32.mrb[15].mxu0 }
 0x8d2   : > { %v1908_v50 = vpop.f32.mrb[16].mxu0 }
 0x8d3   : > { %v7118_v53 = vpop.f32.mrb[16].mxu1  ;;  %v4868_v54 = vpop.f32.mrb[17].mxu0  ;;  %v2068_v55 = vsel %vm1149_vm3, %v1908_v50, -inf }
 0x8d4   : > { %2069 = vmax.xlane.f32.xlu0 %v2068_v55  ;;  %v4850_v56 = vpop.f32.mrb[17].mxu1  ;;  %v1911_v57 = vpop.f32.mrb[18].mxu0 }
 0x8d5   : > { %v7121_v58 = vpop.f32.mrb[18].mxu1  ;;  %v4869_v61 = vpop.f32.mrb[19].mxu0  ;;  %v2071_v62 = vsel %vm1149_vm3, %v1911_v57, -inf }
 0x8d6   : > { %2072 = vmax.xlane.f32.xlu1 %v2071_v62  ;;  %v4851_v63 = vpop.f32.mrb[19].mxu1 }
 0x905   : > { %v7124_v51 = vpop.f32.mrb[20].mxu0 }
 0x906   : > { %v4880_v0 = vpop.f32.mrb[21].mxu0  ;;  %v2080_v60 = vsel %vm1149_vm3, %v7124_v51, -inf }
 0x907   : > { %v2013_v1 = vpop.f32.mrb[22].mxu0 }
 0x908   : > { %v7126_v2 = vpop.f32.mrb[20].mxu1  ;;  %v4881_v3 = vpop.f32.mrb[23].mxu0  ;;  %v2083_v4 = vsel %vm1149_vm3, %v2013_v1, -inf }
 0x909   : > { %2084 = vmax.xlane.f32.xlu1 %v2083_v4  ;;  %v4862_v7 = vpop.f32.mrb[21].mxu1 }
 0x90a   : > { %v7129_v8 = vpop.f32.mrb[22].mxu1 }
 0x90b   : > { %v4863_v59 = vpop.f32.mrb[23].mxu1 }
 0x910   : > { %v1959_v9 = vpop.f32.mrb[24].mxu1 }
 0x911   : > { %v4874_v10 = vpop.f32.mrb[25].mxu1  ;;  %v2074_v52 = vsel %vm1149_vm3, %v1959_v9, -inf }
 0x912   : > { %2075 = vmax.xlane.f32.xlu0 %v2074_v52  ;;  %v1962_v11 = vpop.f32.mrb[26].mxu1 }
 0x913   : > { %v4875_v12 = vpop.f32.mrb[27].mxu1  ;;  %v2077_v13 = vsel %vm1149_vm3, %v1962_v11, -inf }
 0x916   : > { %2078 = vmax.xlane.f32.xlu0 %v2077_v13 }
 0x918   : > { %v2061_v14 = vpop.f32.mrb[28].mxu1 }
 0x919   : > { %v4886_v17 = vpop.f32.mrb[29].mxu1  ;;  %v2086_v19 = vsel %vm1149_vm3, %v2061_v14, -inf }
 0x91a   : > { %2207 = vrot.lane.b32.xlu1 %v6974_v32, %s6160_s18  ;;  %2081 = vmax.xlane.f32.xlu0 %v2080_v60  ;;  %v7136_v5 = vpop.f32.mrb[30].mxu1 }
 0x91b   : > { %v4887_v18 = vpop.f32.mrb[31].mxu1  ;;  %v2089_v20 = vsel %vm1149_vm3, %v7136_v5, -inf }
 0x91e   : > { %2254 = vrot.lane.b32.xlu1 %v6982_v43, %s6160_s18  ;;  %2087 = vmax.xlane.f32.xlu0 %v2086_v19 }
 0x934   : > { %2160 = vrot.lane.b32.xlu0 %v6976_v33, %s6160_s18 }
 0x942   : > { %2090 = vmax.xlane.f32.xlu1 %v2089_v20 }
 0x953   : > { %2301 = vrot.lane.b32.xlu1 %v6980_v42, %s6160_s18 }
 0x961   : > { %v2070_v21 = vpop.xlane.xlu0 %2069 }
 0x962   : > { %v2092_v22 = vsub.f32 %v1908_v50, %v2070_v21 }
 0x963   : > { %v2073_v6 = vpop.xlane.xlu1 %2072 }
 0x964   : > { %v2100_v23 = vmul.f32 1.442695, %v2092_v22  ;;  %v2093_v16 = vsub.f32 %v1911_v57, %v2073_v6 }
 0x966   : > { %5366 = vpow2.f32 %v2100_v23  ;;  %v2102_v24 = vmul.f32 1.442695, %v2093_v16 }
 0x968   : > { %5368 = vpow2.f32 %v2102_v24 }
 0x970   : > { %v7144_v25 = vpop.eup %5366 }
 0x971   : > { %v2116_v26 = vsel %vm1149_vm3, %v7144_v25, 0.0 }
 0x972   : > { %2117 = vadd.xlane.f32.xlu0 %v2116_v26  ;;  %v7148_v27 = vpop.eup %5368 }
 0x973   : > { %v2119_v28 = vsel %vm1149_vm3, %v7148_v27, 0.0 }
 0x977   : > { %2120 = vadd.xlane.f32.xlu1 %v2119_v28 }
 0x996   : > { %v2085_v29 = vpop.xlane.xlu1 %2084 }
 0x997   : > { %v2097_v35 = vsub.f32 %v2013_v1, %v2085_v29 }
 0x999   : > { %v2110_v39 = vmul.f32 1.442695, %v2097_v35 }
 0x99a   : > { %v2208_v30 = vpop.permute.xlu1 %2207 }
 0x99b   : > { %4895 = vmatpush3.bf16.msra.mxu1 %v2208_v30 }
 0x99c   : > { %4906 = vmatprep.subr.bf16.mxu1 %v6154_v15 }
 0x99e   : > { %v2255_v59 = vpop.permute.xlu1 %2254 }
 0x99f   : > { %v2076_v31 = vpop.xlane.xlu0 %2075 }
 0x9a0   : > { %v2094_v34 = vsub.f32 %v1959_v9, %v2076_v31 }
 0x9a2   : > { %v2104_v36 = vmul.f32 1.442695, %v2094_v34 }
 0x9a3   : > { %v2079_v37 = vpop.xlane.xlu0 %2078 }
 0x9a4   : > { %5370 = vpow2.f32 %v2104_v36  ;;  %v2095_v38 = vsub.f32 %v1962_v11, %v2079_v37 }
 0x9a6   : > { %v2106_v41 = vmul.f32 1.442695, %v2095_v38 }
 0x9a7   : > { %v2082_v45 = vpop.xlane.xlu0 %2081 }
 0x9a8   : > { %5372 = vpow2.f32 %v2106_v41  ;;  %v2096_v47 = vsub.f32 %v7124_v51, %v2082_v45 }
 0x9a9   : > { %5374 = vpow2.f32 %v2110_v39 }
 0x9aa   : > { %v2108_v49 = vmul.f32 1.442695, %v2096_v47 }
 0x9ab   : > { %v2088_v50 = vpop.xlane.xlu0 %2087 }
 0x9ac   : > { %5376 = vpow2.f32 %v2108_v49  ;;  %v2098_v54 = vsub.f32 %v2061_v14, %v2088_v50 }
 0x9ae   : > { %v5371_v55 = vpop.eup %5370  ;;  %v2112_v56 = vmul.f32 1.442695, %v2098_v54 }
 0x9af   : > { %v2161_v57 = vpop.permute.xlu0 %2160  ;;  %v2122_v61 = vsel %vm1149_vm3, %v5371_v55, 0.0 }
 0x9b0   : > { %5378 = vpow2.f32 %v2112_v56  ;;  %2123 = vadd.xlane.f32.xlu0 %v2122_v61  ;;  %4889 = vmatpush3.bf16.msra.mxu0 %v2161_v57 }
 0x9b1   : > { %4900 = vmatprep.subr.bf16.mxu0 %v6154_v15 }
 0x9b2   : > { %v5373_v62 = vpop.eup %5372 }
 0x9b3   : > { %v2125_v63 = vsel %vm1149_vm3, %v5373_v62, 0.0  ;;  %v5375_v0 = vpop.eup %5374 }
 0x9b4   : > { %2126 = vadd.xlane.f32.xlu1 %v2125_v63  ;;  %v2131_v3 = vsel %vm1149_vm3, %v5375_v0, 0.0 }
 0x9b6   : > { %v5377_v51 = vpop.eup %5376 }
 0x9b7   : > { %v2128_v1 = vsel %vm1149_vm3, %v5377_v51, 0.0 }
 0x9b8   : > { %2129 = vadd.xlane.f32.xlu0 %v2128_v1  ;;  %2132 = vadd.xlane.f32.xlu1 %v2131_v3 }
 0x9ba   : > { %v7159_v4 = vpop.eup %5378 }
 0x9bb   : > { %v2134_v7 = vsel %vm1149_vm3, %v7159_v4, 0.0 }
 0x9bc   : > { %2135 = vadd.xlane.f32.xlu0 %v2134_v7 }
 0x9c9   : > { %2401 = vrot.lane.b32.xlu1 %v6974_v32, %s6161_s25 }
 0x9cf   : > { %v2091_v9 = vpop.xlane.xlu1 %2090 }
 0x9d0   : > { %v2099_v10 = vsub.f32 %v7136_v5, %v2091_v9 }
 0x9d2   : > { %2350 = vrot.lane.b32.xlu0 %v6976_v33, %s6161_s25  ;;  %v2114_v52 = vmul.f32 1.442695, %v2099_v10 }
 0x9d3   : > { %v2302_v13 = vpop.permute.xlu1 %2301 }
 0x9d4   : > { %5380 = vpow2.f32 %v2114_v52 }
 0x9d6   : > { %2348 = vrot.lane.b32.xlu0 %v6976_v33, %s6162_s11 }
 0x9da   : > { %2399 = vrot.lane.b32.xlu0 %v6974_v32, %s6162_s11 }
 0x9de   : > { %2450 = vrot.lane.b32.xlu0 %v6982_v43, %s6162_s11  ;;  %v7169_v11 = vpop.eup %5380 }
 0x9df   : > { %v2137_v12 = vsel %vm1149_vm3, %v7169_v11, 0.0 }
 0x9ed   : > { %2138 = vadd.xlane.f32.xlu1 %v2137_v12 }
 0x9fe   : > { %2452 = vrot.lane.b32.xlu1 %v6982_v43, %s6161_s25 }
 0x9ff   : > { %v2118_v14 = vpop.xlane.xlu0 %2117 }
 0xa00   : > { %5382 = vrcp.f32 %v2118_v14 }
 0xa02   : > { %2503 = vrot.lane.b32.xlu1 %v6980_v42, %s6161_s25 }
 0xa04   : > { %v2121_v17 = vpop.xlane.xlu1 %2120 }
 0xa05   : > { %5384 = vrcp.f32 %v2121_v17 }
 0xa06   : > { %2501 = vrot.lane.b32.xlu1 %v6980_v42, %s6162_s11 }
 0xa0a   : > { %v5383_v60 = vpop.eup %5382 }
 0xa0b   : > { %v2141_v18 = vmul.f32 %v5383_v60, %v7144_v25 }
 0xa0f   : > { %v5385_v5 = vpop.eup %5384 }
 0xa10   : > { %v2143_v19 = vmul.f32 %v5385_v5, %v7148_v27 }
 0xa12   : > { %v2156_v20 = vpack.c.bf16 %v2143_v19, %v2141_v18 }
 0xa14   : > { %4891 = vmatmul.mubr.msk.bf16.vlgmr.msra.gmra.mrb[24].mxu0 %vm1149_vm3, %v2156_v20 }
 0xa15   : > { %4901 = vmatpush3.bf16.msra.mxu0 %v2255_v59  ;;  %4902 = vmatprep.mubr.msk.bf16.mxu0 %vm6155_vm4, %v6154_v15 }
 0xa16   : > { %4912 = vmatprep.subr.bf16.mxu0 %v6154_v15 }
 0xa3d   : > { %v2124_v21 = vpop.xlane.xlu0 %2123 }
 0xa3e   : > { %5386 = vrcp.f32 %v2124_v21 }
 0xa41   : > { %v2127_v22 = vpop.xlane.xlu1 %2126 }
 0xa42   : > { %5388 = vrcp.f32 %v2127_v22 }
 0xa45   : > { %v2130_v6 = vpop.xlane.xlu0 %2129  ;;  %v2133_v23 = vpop.xlane.xlu1 %2132 }
 0xa46   : > { %5390 = vrcp.f32 %v2130_v6 }
 0xa47   : > { %5392 = vrcp.f32 %v2133_v23 }
 0xa48   : > { %v5387_v16 = vpop.eup %5386 }
 0xa49   : > { %v2145_v25 = vmul.f32 %v5387_v16, %v5371_v55  ;;  %v2136_v27 = vpop.xlane.xlu0 %2135  ;;  %v2402_v39 = vpop.permute.xlu1 %2401 }
 0xa4a   : > { %5394 = vrcp.f32 %v2136_v27 }
 0xa4c   : > { %v5389_v24 = vpop.eup %5388 }
 0xa4d   : > { %v2147_v26 = vmul.f32 %v5389_v24, %v5373_v62  ;;  %v2351_v35 = vpop.permute.xlu0 %2350  ;;  %v2407_v62 = vsel %vm1386_vm5, %v2402_v39, 0 }
 0xa4e   : > { %v2356_v37 = vsel %vm1386_vm5, %v2351_v35, 0 }
 0xa4f   : > { %v2157_v28 = vpack.c.bf16 %v2147_v26, %v2145_v25 }
 0xa50   : > { %v5391_v29 = vpop.eup %5390 }
 0xa51   : > { %v5393_v30 = vpop.eup %5392  ;;  %v2149_v31 = vmul.f32 %v5391_v29, %v5377_v51  ;;  %4897 = vmatmul.mubr.msk.bf16.vlgmr.msra.gmra.mrb[32].mxu1 %vm1149_vm3, %v2157_v28  ;;  %v2349_v38 = vpop.permute.xlu0 %2348 }
 0xa52   : > { %v2151_v34 = vmul.f32 %v5393_v30, %v5375_v0  ;;  %4907 = vmatpush3.bf16.msra.mxu1 %v2302_v13  ;;  %4908 = vmatprep.mubr.msk.bf16.mxu1 %vm6155_vm4, %v6154_v15 }
 0xa53   : > { %4918 = vmatprep.subr.bf16.mxu1 %v6154_v15 }
 0xa54   : > { %v2158_v36 = vpack.c.bf16 %v2151_v34, %v2149_v31  ;;  %v5395_v50 = vpop.eup %5394 }
 0xa55   : > { %v2400_v49 = vpop.permute.xlu0 %2399  ;;  %v2153_v55 = vmul.f32 %v5395_v50, %v7159_v4 }
 0xa56   : > { %4903 = vmatmul.mubr.msk.bf16.vlgmr.msra.gmra.mrb[28].mxu0 %vm1149_vm3, %v2158_v36 }
 0xa57   : > { %4913 = vmatpush3.bf16.xpose.msra.mxu0 %v2356_v37  ;;  %4914 = vmatprep.mubr.msk.bf16.mxu0 %vm6155_vm4, %v6154_v15 }
 0xa58   : > { %4924 = vmatprep.subr.bf16.mxu0 %v6154_v15 }
 0xa59   : > { %v2451_v56 = vpop.permute.xlu0 %2450 }
 0xa5e   : > { %4915 = vmatmul.mubr.msk.bf16.vlgmr.msra.gmra.mrb[32].mxu0 %vm1386_vm5, %v2349_v38 }
 0xa5f   : > { %4926 = vmatprep.mubr.msk.bf16.mxu0 %vm6155_vm4, %v6154_v15 }
 0xa7a   : > { %v2139_v41 = vpop.xlane.xlu1 %2138 }
 0xa7b   : > { %5396 = vrcp.f32 %v2139_v41 }
 0xa7e   : > { %v2453_v45 = vpop.permute.xlu1 %2452 }
 0xa7f   : > { %v2458_v47 = vsel %vm1386_vm5, %v2453_v45, 0 }
 0xa80   : > { %4925 = vmatpush3.bf16.xpose.msra.mxu0 %v2458_v47 }
 0xa81   : > { %4936 = vmatprep.subr.bf16.mxu0 %v6154_v15 }
 0xa82   : > { %v2504_v63 = vpop.permute.xlu1 %2503 }
 0xa83   : > { %v2509_v0 = vsel %vm1386_vm5, %v2504_v63, 0 }
 0xa85   : > { %v5397_v54 = vpop.eup %5396 }
 0xa86   : > { %v2155_v57 = vmul.f32 %v5397_v54, %v7169_v11  ;;  %v2502_v51 = vpop.permute.xlu1 %2501 }
 0xa87   : > { %4927 = vmatmul.mubr.msk.bf16.vlgmr.msra.gmra.mrb[36].mxu0 %vm1386_vm5, %v2451_v56 }
 0xa88   : > { %v2159_v61 = vpack.c.bf16 %v2155_v57, %v2153_v55  ;;  %4938 = vmatprep.mubr.msk.bf16.mxu0 %vm6155_vm4, %v6154_v15 }
 0xa8a   : > { %4909 = vmatmul.mubr.msk.bf16.vlgmr.msra.gmra.mrb[36].mxu1 %vm1149_vm3, %v2159_v61 }
 0xa8b   : > { %4919 = vmatpush3.bf16.xpose.msra.mxu1 %v2407_v62  ;;  %4920 = vmatprep.mubr.msk.bf16.mxu1 %vm6155_vm4, %v6154_v15 }
 0xa8c   : > { %4930 = vmatprep.subr.bf16.mxu1 %v6154_v15 }
 0xa92   : > { %4921 = vmatmul.mubr.msk.bf16.vlgmr.msra.gmra.mrb[40].mxu1 %vm1386_vm5, %v2400_v49 }
 0xa93   : > { %4931 = vmatpush3.bf16.xpose.msra.mxu1 %v2509_v0  ;;  %4932 = vmatprep.mubr.msk.bf16.mxu1 %vm6155_vm4, %v6154_v15 }
 0xa94   : > { %4942 = vmatprep.subr.bf16.mxu1 %v6154_v15 }
 0xa9a   : > { %4933 = vmatmul.mubr.msk.bf16.vlgmr.msra.gmra.mrb[44].mxu1 %vm1386_vm5, %v2502_v51 }
 0xa9b   : > { %4944 = vmatprep.mubr.msk.bf16.mxu1 %vm6155_vm4, %v6154_v15 }
 0xae7   : > { %v7214_v1 = vpop.f32.mrb[24].mxu0 }
 0xae8   : > { %v4892_v3 = vpop.f32.mrb[25].mxu0 }
 0xae9   : > { %v7216_v4 = vpop.f32.mrb[26].mxu0 }
 0xaea   : > { %v5251_v7 = vpack.i.bf16 %v7216_v4, %v7214_v1  ;;  %v4893_v59 = vpop.f32.mrb[27].mxu0 }
 0xb24   : > { %v7220_v9 = vpop.f32.mrb[32].mxu1 }
 0xb25   : > { %v4898_v10 = vpop.f32.mrb[33].mxu1 }
 0xb26   : > { %v7222_v52 = vpop.f32.mrb[34].mxu1 }
 0xb27   : > { %v5256_v11 = vpack.i.bf16 %v7222_v52, %v7220_v9  ;;  %v4899_v12 = vpop.f32.mrb[35].mxu1 }
 0xb29   : > { %v7226_v13 = vpop.f32.mrb[28].mxu0 }
 0xb2a   : > { %v4904_v14 = vpop.f32.mrb[29].mxu0 }
 0xb2b   : > { %v7228_v17 = vpop.f32.mrb[30].mxu0 }
 0xb2c   : > { %v5271_v60 = vpack.i.bf16 %v7228_v17, %v7226_v13  ;;  %v4905_v5 = vpop.f32.mrb[31].mxu0 }
 0xb31   : > { %v2392_v18 = vpop.f32.mrb[32].mxu0 }
 0xb32   : > { %v4916_v19 = vpop.f32.mrb[33].mxu0  ;;  %v2552_v20 = vsel %vm1149_vm3, %v2392_v18, -inf }
 0xb33   : > { %2553 = vmax.xlane.f32.xlu0 %v2552_v20  ;;  %v2395_v21 = vpop.f32.mrb[34].mxu0 }
 0xb34   : > { %v4917_v22 = vpop.f32.mrb[35].mxu0  ;;  %v2555_v6 = vsel %vm1149_vm3, %v2395_v21, -inf }
 0xb35   : > { %2556 = vmax.xlane.f32.xlu1 %v2555_v6 }
 0xb5a   : > { %v7234_v23 = vpop.f32.mrb[36].mxu0 }
 0xb5b   : > { %v4928_v16 = vpop.f32.mrb[37].mxu0  ;;  %v2564_v47 = vsel %vm1149_vm3, %v7234_v23, -inf }
 0xb5c   : > { %v2497_v24 = vpop.f32.mrb[38].mxu0 }
 0xb5d   : > { %v7236_v25 = vpop.f32.mrb[36].mxu1  ;;  %v4929_v26 = vpop.f32.mrb[39].mxu0  ;;  %v2567_v27 = vsel %vm1149_vm3, %v2497_v24, -inf }
 0xb5e   : > { %2568 = vmax.xlane.f32.xlu1 %v2567_v27  ;;  %v4910_v28 = vpop.f32.mrb[37].mxu1 }
 0xb5f   : > { %v7239_v29 = vpop.f32.mrb[38].mxu1 }
 0xb60   : > { %v5276_v30 = vpack.i.bf16 %v7239_v29, %v7236_v25  ;;  %v4911_v31 = vpop.f32.mrb[39].mxu1 }
 0xb65   : > { %v2443_v34 = vpop.f32.mrb[40].mxu1 }
 0xb66   : > { %v4922_v35 = vpop.f32.mrb[41].mxu1  ;;  %v2558_v36 = vsel %vm1149_vm3, %v2443_v34, -inf }
 0xb67   : > { %2559 = vmax.xlane.f32.xlu0 %v2558_v36  ;;  %v2446_v37 = vpop.f32.mrb[42].mxu1 }
 0xb68   : > { %v4923_v38 = vpop.f32.mrb[43].mxu1  ;;  %v2561_v39 = vsel %vm1149_vm3, %v2446_v37, -inf }
 0xb6b   : > { %2562 = vmax.xlane.f32.xlu0 %v2561_v39 }
 0xb6d   : > { %v2545_v41 = vpop.f32.mrb[44].mxu1 }
 0xb6e   : > { %v4934_v45 = vpop.f32.mrb[45].mxu1  ;;  %v2570_v54 = vsel %vm1149_vm3, %v2545_v41, -inf }
 0xb6f   : > { %2691 = vrot.lane.b32.xlu1 %v6974_v32, %s6163_s22  ;;  %2565 = vmax.xlane.f32.xlu0 %v2564_v47  ;;  %v7248_v49 = vpop.f32.mrb[46].mxu1 }
 0xb70   : > { %v4935_v50 = vpop.f32.mrb[47].mxu1  ;;  %v2573_v55 = vsel %vm1149_vm3, %v7248_v49, -inf }
 0xb73   : > { %2738 = vrot.lane.b32.xlu1 %v6982_v43, %s6163_s22  ;;  %2571 = vmax.xlane.f32.xlu0 %v2570_v54 }
 0xb89   : > { %2644 = vrot.lane.b32.xlu0 %v6976_v33, %s6163_s22 }
 0xb97   : > { %2574 = vmax.xlane.f32.xlu1 %v2573_v55 }
 0xba8   : > { %2785 = vrot.lane.b32.xlu1 %v6980_v42, %s6163_s22 }
 0xbc0   : > { %v2554_v56 = vpop.xlane.xlu0 %2553 }
 0xbc1   : > { %v2576_v57 = vsub.f32 %v2392_v18, %v2554_v56 }
 0xbc2   : > { %v2557_v61 = vpop.xlane.xlu1 %2556 }
 0xbc3   : > { %v2584_v62 = vmul.f32 1.442695, %v2576_v57  ;;  %v2577_v63 = vsub.f32 %v2395_v21, %v2557_v61 }
 0xbc5   : > { %5398 = vpow2.f32 %v2584_v62  ;;  %v2586_v0 = vmul.f32 1.442695, %v2577_v63 }
 0xbc7   : > { %5400 = vpow2.f32 %v2586_v0 }
 0xbcf   : > { %v7256_v51 = vpop.eup %5398 }
 0xbd0   : > { %v2600_v3 = vsel %vm1149_vm3, %v7256_v51, 0.0 }
 0xbd1   : > { %v7260_v59 = vpop.eup %5400  ;;  %2601 = vadd.xlane.f32.xlu0 %v2600_v3 }
 0xbd2   : > { %v2603_v10 = vsel %vm1149_vm3, %v7260_v59, 0.0 }
 0xbd3   : > { %2604 = vadd.xlane.f32.xlu1 %v2603_v10 }
 0xbeb   : > { %v2569_v12 = vpop.xlane.xlu1 %2568 }
 0xbec   : > { %v2581_v19 = vsub.f32 %v2497_v24, %v2569_v12 }
 0xbee   : > { %v2594_v6 = vmul.f32 1.442695, %v2581_v19 }
 0xbef   : > { %v2692_v14 = vpop.permute.xlu1 %2691 }
 0xbf0   : > { %4943 = vmatpush3.bf16.msra.mxu1 %v2692_v14 }
 0xbf1   : > { %4954 = vmatprep.subr.bf16.mxu1 %v6154_v15 }
 0xbf3   : > { %v2739_v55 = vpop.permute.xlu1 %2738 }
 0xbf4   : > { %v2560_v5 = vpop.xlane.xlu0 %2559 }
 0xbf5   : > { %v2578_v18 = vsub.f32 %v2443_v34, %v2560_v5 }
 0xbf7   : > { %v2588_v20 = vmul.f32 1.442695, %v2578_v18 }
 0xbf8   : > { %v2563_v21 = vpop.xlane.xlu0 %2562 }
 0xbf9   : > { %5402 = vpow2.f32 %v2588_v20  ;;  %v2579_v22 = vsub.f32 %v2446_v37, %v2563_v21 }
 0xbfb   : > { %v2590_v16 = vmul.f32 1.442695, %v2579_v22 }
 0xbfc   : > { %v2566_v26 = vpop.xlane.xlu0 %2565 }
 0xbfd   : > { %5404 = vpow2.f32 %v2590_v16  ;;  %v2580_v27 = vsub.f32 %v7234_v23, %v2566_v26 }
 0xbfe   : > { %5406 = vpow2.f32 %v2594_v6 }
 0xbff   : > { %v2592_v28 = vmul.f32 1.442695, %v2580_v27 }
 0xc00   : > { %v2572_v31 = vpop.xlane.xlu0 %2571 }
 0xc01   : > { %5408 = vpow2.f32 %v2592_v28  ;;  %v2582_v35 = vsub.f32 %v2545_v41, %v2572_v31 }
 0xc03   : > { %v5403_v36 = vpop.eup %5402  ;;  %v2596_v38 = vmul.f32 1.442695, %v2582_v35 }
 0xc04   : > { %v2645_v39 = vpop.permute.xlu0 %2644  ;;  %v2606_v24 = vsel %vm1149_vm3, %v5403_v36, 0.0 }
 0xc05   : > { %5410 = vpow2.f32 %v2596_v38  ;;  %2607 = vadd.xlane.f32.xlu0 %v2606_v24  ;;  %4937 = vmatpush3.bf16.msra.mxu0 %v2645_v39 }
 0xc06   : > { %4948 = vmatprep.subr.bf16.mxu0 %v6154_v15 }
 0xc07   : > { %v5405_v34 = vpop.eup %5404 }
 0xc08   : > { %v2609_v37 = vsel %vm1149_vm3, %v5405_v34, 0.0  ;;  %v5407_v45 = vpop.eup %5406 }
 0xc09   : > { %2610 = vadd.xlane.f32.xlu1 %v2609_v37  ;;  %v2615_v41 = vsel %vm1149_vm3, %v5407_v45, 0.0 }
 0xc0b   : > { %v5409_v23 = vpop.eup %5408 }
 0xc0c   : > { %v2612_v47 = vsel %vm1149_vm3, %v5409_v23, 0.0 }
 0xc0d   : > { %2613 = vadd.xlane.f32.xlu0 %v2612_v47  ;;  %2616 = vadd.xlane.f32.xlu1 %v2615_v41 }
 0xc0f   : > { %v7271_v50 = vpop.eup %5410 }
 0xc10   : > { %v2618_v54 = vsel %vm1149_vm3, %v7271_v50, 0.0 }
 0xc11   : > { %2619 = vadd.xlane.f32.xlu0 %v2618_v54 }
 0xc1e   : > { %2885 = vrot.lane.b32.xlu1 %v6974_v32, %s6164_s9 }
 0xc24   : > { %v2575_v56 = vpop.xlane.xlu1 %2574 }
 0xc25   : > { %v2583_v57 = vsub.f32 %v7248_v49, %v2575_v56 }
 0xc27   : > { %2834 = vrot.lane.b32.xlu0 %v6976_v33, %s6164_s9  ;;  %v2598_v61 = vmul.f32 1.442695, %v2583_v57 }
 0xc28   : > { %v2786_v0 = vpop.permute.xlu1 %2785 }
 0xc29   : > { %5412 = vpow2.f32 %v2598_v61 }
 0xc2b   : > { %2832 = vrot.lane.b32.xlu0 %v6976_v33, %s6165_s26 }
 0xc2f   : > { %2883 = vrot.lane.b32.xlu0 %v6974_v32, %s6165_s26 }
 0xc33   : > { %2934 = vrot.lane.b32.xlu0 %v6982_v43, %s6165_s26  ;;  %v7281_v62 = vpop.eup %5412 }
 0xc34   : > { %v2621_v63 = vsel %vm1149_vm3, %v7281_v62, 0.0 }
 0xc42   : > { %2622 = vadd.xlane.f32.xlu1 %v2621_v63 }
 0xc53   : > { %2936 = vrot.lane.b32.xlu1 %v6982_v43, %s6164_s9 }
 0xc57   : > { %2987 = vrot.lane.b32.xlu1 %v6980_v42, %s6164_s9 }
 0xc5b   : > { %2985 = vrot.lane.b32.xlu1 %v6980_v42, %s6165_s26 }
 0xc5e   : > { %v2602_v49 = vpop.xlane.xlu0 %2601 }
 0xc5f   : > { %5414 = vrcp.f32 %v2602_v49 }
 0xc60   : > { %v2605_v3 = vpop.xlane.xlu1 %2604 }
 0xc61   : > { %5416 = vrcp.f32 %v2605_v3 }
 0xc69   : > { %v5415_v10 = vpop.eup %5414 }
 0xc6a   : > { %v2625_v14 = vmul.f32 %v5415_v10, %v7256_v51 }
 0xc6b   : > { %v5417_v12 = vpop.eup %5416 }
 0xc6c   : > { %v2627_v5 = vmul.f32 %v5417_v12, %v7260_v59 }
 0xc6e   : > { %v2640_v18 = vpack.c.bf16 %v2627_v5, %v2625_v14 }
 0xc70   : > { %4939 = vmatmul.mubr.msk.bf16.vlgmr.msra.gmra.mrb[40].mxu0 %vm1149_vm3, %v2640_v18 }
 0xc71   : > { %4949 = vmatpush3.bf16.msra.mxu0 %v2739_v55  ;;  %4950 = vmatprep.mubr.msk.bf16.mxu0 %vm6155_vm4, %v6154_v15 }
 0xc72   : > { %4960 = vmatprep.subr.bf16.mxu0 %v6154_v15 }
 0xc92   : > { %v2608_v19 = vpop.xlane.xlu0 %2607 }
 0xc93   : > { %5418 = vrcp.f32 %v2608_v19 }
 0xc96   : > { %v2611_v20 = vpop.xlane.xlu1 %2610 }
 0xc97   : > { %5420 = vrcp.f32 %v2611_v20 }
 0xc9a   : > { %v2614_v21 = vpop.xlane.xlu0 %2613  ;;  %v2617_v22 = vpop.xlane.xlu1 %2616 }
 0xc9b   : > { %5422 = vrcp.f32 %v2614_v21 }
 0xc9c   : > { %5424 = vrcp.f32 %v2617_v22 }
 0xc9d   : > { %v5419_v51 = vpop.eup %5418 }
 0xc9e   : > { %v2629_v59 = vmul.f32 %v5419_v51, %v5403_v36  ;;  %v2620_v26 = vpop.xlane.xlu0 %2619 }
 0xc9f   : > { %5426 = vrcp.f32 %v2620_v26 }
 0xca1   : > { %v5421_v6 = vpop.eup %5420 }
 0xca2   : > { %v2631_v16 = vmul.f32 %v5421_v6, %v5405_v34  ;;  %v2835_v39 = vpop.permute.xlu0 %2834  ;;  %v2886_v34 = vpop.permute.xlu1 %2885 }
 0xca3   : > { %v2840_v37 = vsel %vm1386_vm5, %v2835_v39, 0 }
 0xca4   : > { %v2641_v27 = vpack.c.bf16 %v2631_v16, %v2629_v59 }
 0xca5   : > { %v5423_v28 = vpop.eup %5422 }
 0xca6   : > { %v5425_v31 = vpop.eup %5424  ;;  %v2633_v35 = vmul.f32 %v5423_v28, %v5409_v23  ;;  %4945 = vmatmul.mubr.msk.bf16.vlgmr.msra.gmra.mrb[48].mxu1 %vm1149_vm3, %v2641_v27  ;;  %v2833_v36 = vpop.permute.xlu0 %2832 }
 0xca7   : > { %v2635_v38 = vmul.f32 %v5425_v31, %v5407_v45  ;;  %4955 = vmatpush3.bf16.msra.mxu1 %v2786_v0  ;;  %4956 = vmatprep.mubr.msk.bf16.mxu1 %vm6155_vm4, %v6154_v15  ;;  %v2891_v0 = vsel %vm1386_vm5, %v2886_v34, 0 }
 0xca8   : > { %4966 = vmatprep.subr.bf16.mxu1 %v6154_v15 }
 0xca9   : > { %v2642_v24 = vpack.c.bf16 %v2635_v38, %v2633_v35  ;;  %v5427_v54 = vpop.eup %5426 }
 0xcaa   : > { %v2884_v41 = vpop.permute.xlu0 %2883  ;;  %v2637_v56 = vmul.f32 %v5427_v54, %v7271_v50 }
 0xcab   : > { %4951 = vmatmul.mubr.msk.bf16.vlgmr.msra.gmra.mrb[44].mxu0 %vm1149_vm3, %v2642_v24 }
 0xcac   : > { %4961 = vmatpush3.bf16.xpose.msra.mxu0 %v2840_v37  ;;  %4962 = vmatprep.mubr.msk.bf16.mxu0 %vm6155_vm4, %v6154_v15 }
 0xcad   : > { %4972 = vmatprep.subr.bf16.mxu0 %v6154_v15 }
 0xcae   : > { %v2935_v57 = vpop.permute.xlu0 %2934 }
 0xcb3   : > { %4963 = vmatmul.mubr.msk.bf16.vlgmr.msra.gmra.mrb[48].mxu0 %vm1386_vm5, %v2833_v36 }
 0xcb4   : > { %4974 = vmatprep.mubr.msk.bf16.mxu0 %vm6155_vm4, %v6154_v15 }
 0xccf   : > { %v2623_v45 = vpop.xlane.xlu1 %2622 }
 0xcd0   : > { %5428 = vrcp.f32 %v2623_v45 }
 0xcd3   : > { %v2937_v23 = vpop.permute.xlu1 %2936 }
 0xcd4   : > { %v2942_v47 = vsel %vm1386_vm5, %v2937_v23, 0 }
 0xcd5   : > { %4973 = vmatpush3.bf16.xpose.msra.mxu0 %v2942_v47 }
 0xcd6   : > { %4984 = vmatprep.subr.bf16.mxu0 %v6154_v15 }
 0xcd7   : > { %v2988_v50 = vpop.permute.xlu1 %2987 }
 0xcd8   : > { %v2993_v49 = vsel %vm1386_vm5, %v2988_v50, 0 }
 0xcda   : > { %v5429_v55 = vpop.eup %5428 }
 0xcdb   : > { %v2639_v61 = vmul.f32 %v5429_v55, %v7281_v62  ;;  %v2986_v62 = vpop.permute.xlu1 %2985 }
 0xcdc   : > { %4975 = vmatmul.mubr.msk.bf16.vlgmr.msra.gmra.mrb[52].mxu0 %vm1386_vm5, %v2935_v57 }
 0xcdd   : > { %v2643_v63 = vpack.c.bf16 %v2639_v61, %v2637_v56  ;;  %4986 = vmatprep.mubr.msk.bf16.mxu0 %vm6155_vm4, %v6154_v15 }
 0xcdf   : > { %4957 = vmatmul.mubr.msk.bf16.vlgmr.msra.gmra.mrb[52].mxu1 %vm1149_vm3, %v2643_v63 }
 0xce0   : > { %4967 = vmatpush3.bf16.xpose.msra.mxu1 %v2891_v0  ;;  %4968 = vmatprep.mubr.msk.bf16.mxu1 %vm6155_vm4, %v6154_v15 }
 0xce1   : > { %4978 = vmatprep.subr.bf16.mxu1 %v6154_v15 }
 0xce7   : > { %4969 = vmatmul.mubr.msk.bf16.vlgmr.msra.gmra.mrb[56].mxu1 %vm1386_vm5, %v2884_v41 }
 0xce8   : > { %4979 = vmatpush3.bf16.xpose.msra.mxu1 %v2993_v49  ;;  %4980 = vmatprep.mubr.msk.bf16.mxu1 %vm6155_vm4, %v6154_v15 }
 0xce9   : > { %4990 = vmatprep.subr.bf16.mxu1 %v6154_v15 }
 0xcef   : > { %4981 = vmatmul.mubr.msk.bf16.vlgmr.msra.gmra.mrb[60].mxu1 %vm1386_vm5, %v2986_v62 }
 0xcf0   : > { %4992 = vmatprep.mubr.msk.bf16.mxu1 %vm6155_vm4, %v6154_v15 }
 0xd43   : > { %v7326_v3 = vpop.f32.mrb[40].mxu0 }
 0xd44   : > { %v4940_v10 = vpop.f32.mrb[41].mxu0 }
 0xd45   : > { %v7328_v12 = vpop.f32.mrb[42].mxu0 }
 0xd46   : > { %v5261_v14 = vpack.i.bf16 %v7328_v12, %v7326_v3  ;;  %v4941_v5 = vpop.f32.mrb[43].mxu0 }
 0xd79   : > { %v7332_v18 = vpop.f32.mrb[48].mxu1 }
 0xd7a   : > { %v4946_v19 = vpop.f32.mrb[49].mxu1 }
 0xd7b   : > { %v7334_v20 = vpop.f32.mrb[50].mxu1 }
 0xd7c   : > { %v5266_v21 = vpack.i.bf16 %v7334_v20, %v7332_v18  ;;  %v4947_v22 = vpop.f32.mrb[51].mxu1 }
 0xd7e   : > { %v7338_v51 = vpop.f32.mrb[44].mxu0 }
 0xd7f   : > { %v4952_v6 = vpop.f32.mrb[45].mxu0 }
 0xd80   : > { %v7340_v59 = vpop.f32.mrb[46].mxu0 }
 0xd81   : > { %v5286_v16 = vpack.i.bf16 %v7340_v59, %v7338_v51  ;;  %v4953_v26 = vpop.f32.mrb[47].mxu0 }
 0xd86   : > { %v2876_v27 = vpop.f32.mrb[48].mxu0 }
 0xd87   : > { %v4964_v28 = vpop.f32.mrb[49].mxu0  ;;  %v3036_v31 = vsel %vm1149_vm3, %v2876_v27, -inf }
 0xd88   : > { %3037 = vmax.xlane.f32.xlu0 %v3036_v31  ;;  %v2879_v35 = vpop.f32.mrb[50].mxu0 }
 0xd89   : > { %v4965_v38 = vpop.f32.mrb[51].mxu0  ;;  %v3039_v39 = vsel %vm1149_vm3, %v2879_v35, -inf }
 0xd8a   : > { %3040 = vmax.xlane.f32.xlu1 %v3039_v39 }
 0xdaf   : > { %v2978_v24 = vpop.f32.mrb[52].mxu0 }
 0xdb0   : > { %v4976_v37 = vpop.f32.mrb[53].mxu0  ;;  %v3048_v10 = vsel %vm1149_vm3, %v2978_v24, -inf }
 0xdb1   : > { %v2981_v36 = vpop.f32.mrb[54].mxu0 }
 0xdb2   : > { %v7346_v34 = vpop.f32.mrb[52].mxu1  ;;  %v4977_v45 = vpop.f32.mrb[55].mxu0  ;;  %v3051_v23 = vsel %vm1149_vm3, %v2981_v36, -inf }
 0xdb3   : > { %3052 = vmax.xlane.f32.xlu1 %v3051_v23  ;;  %v4958_v47 = vpop.f32.mrb[53].mxu1 }
 0xdb4   : > { %v7349_v41 = vpop.f32.mrb[54].mxu1 }
 0xdb5   : > { %v5296_v54 = vpack.i.bf16 %v7349_v41, %v7346_v34  ;;  %v4959_v55 = vpop.f32.mrb[55].mxu1 }
 0xdba   : > { %v2927_v56 = vpop.f32.mrb[56].mxu1 }
 0xdbb   : > { %v4970_v57 = vpop.f32.mrb[57].mxu1  ;;  %v3042_v61 = vsel %vm1149_vm3, %v2927_v56, -inf }
 0xdbc   : > { %3043 = vmax.xlane.f32.xlu0 %v3042_v61  ;;  %v2930_v63 = vpop.f32.mrb[58].mxu1 }
 0xdbd   : > { %v4971_v0 = vpop.f32.mrb[59].mxu1  ;;  %v3045_v50 = vsel %vm1149_vm3, %v2930_v63, -inf }
 0xdc0   : > { %3046 = vmax.xlane.f32.xlu0 %v3045_v50 }
 0xdc2   : > { %v3029_v49 = vpop.f32.mrb[60].mxu1 }
 0xdc3   : > { %v4982_v62 = vpop.f32.mrb[61].mxu1  ;;  %v3054_v6 = vsel %vm1149_vm3, %v3029_v49, -inf }
 0xdc4   : > { %3049 = vmax.xlane.f32.xlu0 %v3048_v10  ;;  %v7356_v5 = vpop.f32.mrb[62].mxu1 }
 0xdc5   : > { %v4983_v19 = vpop.f32.mrb[63].mxu1  ;;  %v3057_v22 = vsel %vm1149_vm3, %v7356_v5, -inf }
 0xdc6   : > { %3058 = vmax.xlane.f32.xlu1 %v3057_v22 }
 0xdc8   : > { %3055 = vmax.xlane.f32.xlu0 %v3054_v6 }
 0xe15   : > { %v3038_v26 = vpop.xlane.xlu0 %3037 }
 0xe16   : > { %v3060_v28 = vsub.f32 %v2876_v27, %v3038_v26 }
 0xe17   : > { %v3041_v31 = vpop.xlane.xlu1 %3040 }
 0xe18   : > { %v3068_v38 = vmul.f32 1.442695, %v3060_v28  ;;  %v3061_v39 = vsub.f32 %v2879_v35, %v3041_v31 }
 0xe1a   : > { %5430 = vpow2.f32 %v3068_v38  ;;  %v3070_v37 = vmul.f32 1.442695, %v3061_v39 }
 0xe1c   : > { %5432 = vpow2.f32 %v3070_v37 }
 0xe24   : > { %v7361_v45 = vpop.eup %5430 }
 0xe25   : > { %v3084_v23 = vsel %vm1149_vm3, %v7361_v45, 0.0 }
 0xe26   : > { %v7365_v47 = vpop.eup %5432  ;;  %3085 = vadd.xlane.f32.xlu0 %v3084_v23 }
 0xe27   : > { %v3087_v55 = vsel %vm1149_vm3, %v7365_v47, 0.0 }
 0xe28   : > { %3088 = vadd.xlane.f32.xlu1 %v3087_v55 }
 0xe40   : > { %v3053_v57 = vpop.xlane.xlu1 %3052 }
 0xe41   : > { %v3065_v0 = vsub.f32 %v2981_v36, %v3053_v57 }
 0xe43   : > { %v3078_v10 = vmul.f32 1.442695, %v3065_v0 }
 0xe49   : > { %v3044_v27 = vpop.xlane.xlu0 %3043 }
 0xe4a   : > { %v3062_v61 = vsub.f32 %v2927_v56, %v3044_v27 }
 0xe4c   : > { %v3072_v35 = vmul.f32 1.442695, %v3062_v61 }
 0xe4d   : > { %v3047_v50 = vpop.xlane.xlu0 %3046 }
 0xe4e   : > { %5434 = vpow2.f32 %v3072_v35  ;;  %v3063_v62 = vsub.f32 %v2930_v63, %v3047_v50 }
 0xe50   : > { %v3074_v19 = vmul.f32 1.442695, %v3063_v62 }
 0xe51   : > { %v3050_v22 = vpop.xlane.xlu0 %3049 }
 0xe52   : > { %5436 = vpow2.f32 %v3074_v19  ;;  %v3064_v6 = vsub.f32 %v2978_v24, %v3050_v22 }
 0xe53   : > { %5438 = vpow2.f32 %v3078_v10  ;;  %v3059_v27 = vpop.xlane.xlu1 %3058 }
 0xe54   : > { %v3076_v26 = vmul.f32 1.442695, %v3064_v6  ;;  %v3067_v61 = vsub.f32 %v7356_v5, %v3059_v27 }
 0xe55   : > { %v3056_v28 = vpop.xlane.xlu0 %3055 }
 0xe56   : > { %5440 = vpow2.f32 %v3076_v26  ;;  %v3066_v31 = vsub.f32 %v3029_v49, %v3056_v28 }
 0xe58   : > { %v5435_v38 = vpop.eup %5434  ;;  %v3080_v39 = vmul.f32 1.442695, %v3066_v31  ;;  %v5312_v31 = vld [vmem:[%s862_s19] sm:$0xff]  }
 0xe59   : > { %v3090_v37 = vsel %vm1149_vm3, %v5435_v38, 0.0 }
 0xe5a   : > { %5442 = vpow2.f32 %v3080_v39  ;;  %3091 = vadd.xlane.f32.xlu0 %v3090_v37 }
 0xe5c   : > { %v5437_v36 = vpop.eup %5436 }
 0xe5d   : > { %v3093_v56 = vsel %vm1149_vm3, %v5437_v36, 0.0  ;;  %v7371_v63 = vpop.eup %5438 }
 0xe5e   : > { %3094 = vadd.xlane.f32.xlu1 %v3093_v56  ;;  %v3099_v49 = vsel %vm1149_vm3, %v7371_v63, 0.0 }
 0xe60   : > { %v7373_v23 = vpop.eup %5440 }
 0xe61   : > { %v3096_v24 = vsel %vm1149_vm3, %v7373_v23, 0.0 }
 0xe62   : > { %3097 = vadd.xlane.f32.xlu0 %v3096_v24  ;;  %3100 = vadd.xlane.f32.xlu1 %v3099_v49 }
 0xe64   : > { %v7379_v55 = vpop.eup %5442 }
 0xe65   : > { %v3102_v57 = vsel %vm1149_vm3, %v7379_v55, 0.0 }
 0xe66   : > { %3103 = vadd.xlane.f32.xlu0 %v3102_v57 }
 0xe73   : > { %3175 = vrot.lane.b32.xlu1 %v6974_v32, %s6166_s17  ;;  %v3082_v32 = vmul.f32 1.442695, %v3067_v61 }
 0xe75   : > { %5444 = vpow2.f32 %v3082_v32 }
 0xe77   : > { %3222 = vrot.lane.b32.xlu1 %v6982_v43, %s6166_s17 }
 0xe7c   : > { %3128 = vrot.lane.b32.xlu0 %v6976_v33, %s6166_s17 }
 0xe7f   : > { %v5445_v33 = vpop.eup %5444 }
 0xe80   : > { %5252 = vrot.lane.b32.xlu0 %v5251_v7, %s6167_s30  ;;  %v3105_v43 = vsel %vm1149_vm3, %v5445_v33, 0.0 }
 0xe84   : > { %5262 = vrot.lane.b32.xlu0 %v5261_v14, %s6168_s7 }
 0xe88   : > { %5272 = vrot.lane.b32.xlu0 %v5271_v60, %s6167_s30 }
 0xe9b   : > { %3106 = vadd.xlane.f32.xlu1 %v3105_v43 }
 0xeac   : > { %3269 = vrot.lane.b32.xlu1 %v6980_v42, %s6166_s17 }
 0xeb0   : > { %5257 = vrot.lane.b32.xlu1 %v5256_v11, %s6167_s30 }
 0xeb3   : > { %v3086_v1 = vpop.xlane.xlu0 %3085 }
 0xeb4   : > { %5267 = vrot.lane.b32.xlu1 %v5266_v21, %s6168_s7 }
 0xeb5   : > { %v3089_v4 = vpop.xlane.xlu1 %3088 }
 0xeb6   : > { %5446 = vrcp.f32 %v3089_v4 }
 0xeb7   : > { %5448 = vrcp.f32 %v3086_v1 }
 0xeb8   : > { %5277 = vrot.lane.b32.xlu1 %v5276_v30, %s6167_s30 }
 0xec0   : > { %v5447_v52 = vpop.eup %5446 }
 0xec1   : > { %v5449_v11 = vpop.eup %5448  ;;  %v3111_v25 = vmul.f32 %v5447_v52, %v7365_v47 }
 0xec2   : > { %v3109_v30 = vmul.f32 %v5449_v11, %v7361_v45 }
 0xec4   : > { %v3124_v20 = vpack.c.bf16 %v3111_v25, %v3109_v30 }
 0xee7   : > { %v3092_v7 = vpop.xlane.xlu0 %3091 }
 0xee8   : > { %5450 = vrcp.f32 %v3092_v7 }
 0xeeb   : > { %v3095_v42 = vpop.xlane.xlu1 %3094 }
 0xeec   : > { %5452 = vrcp.f32 %v3095_v42 }
 0xeef   : > { %v3098_v13 = vpop.xlane.xlu0 %3097  ;;  %v3101_v9 = vpop.xlane.xlu1 %3100 }
 0xef0   : > { %5454 = vrcp.f32 %v3098_v13 }
 0xef1   : > { %5456 = vrcp.f32 %v3101_v9 }
 0xef2   : > { %v5451_v3 = vpop.eup %5450 }
 0xef3   : > { %v3104_v17 = vpop.xlane.xlu0 %3103  ;;  %v3176_v60 = vpop.permute.xlu1 %3175  ;;  %v3113_v12 = vmul.f32 %v5451_v3, %v5435_v38 }
 0xef4   : > { %4991 = vmatpush3.bf16.msra.mxu1 %v3176_v60  ;;  %5458 = vrcp.f32 %v3104_v17 }
 0xef5   : > { %5002 = vmatprep.subr.bf16.mxu1 %v6154_v15 }
 0xef6   : > { %v5453_v29 = vpop.eup %5452 }
 0xef7   : > { %v3115_v14 = vmul.f32 %v5453_v29, %v5437_v36  ;;  %v3129_v18 = vpop.permute.xlu0 %3128  ;;  %v3223_v35 = vpop.permute.xlu1 %3222 }
 0xef8   : > { %4985 = vmatpush3.bf16.msra.mxu0 %v3129_v18 }
 0xef9   : > { %4996 = vmatprep.subr.bf16.mxu0 %v6154_v15  ;;  %v3125_v21 = vpack.c.bf16 %v3115_v14, %v3113_v12 }
 0xefa   : > { %v5455_v5 = vpop.eup %5454 }
 0xefb   : > { %v5457_v0 = vpop.eup %5456  ;;  %4987 = vmatmul.mubr.msk.bf16.vlgmr.msra.gmra.mrb[56].mxu0 %vm1149_vm3, %v3124_v20  ;;  %4993 = vmatmul.mubr.msk.bf16.vlgmr.msra.gmra.mrb[64].mxu1 %vm1149_vm3, %v3125_v21  ;;  %v3117_v45 = vmul.f32 %v5455_v5, %v7373_v23  ;;  %v5253_v42 = vpop.permute.xlu0 %5252 }
 0xefc   : > { %4997 = vmatpush3.bf16.msra.mxu0 %v3223_v35  ;;  %4998 = vmatprep.mubr.msk.bf16.mxu0 %vm6155_vm4, %v6154_v15  ;;  %v3119_v47 = vmul.f32 %v5457_v0, %v7371_v63  ;;  %v5254_v9 = vunpack.i.l.bf16 %v5253_v42 }
 0xefd   : > { %5004 = vmatprep.mubr.msk.bf16.mxu1 %vm6155_vm4, %v6154_v15  ;;  %5008 = vmatprep.subr.bf16.mxu0 %v5312_v31 }
 0xefe   : > { %v3126_v50 = vpack.c.bf16 %v3119_v47, %v3117_v45  ;;  %v5459_v19 = vpop.eup %5458  ;;  %v3412_v29 = vsel %vm1386_vm5, %v7110_v40, %v5254_v9 }
 0xeff   : > { %v3121_v6 = vmul.f32 %v5459_v19, %v7379_v55  ;;  %v5263_v51 = vpop.permute.xlu0 %5262 }
 0xf00   : > { %v5264_v17 = vunpack.i.l.bf16 %v5263_v51 }
 0xf02   : > { %v3421_v35 = vsel %vm3420_vm6, %v3412_v29, %v5264_v17 }
 0xf03   : > { %4999 = vmatmul.mubr.msk.bf16.vlgmr.msra.gmra.mrb[60].mxu0 %vm1149_vm3, %v3126_v50  ;;  %v5273_v52 = vpop.permute.xlu0 %5272 }
 0xf04   : > { %5009 = vmatpush3.bf16.msra.mxu0 %v5312_v31 }
 0xf28   : > { %v3107_v62 = vpop.xlane.xlu1 %3106 }
 0xf29   : > { %5460 = vrcp.f32 %v3107_v62 }
 0xf2c   : > { %v3270_v10 = vpop.permute.xlu1 %3269 }
 0xf2d   : > { %5003 = vmatpush3.bf16.msra.mxu1 %v3270_v10 }
 0xf30   : > { %v5258_v13 = vpop.permute.xlu1 %5257 }
 0xf31   : > { %v5260_v11 = vunpack.i.h.bf16 %v5258_v13  ;;  %v5259_v34 = vunpack.i.l.bf16 %v5258_v13 }
 0xf33   : > { %v5461_v22 = vpop.eup %5460  ;;  %v3415_v30 = vsel %vm1386_vm5, %v7121_v58, %v5260_v11  ;;  %v3414_v12 = vsel %vm1386_vm5, %v7118_v53, %v5259_v34 }
 0xf34   : > { %v3123_v26 = vmul.f32 %v5461_v22, %v5445_v33  ;;  %v5268_v59 = vpop.permute.xlu1 %5267  ;;  %v5275_v22 = vunpack.i.h.bf16 %v5273_v52 }
 0xf35   : > { %v5270_v60 = vunpack.i.h.bf16 %v5268_v59  ;;  %v5269_v3 = vunpack.i.l.bf16 %v5268_v59  ;;  %v4666_v59 = vld [vmem:[%s870_s23] ss:$0 sm:$0xff] }
 0xf36   : > { %v3127_v28 = vpack.c.bf16 %v3123_v26, %v3121_v6  ;;  %v5274_v6 = vunpack.i.l.bf16 %v5273_v52 }
 0xf37   : > { %v3423_v45 = vsel %vm3420_vm6, %v3414_v12, %v5269_v3  ;;  %v3424_v40 = vsel %vm3420_vm6, %v3415_v30, %v5270_v60  ;;  %v5513_v3 = vld [vmem:[#allocation2 + $0x18] sm:$0xff] }
 0xf38   : > { %5005 = vmatmul.mubr.msk.bf16.vlgmr.msra.gmra.mrb[68].mxu1 %vm1149_vm3, %v3127_v28  ;;  %v5278_v41 = vpop.permute.xlu1 %5277 }
 0xfce   : > { %v3168_v15 = vpop.f32.mrb[56].mxu0  ;;  %v3215_v38 = vpop.f32.mrb[64].mxu1 }
 0xfcf   : > { %v4988_v39 = vpop.f32.mrb[57].mxu0  ;;  %v4994_v37 = vpop.f32.mrb[65].mxu1 }
 0xfd0   : > { %v3171_v36 = vpop.f32.mrb[58].mxu0  ;;  %v3218_v56 = vpop.f32.mrb[66].mxu1 }
 0xfd1   : > { %v5281_v63 = vpack.i.bf16 %v3171_v36, %v3168_v15  ;;  %v5291_v23 = vpack.i.bf16 %v3218_v56, %v3215_v38  ;;  %v4989_v24 = vpop.f32.mrb[59].mxu0  ;;  %v4995_v49 = vpop.f32.mrb[67].mxu1  ;;  %v3417_v15 = vsel %vm1386_vm5, %v7116_v48, %v5275_v22  ;;  %v3416_v38 = vsel %vm1386_vm5, %v7114_v46, %v5274_v6 }
 0xfd2   : > { %v5279_v48 = vunpack.i.l.bf16 %v5278_v41 }
 0xfd3   : > { %5282 = vrot.lane.b32.xlu0 %v5281_v63, %s6169_s24  ;;  %5292 = vrot.lane.b32.xlu1 %v5291_v23, %s6169_s24 }
 0xfd6   : > { %v3262_v55 = vpop.f32.mrb[60].mxu0 }
 0xfd7   : > { %5287 = vrot.lane.b32.xlu0 %v5286_v16, %s6168_s7  ;;  %v5000_v57 = vpop.f32.mrb[61].mxu0  ;;  %5297 = vrot.lane.b32.xlu1 %v5296_v54, %s6168_s7  ;;  %v5255_v16 = vunpack.i.h.bf16 %v5253_v42  ;;  %v5265_v54 = vunpack.i.h.bf16 %v5263_v51 }
 0xfd8   : > { %v3265_v27 = vpop.f32.mrb[62].mxu0 }
 0xfd9   : > { %v5301_v61 = vpack.i.bf16 %v3265_v27, %v3262_v55  ;;  %v5001_v32 = vpop.f32.mrb[63].mxu0  ;;  %v3413_v25 = vsel %vm1386_vm5, %v7112_v44, %v5255_v16  ;;  %v5280_v55 = vunpack.i.h.bf16 %v5278_v41  ;;  %v5510_v16 = vld [vmem:[#allocation2 + $0x10] sm:$0xff] }
 0xfda   : > { %v3422_v44 = vsel %vm3420_vm6, %v3413_v25, %v5265_v54  ;;  %v3418_v32 = vsel %vm1386_vm5, %v7126_v2, %v5279_v48  ;;  %v5511_v2 = vld [vmem:[#allocation2] sm:$0xff]  ;;  %v5512_v54 = vld [vmem:[#allocation2 + $0x8] sm:$0xff] }
 0xfdb   : > { %5302 = vrot.lane.b32.xlu0 %v5301_v61, %s6169_s24  ;;  %v3419_v61 = vsel %vm1386_vm5, %v7129_v8, %v5280_v55 }
0x100b   : > { %v3309_v33 = vpop.f32.mrb[68].mxu1 }
0x100c   : > { %v5006_v43 = vpop.f32.mrb[69].mxu1 }
0x100d   : > { %v3312_v1 = vpop.f32.mrb[70].mxu1 }
0x100e   : > { %v5306_v4 = vpack.i.bf16 %v3312_v1, %v3309_v33  ;;  %v5007_v7 = vpop.f32.mrb[71].mxu1 }
0x1010   : > { %5307 = vrot.lane.b32.xlu1 %v5306_v4, %s6169_s24 }
0x1045   : > { %v5283_v14 = vpop.permute.xlu0 %5282  ;;  %v5293_v18 = vpop.permute.xlu1 %5292 }
0x1046   : > { %v5285_v20 = vunpack.i.h.bf16 %v5283_v14  ;;  %v5284_v21 = vunpack.i.l.bf16 %v5283_v14  ;;  %v5295_v5 = vunpack.i.h.bf16 %v5293_v18  ;;  %v5294_v0 = vunpack.i.l.bf16 %v5293_v18 }
0x1048   : > { %v3431_v58 = vsel %vm3429_vm7, %v3422_v44, %v5285_v20  ;;  %v3430_v47 = vsel %vm3429_vm7, %v3421_v35, %v5284_v21  ;;  %v3433_v53 = vsel %vm3429_vm7, %v3424_v40, %v5295_v5  ;;  %v3432_v50 = vsel %vm3429_vm7, %v3423_v45, %v5294_v0  ;;  %v5514_v5 = vld [vmem:[#allocation2 + $0x30] sm:$0xff]  ;;  %v5515_v44 = vld [vmem:[#allocation2 + $0x20] sm:$0xff] }
0x1049   : > { %v3438_v62 = vpack.c.bf16 %v3431_v58, %v3430_v47  ;;  %v3439_v10 = vpack.c.bf16 %v3433_v53, %v3432_v50  ;;  %v5288_v19 = vpop.permute.xlu0 %5287  ;;  %v5298_v49 = vpop.permute.xlu1 %5297  ;;  %v5516_v47 = vld [vmem:[#allocation2 + $0x38] sm:$0xff] }
0x104a   : > { %v5290_v26 = vunpack.i.h.bf16 %v5288_v19  ;;  %v5289_v28 = vunpack.i.l.bf16 %v5288_v19  ;;  %v5300_v57 = vunpack.i.h.bf16 %v5298_v49  ;;  %v5299_v27 = vunpack.i.l.bf16 %v5298_v49 }
0x104b   : > { %5010 = vmatprep.mubr.msk.bf16.mxu0 %vm1149_vm3, %v3438_v62 }
0x104c   : > { %5011 = vmatmul.mubr.msk.bf16.vlgmr.msra.gmra.mrb[64].mxu0 %vm1149_vm3, %v3439_v10  ;;  %v3426_v36 = vsel %vm3420_vm6, %v3417_v15, %v5290_v26  ;;  %v3425_v56 = vsel %vm3420_vm6, %v3416_v38, %v5289_v28  ;;  %v3428_v1 = vsel %vm3420_vm6, %v3419_v61, %v5300_v57  ;;  %v3427_v4 = vsel %vm3420_vm6, %v3418_v32, %v5299_v27  ;;  %v5517_v10 = vld [vmem:[#allocation2 + $0x28] sm:$0xff] }
0x104d   : > { %v5303_v31 = vpop.permute.xlu0 %5302 }
0x104e   : > { %v5305_v39 = vunpack.i.h.bf16 %v5303_v31  ;;  %v5304_v37 = vunpack.i.l.bf16 %v5303_v31 }
0x1050   : > { %v3435_v63 = vsel %vm3429_vm7, %v3426_v36, %v5305_v39  ;;  %v3434_v23 = vsel %vm3429_vm7, %v3425_v56, %v5304_v37 }
0x1051   : > { %v3440_v24 = vpack.c.bf16 %v3435_v63, %v3434_v23 }
0x1053   : > { %5014 = vmatprep.mubr.msk.bf16.mxu0 %vm1149_vm3, %v3440_v24 }
0x1082   : > { %v5308_v46 = vpop.permute.xlu1 %5307 }
0x1083   : > { %v5310_v33 = vunpack.i.h.bf16 %v5308_v46  ;;  %v5309_v43 = vunpack.i.l.bf16 %v5308_v46 }
0x1085   : > { %v3437_v7 = vsel %vm3429_vm7, %v3428_v1, %v5310_v33  ;;  %v3436_v42 = vsel %vm3429_vm7, %v3427_v4, %v5309_v43 }
0x1086   : > { %v3441_v13 = vpack.c.bf16 %v3437_v7, %v3436_v42  ;;  %v5313_v7 = vld [vmem:[%s895_s15] sm:$0xff]  }
0x1087   : > { %5018 = vmatprep.subr.bf16.mxu1 %v5313_v7 }
0x1088   : > { %5015 = vmatmul.mubr.msk.bf16.gmra.mrb[68].mxu0 %vm1149_vm3, %v3441_v13  ;;  %5019 = vmatpush3.bf16.msra.mxu1 %v5313_v7 }
0x111f   : > { %v5012_v51 = vpop.f32.mrb[64].mxu0 }
0x1120   : > { %v3496_v8 = vpop.f32.mrb[65].mxu0  ;;  %v3529_v9 = vadd.f32 %v5510_v16, %v5012_v51 }
0x1121   : > { %v3527_v52 = vadd.f32 %v5511_v2, %v3496_v8  ;;  %v5013_v11 = vpop.f32.mrb[66].mxu0 }
0x1122   : > { %v3499_v34 = vpop.f32.mrb[67].mxu0  ;;  %v7474_v60 = vadd.f32 %v4666_v59, %v3529_v9  ;;  %v3530_v25 = vadd.f32 %v5513_v3, %v5013_v11 }
0x1123   : > { %v7472_v41 = vadd.f32 %v4666_v59, %v3527_v52  ;;  %v3528_v17 = vadd.f32 %v5512_v54, %v3499_v34 }
0x1124   : > { %v7482_v14 = vadd.f32 %v4666_v59, %v3530_v25  ;;  %v3558_v18 = vsel %vm1149_vm3, %v7474_v60, 0.0 }
0x1125   : > { %v7476_v29 = vadd.f32 %v4666_v59, %v3528_v17  ;;  %v3552_v30 = vsel %vm1149_vm3, %v7472_v41, 0.0 }
0x1126   : > { %3553 = vadd.xlane.f32.xlu0 %v3552_v30  ;;  %v3561_v20 = vsel %vm1149_vm3, %v7482_v14, 0.0 }
0x1127   : > { %v3555_v12 = vsel %vm1149_vm3, %v7476_v29, 0.0 }
0x1128   : > { %3556 = vadd.xlane.f32.xlu1 %v3555_v12 }
0x112a   : > { %3559 = vadd.xlane.f32.xlu0 %v3558_v18 }
0x112e   : > { %3562 = vadd.xlane.f32.xlu0 %v3561_v20 }
0x115b   : > { %v5016_v21 = vpop.f32.mrb[68].mxu0 }
0x115c   : > { %v3533_v0 = vadd.f32 %v5514_v5, %v5016_v21  ;;  %v3512_v35 = vpop.f32.mrb[69].mxu0 }
0x115d   : > { %v3531_v45 = vadd.f32 %v5515_v44, %v3512_v35  ;;  %v5017_v40 = vpop.f32.mrb[70].mxu0 }
0x115e   : > { %v7488_v58 = vadd.f32 %v4666_v59, %v3533_v0  ;;  %v3534_v53 = vadd.f32 %v5516_v47, %v5017_v40  ;;  %v3515_v50 = vpop.f32.mrb[71].mxu0 }
0x115f   : > { %v7490_v62 = vadd.f32 %v4666_v59, %v3531_v45  ;;  %v3532_v19 = vadd.f32 %v5517_v10, %v3515_v50 }
0x1160   : > { %v7492_v22 = vadd.f32 %v4666_v59, %v3534_v53  ;;  %v3570_v31 = vsel %vm1149_vm3, %v7488_v58, 0.0 }
0x1161   : > { %v7494_v6 = vadd.f32 %v4666_v59, %v3532_v19  ;;  %v3564_v26 = vsel %vm1149_vm3, %v7490_v62, 0.0 }
0x1162   : > { %3565 = vadd.xlane.f32.xlu0 %v3564_v26  ;;  %v3573_v15 = vsel %vm1149_vm3, %v7492_v22, 0.0 }
0x1163   : > { %v3567_v28 = vsel %vm1149_vm3, %v7494_v6, 0.0 }
0x1164   : > { %3568 = vadd.xlane.f32.xlu1 %v3567_v28 }
0x1166   : > { %3571 = vadd.xlane.f32.xlu0 %v3570_v31  ;;  %v4667_v31 = vld [vmem:[%s878_s29] ss:$0 sm:$0xff] }
0x1168   : > { %3574 = vadd.xlane.f32.xlu1 %v3573_v15 }
0x11b3   : > { %v3554_v38 = vpop.xlane.xlu0 %3553 }
0x11b4   : > { %v3576_v39 = vmul.f32 0.0625, %v3554_v38 }
0x11b5   : > { %v3557_v37 = vpop.xlane.xlu1 %3556 }
0x11b6   : > { %v7505_v36 = vsub.f32 %v7472_v41, %v3576_v39  ;;  %v3577_v56 = vmul.f32 0.0625, %v3557_v37 }
0x11b7   : > { %v3560_v63 = vpop.xlane.xlu0 %3559 }
0x11b8   : > { %v7508_v23 = vsub.f32 %v7476_v29, %v3577_v56  ;;  %v3578_v24 = vmul.f32 0.0625, %v3560_v63  ;;  %v3592_v49 = vmul.f32 %v7505_v36, %v7505_v36  ;;  %v4668_v63 = vld [vmem:[%s886_s20] ss:$0 sm:$0xff] }
0x11ba   : > { %v7513_v55 = vsub.f32 %v7474_v60, %v3578_v24  ;;  %v3600_v48 = vsel %vm1149_vm3, %v3592_v49, 0.0  ;;  %v3593_v57 = vmul.f32 %v7508_v23, %v7508_v23 }
0x11bb   : > { %v3563_v27 = vpop.xlane.xlu0 %3562  ;;  %3601 = vadd.xlane.f32.xlu0 %v3600_v48 }
0x11bc   : > { %v3579_v46 = vmul.f32 0.0625, %v3563_v27  ;;  %v3603_v61 = vsel %vm1149_vm3, %v3593_v57, 0.0  ;;  %v3594_v32 = vmul.f32 %v7513_v55, %v7513_v55 }
0x11bd   : > { %3604 = vadd.xlane.f32.xlu1 %v3603_v61 }
0x11be   : > { %v7522_v33 = vsub.f32 %v7482_v14, %v3579_v46  ;;  %v3606_v43 = vsel %vm1149_vm3, %v3594_v32, 0.0 }
0x11bf   : > { %3607 = vadd.xlane.f32.xlu0 %v3606_v43 }
0x11c0   : > { %v3595_v1 = vmul.f32 %v7522_v33, %v7522_v33 }
0x11c2   : > { %v3609_v4 = vsel %vm1149_vm3, %v3595_v1, 0.0 }
0x11c3   : > { %3610 = vadd.xlane.f32.xlu1 %v3609_v4 }
0x11ef   : > { %v3566_v42 = vpop.xlane.xlu0 %3565 }
0x11f0   : > { %v3580_v13 = vmul.f32 0.0625, %v3566_v42 }
0x11f1   : > { %v3569_v51 = vpop.xlane.xlu1 %3568 }
0x11f2   : > { %v7531_v59 = vsub.f32 %v7490_v62, %v3580_v13  ;;  %v3581_v8 = vmul.f32 0.0625, %v3569_v51 }
0x11f3   : > { %v3572_v16 = vpop.xlane.xlu0 %3571 }
0x11f4   : > { %v7534_v9 = vsub.f32 %v7494_v6, %v3581_v8  ;;  %v3582_v2 = vmul.f32 0.0625, %v3572_v16  ;;  %v3596_v52 = vmul.f32 %v7531_v59, %v7531_v59 }
0x11f5   : > { %v3575_v11 = vpop.xlane.xlu1 %3574 }
0x11f6   : > { %v7539_v34 = vsub.f32 %v7488_v58, %v3582_v2  ;;  %v3583_v54 = vmul.f32 0.0625, %v3575_v11  ;;  %v3612_v17 = vsel %vm1149_vm3, %v3596_v52, 0.0  ;;  %v3597_v3 = vmul.f32 %v7534_v9, %v7534_v9 }
0x11f7   : > { %3613 = vadd.xlane.f32.xlu0 %v3612_v17 }
0x11f8   : > { %v7545_v25 = vsub.f32 %v7492_v22, %v3583_v54  ;;  %v3615_v30 = vsel %vm1149_vm3, %v3597_v3, 0.0  ;;  %v3598_v12 = vmul.f32 %v7539_v34, %v7539_v34 }
0x11f9   : > { %3616 = vadd.xlane.f32.xlu1 %v3615_v30 }
0x11fa   : > { %v3618_v18 = vsel %vm1149_vm3, %v3598_v12, 0.0  ;;  %v3599_v20 = vmul.f32 %v7545_v25, %v7545_v25 }
0x11fb   : > { %3619 = vadd.xlane.f32.xlu0 %v3618_v18 }
0x11fc   : > { %v3621_v21 = vsel %vm1149_vm3, %v3599_v20, 0.0 }
0x11fd   : > { %3622 = vadd.xlane.f32.xlu1 %v3621_v21 }
0x1248   : > { %v3602_v5 = vpop.xlane.xlu0 %3601 }
0x1249   : > { %v3624_v0 = vmul.f32 0.0625, %v3602_v5 }
0x124a   : > { %v3605_v35 = vpop.xlane.xlu1 %3604 }
0x124b   : > { %v3632_v44 = vadd.f32 1e-05, %v3624_v0  ;;  %v3625_v45 = vmul.f32 0.0625, %v3605_v35 }
0x124c   : > { %v3608_v40 = vpop.xlane.xlu0 %3607 }
0x124d   : > { %5462 = vrsqrt.f32 %v3632_v44  ;;  %v3633_v47 = vadd.f32 1e-05, %v3625_v45  ;;  %v3626_v53 = vmul.f32 0.0625, %v3608_v40 }
0x124f   : > { %5464 = vrsqrt.f32 %v3633_v47  ;;  %v3634_v50 = vadd.f32 1e-05, %v3626_v53 }
0x1250   : > { %v3611_v10 = vpop.xlane.xlu1 %3610 }
0x1251   : > { %5466 = vrsqrt.f32 %v3634_v50  ;;  %v3627_v19 = vmul.f32 0.0625, %v3611_v10  ;;  %v5315_v50 = vld [vmem:[%s6876_s12 + $0x8] sm:$0xff]   ;;  %v5317_v10 = vld [vmem:[%s6876_s12 + $0x18] sm:$0xff]  }
0x1253   : > { %v3635_v26 = vadd.f32 1e-05, %v3627_v19  ;;  %v7576_v19 = vld [vmem:[%s903_s5] ss:$0 sm:$0xff] }
0x1255   : > { %5468 = vrsqrt.f32 %v3635_v26 }
0x1257   : > { %v5463_v28 = vpop.eup %5462 }
0x1258   : > { %v3648_v15 = vmul.f32 %v5463_v28, %v7505_v36 }
0x1259   : > { %v5465_v38 = vpop.eup %5464 }
0x125a   : > { %v3649_v39 = vmul.f32 %v5465_v38, %v7508_v23  ;;  %v3662_v37 = vmul.f32 %v4667_v31, %v3648_v15 }
0x125b   : > { %v5467_v56 = vpop.eup %5466 }
0x125c   : > { %v3650_v24 = vmul.f32 %v5467_v56, %v7513_v55  ;;  %v3663_v49 = vmul.f32 %v4667_v31, %v3649_v39  ;;  %v3676_v48 = vadd.f32 %v4668_v63, %v3662_v37 }
0x125e   : > { %v3677_v57 = vadd.f32 %v4668_v63, %v3663_v49  ;;  %v3664_v46 = vmul.f32 %v4667_v31, %v3650_v24 }
0x125f   : > { %v5469_v27 = vpop.eup %5468 }
0x1260   : > { %v3651_v61 = vmul.f32 %v5469_v27, %v7522_v33  ;;  %v3684_v32 = vpack.c.bf16 %v3677_v57, %v3676_v48  ;;  %v3678_v36 = vadd.f32 %v4668_v63, %v3664_v46 }
0x1262   : > { %v3665_v43 = vmul.f32 %v4667_v31, %v3651_v61  ;;  %5020 = vmatprep.mubr.msk.bf16.mxu1 %vm1149_vm3, %v3684_v32 }
0x1264   : > { %v3679_v1 = vadd.f32 %v4668_v63, %v3665_v43 }
0x1266   : > { %v3685_v23 = vpack.c.bf16 %v3679_v1, %v3678_v36 }
0x1268   : > { %5021 = vmatmul.mubr.msk.bf16.vlgmr.msra.gmra.mrb[72].mxu1 %vm1149_vm3, %v3685_v23 }
0x1284   : > { %v3614_v4 = vpop.xlane.xlu0 %3613 }
0x1285   : > { %v3628_v7 = vmul.f32 0.0625, %v3614_v4 }
0x1286   : > { %v3617_v42 = vpop.xlane.xlu1 %3616 }
0x1287   : > { %v3636_v55 = vadd.f32 1e-05, %v3628_v7  ;;  %v3629_v13 = vmul.f32 0.0625, %v3617_v42 }
0x1288   : > { %v3620_v51 = vpop.xlane.xlu0 %3619 }
0x1289   : > { %5470 = vrsqrt.f32 %v3636_v55  ;;  %v3637_v8 = vadd.f32 1e-05, %v3629_v13  ;;  %v3630_v16 = vmul.f32 0.0625, %v3620_v51 }
0x128a   : > { %v3623_v2 = vpop.xlane.xlu1 %3622 }
0x128b   : > { %5472 = vrsqrt.f32 %v3637_v8  ;;  %v3638_v33 = vadd.f32 1e-05, %v3630_v16  ;;  %v3631_v52 = vmul.f32 0.0625, %v3623_v2 }
0x128d   : > { %5474 = vrsqrt.f32 %v3638_v33  ;;  %v3639_v11 = vadd.f32 1e-05, %v3631_v52 }
0x128f   : > { %5476 = vrsqrt.f32 %v3639_v11 }
0x1293   : > { %v5471_v54 = vpop.eup %5470 }
0x1294   : > { %v3652_v17 = vmul.f32 %v5471_v54, %v7531_v59 }
0x1295   : > { %v5473_v3 = vpop.eup %5472 }
0x1296   : > { %v3653_v30 = vmul.f32 %v5473_v3, %v7534_v9  ;;  %v3666_v12 = vmul.f32 %v4667_v31, %v3652_v17 }
0x1297   : > { %v5475_v18 = vpop.eup %5474 }
0x1298   : > { %v3654_v20 = vmul.f32 %v5475_v18, %v7539_v34  ;;  %v3667_v21 = vmul.f32 %v4667_v31, %v3653_v30  ;;  %v3680_v35 = vadd.f32 %v4668_v63, %v3666_v12  ;;  %v5314_v34 = vld [vmem:[%s6876_s12] sm:$0xff]  }
0x1299   : > { %v5477_v5 = vpop.eup %5476  ;;  %5028 = vmatprep.subr.bf16.mxu0 %v5314_v34 }
0x129a   : > { %v3655_v0 = vmul.f32 %v5477_v5, %v7545_v25  ;;  %v3681_v44 = vadd.f32 %v4668_v63, %v3667_v21  ;;  %v3668_v45 = vmul.f32 %v4667_v31, %v3654_v20  ;;  %5029 = vmatpush3.bf16.msra.mxu0 %v5314_v34  ;;  %v5316_v25 = vld [vmem:[%s6876_s12 + $0x10] sm:$0xff]  }
0x129b   : > { %5030 = vmatprep.subr.bf16.mxu0 %v5315_v50 }
0x129c   : > { %v3686_v40 = vpack.c.bf16 %v3681_v44, %v3680_v35  ;;  %v3669_v59 = vmul.f32 %v4667_v31, %v3655_v0  ;;  %v3682_v47 = vadd.f32 %v4668_v63, %v3668_v45 }
0x129e   : > { %5024 = vmatprep.mubr.msk.bf16.mxu1 %vm1149_vm3, %v3686_v40  ;;  %v3683_v9 = vadd.f32 %v4668_v63, %v3669_v59  ;;  %5031 = vmatpush3.bf16.msra.mxu0 %v5315_v50 }
0x129f   : > { %5032 = vmatprep.subr.bf16.mxu0 %v5316_v25 }
0x12a0   : > { %v3687_v53 = vpack.c.bf16 %v3683_v9, %v3682_v47 }
0x12a2   : > { %5025 = vmatmul.mubr.msk.bf16.gmra.mrb[76].mxu1 %vm1149_vm3, %v3687_v53  ;;  %5033 = vmatpush3.bf16.msra.mxu0 %v5316_v25 }
0x12a3   : > { %5034 = vmatprep.subr.bf16.mxu0 %v5317_v10 }
0x12a6   : > { %5035 = vmatpush3.bf16.msra.mxu0 %v5317_v10 }
0x133b   : > { %v5022_v26 = vpop.f32.mrb[72].mxu1 }
0x133c   : > { %v7579_v28 = vadd.f32 %v5022_v26, %v7576_v19  ;;  %v3749_v31 = vpop.f32.mrb[73].mxu1 }
0x133d   : > { %v7582_v15 = vadd.f32 %v7576_v19, %v3749_v31  ;;  %v5023_v38 = vpop.f32.mrb[74].mxu1 }
0x133e   : > { %v7585_v39 = vmul.f32 0.70710677, %v7579_v28  ;;  %v7588_v37 = vadd.f32 %v5023_v38, %v7576_v19  ;;  %v3752_v56 = vpop.f32.mrb[75].mxu1 }
0x133f   : > { %v7591_v63 = vmul.f32 0.70710677, %v7582_v15  ;;  %v7594_v24 = vadd.f32 %v7576_v19, %v3752_v56 }
0x1340   : > { %v3798_v49 = vand.u32 2147483647, %v7585_v39  ;;  %v7598_v48 = vmul.f32 0.70710677, %v7588_v37  ;;  %vm3958_vm8 = vcmp.ge.f32.partialorder %v7585_v39, 0.0 }
0x1341   : > { %v3796_v57 = vand.u32 2147483647, %v7591_v63  ;;  %v7602_v27 = vmul.f32 0.70710677, %v7594_v24  ;;  %vm3956_vm9 = vcmp.ge.f32.partialorder %v7591_v63, 0.0 }
0x1342   : > { %v3806_v46 = vmul.f32 0.3275911, %v3798_v49  ;;  %v3799_v61 = vand.u32 2147483647, %v7598_v48  ;;  %v3910_v55 = vsub.f32 0.0, %v3798_v49  ;;  %vm3959_vm10 = vcmp.ge.f32.partialorder %v7598_v48, 0.0 }
0x1343   : > { %v3804_v32 = vmul.f32 0.3275911, %v3796_v57  ;;  %v3797_v43 = vand.u32 2147483647, %v7602_v27  ;;  %v3908_v13 = vsub.f32 0.0, %v3796_v57  ;;  %vm3957_vm11 = vcmp.ge.f32.partialorder %v7602_v27, 0.0 }
0x1344   : > { %v3814_v36 = vadd.f32 1.0, %v3806_v46  ;;  %v3807_v1 = vmul.f32 0.3275911, %v3799_v61  ;;  %v3918_v8 = vmul.f32 %v3910_v55, %v3798_v49  ;;  %v3911_v16 = vsub.f32 0.0, %v3799_v61 }
0x1345   : > { %v3812_v23 = vadd.f32 1.0, %v3804_v32  ;;  %v3805_v4 = vmul.f32 0.3275911, %v3797_v43  ;;  %v3916_v52 = vmul.f32 %v3908_v13, %v3796_v57  ;;  %v3909_v54 = vsub.f32 0.0, %v3797_v43 }
0x1346   : > { %5478 = vrcp.f32 %v3814_v36  ;;  %v3815_v7 = vadd.f32 1.0, %v3807_v1  ;;  %v3928_v30 = vmul.f32 1.442695, %v3918_v8  ;;  %v3919_v18 = vmul.f32 %v3911_v16, %v3799_v61 }
0x1347   : > { %5480 = vrcp.f32 %v3812_v23  ;;  %v3813_v42 = vadd.f32 1.0, %v3805_v4  ;;  %v3924_v21 = vmul.f32 1.442695, %v3916_v52  ;;  %v3917_v44 = vmul.f32 %v3909_v54, %v3797_v43 }
0x1348   : > { %5482 = vrcp.f32 %v3815_v7  ;;  %v3930_v9 = vmul.f32 1.442695, %v3919_v18 }
0x1349   : > { %5484 = vrcp.f32 %v3813_v42  ;;  %v3926_v10 = vmul.f32 1.442695, %v3917_v44 }
0x134a   : > { %5486 = vpow2.f32 %v3928_v30 }
0x134b   : > { %5488 = vpow2.f32 %v3924_v21 }
0x134c   : > { %5490 = vpow2.f32 %v3930_v9 }
0x134d   : > { %5492 = vpow2.f32 %v3926_v10 }
0x1350   : > { %v5479_v51 = vpop.eup %5478 }
0x1351   : > { %v5481_v2 = vpop.eup %5480  ;;  %v3838_v33 = vmul.f32 1.0614054, %v5479_v51 }
0x1352   : > { %v3836_v11 = vmul.f32 1.0614054, %v5481_v2  ;;  %v5483_v3 = vpop.eup %5482 }
0x1353   : > { %v3846_v17 = vadd.f32 -1.4531521, %v3838_v33  ;;  %v3839_v5 = vmul.f32 1.0614054, %v5483_v3  ;;  %v5485_v0 = vpop.eup %5484 }
0x1354   : > { %v3844_v12 = vadd.f32 -1.4531521, %v3836_v11  ;;  %v3837_v59 = vmul.f32 1.0614054, %v5485_v0  ;;  %v5487_v42 = vpop.eup %5486 }
0x1355   : > { %v3854_v20 = vmul.f32 %v5479_v51, %v3846_v17  ;;  %v3847_v40 = vadd.f32 -1.4531521, %v3839_v5  ;;  %v5489_v13 = vpop.eup %5488 }
0x1356   : > { %v3852_v35 = vmul.f32 %v5481_v2, %v3844_v12  ;;  %v3845_v50 = vadd.f32 -1.4531521, %v3837_v59  ;;  %v5491_v30 = vpop.eup %5490 }
0x1357   : > { %v3862_v45 = vadd.f32 1.4214138, %v3854_v20  ;;  %v3855_v34 = vmul.f32 %v5483_v3, %v3847_v40  ;;  %v5493_v5 = vpop.eup %5492 }
0x1358   : > { %v3860_v47 = vadd.f32 1.4214138, %v3852_v35  ;;  %v3853_v38 = vmul.f32 %v5485_v0, %v3845_v50  ;;  %v3780_v50 = vmul.f32 0.5, %v7582_v15 }
0x1359   : > { %v3870_v53 = vmul.f32 %v5479_v51, %v3862_v45  ;;  %v3863_v31 = vadd.f32 1.4214138, %v3855_v34  ;;  %v3783_v34 = vmul.f32 0.5, %v7588_v37 }
0x135a   : > { %v3868_v25 = vmul.f32 %v5481_v2, %v3860_v47  ;;  %v3861_v46 = vadd.f32 1.4214138, %v3853_v38 }
0x135b   : > { %v3878_v26 = vadd.f32 -0.28449672, %v3870_v53  ;;  %v3871_v57 = vmul.f32 %v5483_v3, %v3863_v31 }
0x135c   : > { %v3876_v56 = vadd.f32 -0.28449672, %v3868_v25  ;;  %v3869_v36 = vmul.f32 %v5485_v0, %v3861_v46 }
0x135d   : > { %v3886_v49 = vmul.f32 %v5479_v51, %v3878_v26  ;;  %v3879_v43 = vadd.f32 -0.28449672, %v3871_v57  ;;  %v3781_v26 = vmul.f32 0.5, %v7594_v24 }
0x135e   : > { %v3884_v61 = vmul.f32 %v5481_v2, %v3876_v56  ;;  %v3877_v7 = vadd.f32 -0.28449672, %v3869_v36 }
0x135f   : > { %v3894_v32 = vadd.f32 0.2548296, %v3886_v49  ;;  %v3887_v4 = vmul.f32 %v5483_v3, %v3879_v43 }
0x1360   : > { %v3892_v1 = vadd.f32 0.2548296, %v3884_v61  ;;  %v3885_v33 = vmul.f32 %v5485_v0, %v3877_v7 }
0x1361   : > { %v3902_v23 = vmul.f32 %v5479_v51, %v3894_v32  ;;  %v3895_v16 = vadd.f32 0.2548296, %v3887_v4 }
0x1362   : > { %v3900_v55 = vmul.f32 %v5481_v2, %v3892_v1  ;;  %v3893_v17 = vadd.f32 0.2548296, %v3885_v33 }
0x1363   : > { %v3942_v8 = vmul.f32 %v5487_v42, %v3902_v23  ;;  %v3903_v54 = vmul.f32 %v5483_v3, %v3895_v16  ;;  %v3782_v3 = vmul.f32 0.5, %v7579_v28 }
0x1364   : > { %v3940_v52 = vmul.f32 %v5489_v13, %v3900_v55  ;;  %v3901_v21 = vmul.f32 %v5485_v0, %v3893_v17 }
0x1365   : > { %v3950_v11 = vsub.f32 1.0, %v3942_v8  ;;  %v3943_v20 = vmul.f32 %v5491_v30, %v3903_v54 }
0x1366   : > { %v3948_v12 = vsub.f32 1.0, %v3940_v52  ;;  %v3941_v2 = vmul.f32 %v5493_v5, %v3901_v21 }
0x1367   : > { %v3966_v18 = vsub.f32 0.0, %v3950_v11  ;;  %v3951_v44 = vsub.f32 1.0, %v3943_v20 }
0x1368   : > { %v3964_v51 = vsub.f32 0.0, %v3948_v12  ;;  %v3949_v59 = vsub.f32 1.0, %v3941_v2 }
0x1369   : > { %v3974_v35 = vsel %vm3958_vm8, %v3950_v11, %v3966_v18  ;;  %v3967_v40 = vsub.f32 0.0, %v3951_v44 }
0x136a   : > { %v3972_v45 = vsel %vm3956_vm9, %v3948_v12, %v3964_v51  ;;  %v3982_v47 = vadd.f32 1.0, %v3974_v35  ;;  %v3965_v53 = vsub.f32 0.0, %v3949_v59 }
0x136b   : > { %v3975_v9 = vsel %vm3959_vm10, %v3951_v44, %v3967_v40  ;;  %v3980_v0 = vadd.f32 1.0, %v3972_v45 }
0x136c   : > { %v3983_v39 = vadd.f32 1.0, %v3975_v9  ;;  %v3973_v25 = vsel %vm3957_vm11, %v3949_v59, %v3965_v53  ;;  %v3990_v63 = vmul.f32 %v3982_v47, %v3782_v3 }
0x136d   : > { %v3981_v31 = vadd.f32 1.0, %v3973_v25  ;;  %v3988_v38 = vmul.f32 %v3980_v0, %v3780_v50 }
0x136e   : > { %v3991_v10 = vmul.f32 %v3983_v39, %v3783_v34 }
0x136f   : > { %v3989_v56 = vmul.f32 %v3981_v31, %v3781_v26 }
0x1370   : > { %v3997_v48 = vpack.c.bf16 %v3991_v10, %v3990_v63 }
0x1371   : > { %v3996_v28 = vpack.c.bf16 %v3989_v56, %v3988_v38 }
0x1373   : > { %5036 = vmatprep.mubr.msk.bf16.mxu0 %vm4039_vm12, %v3996_v28 }
0x1374   : > { %5037 = vmatmul.mubr.msk.bf16.vlgmr.msra.gmra.mrb[72].mxu0 %vm4039_vm12, %v3997_v48 }
0x1375   : > { %v5026_v49 = vpop.f32.mrb[76].mxu1 }
0x1376   : > { %v7616_v37 = vadd.f32 %v5026_v49, %v7576_v19  ;;  %v3765_v27 = vpop.f32.mrb[77].mxu1 }
0x1377   : > { %v7620_v15 = vadd.f32 %v7576_v19, %v3765_v27  ;;  %v5027_v57 = vpop.f32.mrb[78].mxu1 }
0x1378   : > { %v7623_v24 = vmul.f32 0.70710677, %v7616_v37  ;;  %v7626_v46 = vadd.f32 %v5027_v57, %v7576_v19  ;;  %v3768_v61 = vpop.f32.mrb[79].mxu1 }
0x1379   : > { %v7629_v32 = vmul.f32 0.70710677, %v7620_v15  ;;  %v7632_v43 = vadd.f32 %v7576_v19, %v3768_v61 }
0x137a   : > { %v3802_v36 = vand.u32 2147483647, %v7623_v24  ;;  %v7636_v1 = vmul.f32 0.70710677, %v7626_v46  ;;  %vm3962_vm13 = vcmp.ge.f32.partialorder %v7623_v24, 0.0  ;;  %v3787_v24 = vmul.f32 0.5, %v7626_v46 }
0x137b   : > { %v3800_v23 = vand.u32 2147483647, %v7629_v32  ;;  %v7640_v4 = vmul.f32 0.70710677, %v7632_v43  ;;  %vm3960_vm14 = vcmp.ge.f32.partialorder %v7629_v32, 0.0 }
0x137c   : > { %v3810_v7 = vmul.f32 0.3275911, %v3802_v36  ;;  %v3803_v42 = vand.u32 2147483647, %v7636_v1  ;;  %v3914_v54 = vsub.f32 0.0, %v3802_v36  ;;  %vm3963_vm15 = vcmp.ge.f32.partialorder %v7636_v1, 0.0 }
0x137d   : > { %v3808_v55 = vmul.f32 0.3275911, %v3800_v23  ;;  %v3801_v13 = vand.u32 2147483647, %v7640_v4  ;;  %v3912_v17 = vsub.f32 0.0, %v3800_v23  ;;  %vm3961_vm0 = vcmp.ge.f32.partialorder %v7640_v4, 0.0 }
0x137e   : > { %v3818_v8 = vadd.f32 1.0, %v3810_v7  ;;  %v3811_v16 = vmul.f32 0.3275911, %v3803_v42  ;;  %v3922_v12 = vmul.f32 %v3914_v54, %v3802_v36  ;;  %v3915_v18 = vsub.f32 0.0, %v3803_v42  ;;  %v4675_v46 = vld [vmem:[%s920_s1] ss:$0 sm:$0xff] }
0x137f   : > { %v3816_v19 = vadd.f32 1.0, %v3808_v55  ;;  %v3809_v33 = vmul.f32 0.3275911, %v3801_v13  ;;  %v3920_v5 = vmul.f32 %v3912_v17, %v3800_v23  ;;  %v3913_v35 = vsub.f32 0.0, %v3801_v13 }
0x1380   : > { %5494 = vrcp.f32 %v3818_v8  ;;  %v3819_v52 = vadd.f32 1.0, %v3811_v16  ;;  %v3936_v45 = vmul.f32 1.442695, %v3922_v12  ;;  %v3923_v59 = vmul.f32 %v3915_v18, %v3803_v42 }
0x1381   : > { %5496 = vrcp.f32 %v3816_v19  ;;  %v3817_v11 = vadd.f32 1.0, %v3809_v33  ;;  %v3932_v3 = vmul.f32 1.442695, %v3920_v5  ;;  %v3921_v34 = vmul.f32 %v3913_v35, %v3801_v13 }
0x1382   : > { %5498 = vrcp.f32 %v3819_v52  ;;  %v3938_v10 = vmul.f32 1.442695, %v3923_v59 }
0x1383   : > { %5500 = vrcp.f32 %v3817_v11  ;;  %v3934_v56 = vmul.f32 1.442695, %v3921_v34 }
0x1384   : > { %5502 = vpow2.f32 %v3936_v45 }
0x1385   : > { %5504 = vpow2.f32 %v3932_v3 }
0x1386   : > { %5506 = vpow2.f32 %v3938_v10 }
0x1387   : > { %5508 = vpow2.f32 %v3934_v56  ;;  %v3785_v56 = vmul.f32 0.5, %v7632_v43 }
0x138a   : > { %v5495_v30 = vpop.eup %5494 }
0x138b   : > { %v5497_v20 = vpop.eup %5496  ;;  %v3842_v21 = vmul.f32 1.0614054, %v5495_v30 }
0x138c   : > { %v3840_v51 = vmul.f32 1.0614054, %v5497_v20  ;;  %v5499_v2 = vpop.eup %5498 }
0x138d   : > { %v3850_v44 = vadd.f32 -1.4531521, %v3842_v21  ;;  %v3843_v9 = vmul.f32 1.0614054, %v5499_v2  ;;  %v5501_v53 = vpop.eup %5500 }
0x138e   : > { %v3848_v40 = vadd.f32 -1.4531521, %v3840_v51  ;;  %v3841_v25 = vmul.f32 1.0614054, %v5501_v53  ;;  %v5503_v52 = vpop.eup %5502 }
0x138f   : > { %v3858_v47 = vmul.f32 %v5495_v30, %v3850_v44  ;;  %v3851_v50 = vadd.f32 -1.4531521, %v3843_v9  ;;  %v5505_v54 = vpop.eup %5504 }
0x1390   : > { %v3856_v0 = vmul.f32 %v5497_v20, %v3848_v40  ;;  %v3849_v38 = vadd.f32 -1.4531521, %v3841_v25  ;;  %v5507_v44 = vpop.eup %5506 }
0x1391   : > { %v3866_v39 = vadd.f32 1.4214138, %v3858_v47  ;;  %v3859_v31 = vmul.f32 %v5499_v2, %v3851_v50  ;;  %v5509_v3 = vpop.eup %5508 }
0x1392   : > { %v3864_v63 = vadd.f32 1.4214138, %v3856_v0  ;;  %v3857_v27 = vmul.f32 %v5501_v53, %v3849_v38 }
0x1393   : > { %v3874_v26 = vmul.f32 %v5495_v30, %v3866_v39  ;;  %v3867_v49 = vadd.f32 1.4214138, %v3859_v31  ;;  %v3784_v31 = vmul.f32 0.5, %v7620_v15 }
0x1394   : > { %v3872_v48 = vmul.f32 %v5497_v20, %v3864_v63  ;;  %v3865_v23 = vadd.f32 1.4214138, %v3857_v27 }
0x1395   : > { %v3882_v28 = vadd.f32 -0.28449672, %v3874_v26  ;;  %v3875_v36 = vmul.f32 %v5499_v2, %v3867_v49 }
0x1396   : > { %v3880_v57 = vadd.f32 -0.28449672, %v3872_v48  ;;  %v3873_v13 = vmul.f32 %v5501_v53, %v3865_v23 }
0x1397   : > { %v3890_v61 = vmul.f32 %v5495_v30, %v3882_v28  ;;  %v3883_v55 = vadd.f32 -0.28449672, %v3875_v36 }
0x1398   : > { %v3888_v7 = vmul.f32 %v5497_v20, %v3880_v57  ;;  %v3881_v33 = vadd.f32 -0.28449672, %v3873_v13 }
0x1399   : > { %v3898_v42 = vadd.f32 0.2548296, %v3890_v61  ;;  %v3891_v19 = vmul.f32 %v5499_v2, %v3883_v55 }
0x139a   : > { %v3896_v8 = vadd.f32 0.2548296, %v3888_v7  ;;  %v3889_v18 = vmul.f32 %v5501_v53, %v3881_v33 }
0x139b   : > { %v3906_v16 = vmul.f32 %v5495_v30, %v3898_v42  ;;  %v3899_v12 = vadd.f32 0.2548296, %v3891_v19 }
0x139c   : > { %v3904_v11 = vmul.f32 %v5497_v20, %v3896_v8  ;;  %v3897_v35 = vadd.f32 0.2548296, %v3889_v18 }
0x139d   : > { %v3946_v17 = vmul.f32 %v5503_v52, %v3906_v16  ;;  %v3907_v51 = vmul.f32 %v5499_v2, %v3899_v12  ;;  %v3786_v2 = vmul.f32 0.5, %v7616_v37 }
0x139e   : > { %v3944_v21 = vmul.f32 %v5505_v54, %v3904_v11  ;;  %v3905_v47 = vmul.f32 %v5501_v53, %v3897_v35 }
0x139f   : > { %v3954_v5 = vsub.f32 1.0, %v3946_v17  ;;  %v3947_v59 = vmul.f32 %v5507_v44, %v3907_v51 }
0x13a0   : > { %v3952_v45 = vsub.f32 1.0, %v3944_v21  ;;  %v3945_v20 = vmul.f32 %v5509_v3, %v3905_v47 }
0x13a1   : > { %v3970_v40 = vsub.f32 0.0, %v3954_v5  ;;  %v3955_v0 = vsub.f32 1.0, %v3947_v59 }
0x13a2   : > { %v3968_v30 = vsub.f32 0.0, %v3952_v45  ;;  %v3953_v50 = vsub.f32 1.0, %v3945_v20 }
0x13a3   : > { %v3978_v9 = vsel %vm3962_vm13, %v3954_v5, %v3970_v40  ;;  %v3971_v39 = vsub.f32 0.0, %v3955_v0 }
0x13a4   : > { %v3976_v34 = vsel %vm3960_vm14, %v3952_v45, %v3968_v30  ;;  %v3986_v25 = vadd.f32 1.0, %v3978_v9  ;;  %v3969_v10 = vsub.f32 0.0, %v3953_v50 }
0x13a5   : > { %v3979_v63 = vsel %vm3963_vm15, %v3955_v0, %v3971_v39  ;;  %v3984_v53 = vadd.f32 1.0, %v3976_v34 }
0x13a6   : > { %v3987_v26 = vadd.f32 1.0, %v3979_v63  ;;  %v3977_v32 = vsel %vm3961_vm0, %v3953_v50, %v3969_v10  ;;  %v3994_v38 = vmul.f32 %v3986_v25, %v3786_v2 }
0x13a7   : > { %v3985_v28 = vadd.f32 1.0, %v3977_v32  ;;  %v3992_v1 = vmul.f32 %v3984_v53, %v3784_v31 }
0x13a8   : > { %v3995_v48 = vmul.f32 %v3987_v26, %v3787_v24 }
0x13a9   : > { %v3993_v37 = vmul.f32 %v3985_v28, %v3785_v56 }
0x13aa   : > { %v3999_v49 = vpack.c.bf16 %v3995_v48, %v3994_v38 }
0x13ab   : > { %v3998_v27 = vpack.c.bf16 %v3993_v37, %v3992_v1 }
0x13ad   : > { %5040 = vmatprep.mubr.msk.bf16.mxu0 %vm4039_vm12, %v3998_v27 }
0x13ae   : > { %5041 = vmatmul.mubr.msk.bf16.gmra.mrb[76].mxu0 %vm4039_vm12, %v3999_v49 }
0x1447   : > { %v5038_v57 = vpop.f32.mrb[72].mxu0 }
0x1448   : > { %v4095_v4 = vadd.f32 %v5038_v57, %v4675_v46  ;;  %v4086_v61 = vpop.f32.mrb[73].mxu0 }
0x1449   : > { %v4087_v15 = vadd.f32 %v4675_v46, %v4086_v61  ;;  %v5039_v36 = vpop.f32.mrb[74].mxu0 }
0x144a   : > { %v4119_v23 = vadd.f32 %v4095_v4, %v7474_v60  ;;  %v4098_v7 = vadd.f32 %v5039_v36, %v4675_v46  ;;  %v4089_v43 = vpop.f32.mrb[75].mxu0 }
0x144b   : > { %v4117_v42 = vadd.f32 %v4087_v15, %v7472_v41  ;;  %v4090_v55 = vadd.f32 %v4675_v46, %v4089_v43 }
0x144c   : > { %4127 = vst.msk [vmem:[#allocation2 + $0x10] sm:$0xff] %vm1149_vm3, %v4119_v23  ;;  %v4120_v13 = vadd.f32 %v4098_v7, %v7482_v14 }
0x144d   : > { %4125 = vst.msk [vmem:[#allocation2] sm:$0xff] %vm1149_vm3, %v4117_v42  ;;  %v4118_v8 = vadd.f32 %v4090_v55, %v7476_v29 }
0x144e   : > { %4128 = vst.msk [vmem:[#allocation2 + $0x18] sm:$0xff] %vm1149_vm3, %v4120_v13 }
0x144f   : > { %4126 = vst.msk [vmem:[#allocation2 + $0x8] sm:$0xff] %vm1149_vm3, %v4118_v8  ;;  %v4137_v18 = vpack.c.bf16 (!%p4684_p2), %v4118_v8, %v4117_v42 }
0x1451   : > { %5046 = vmatprep.mubr.msk.bf16.mxu0 (!%p4684_p2), %vm1149_vm3, %v4137_v18 }
0x1481   : > { %v5042_v16 = vpop.f32.mrb[76].mxu0 }
0x1482   : > { %v4111_v19 = vadd.f32 %v5042_v16, %v4675_v46  ;;  %v4102_v60 = vpop.f32.mrb[77].mxu0 }
0x1483   : > { %v4103_v33 = vadd.f32 %v4675_v46, %v4102_v60  ;;  %v5043_v52 = vpop.f32.mrb[78].mxu0  ;;  %4136 = sbr.rel (%p4684_p2) target bundleno = 5478 (0x1566), region = 164 }
0x1484   : > { %v4123_v41 = vadd.f32 %v4111_v19, %v7488_v58  ;;  %v4114_v11 = vadd.f32 %v5043_v52, %v4675_v46  ;;  %v4105_v54 = vpop.f32.mrb[79].mxu0  ;;  %v5518_v58 = vld [vmem:[#allocation27] sm:$0xff] (!%p4684_p2)  }
0x1485   : > { %v4121_v17 = vadd.f32 %v4103_v33, %v7490_v62  ;;  %v4106_v14 = vadd.f32 %v4675_v46, %v4105_v54  ;;  %5044 = vmatprep.subr.bf16.mxu0 (!%p4684_p2), %v5518_v58  ;;  %5058 = vmatprep.subr.bf16.mxu1 (!%p4684_p2), %v5518_v58  ;;  %v4138_v62 = vpack.c.bf16 (!%p4684_p2), %v4120_v13, %v4119_v23 }
0x1486   : > { %4131 = vst.msk [vmem:[#allocation2 + $0x30] sm:$0xff] %vm1149_vm3, %v4123_v41  ;;  %v4124_v29 = vadd.f32 %v4114_v11, %v7492_v22  ;;  %5045 = vmatpush3.bf16.msra.mxu0 (!%p4684_p2), %v5518_v58  ;;  %5059 = vmatpush3.bf16.msra.mxu1 (!%p4684_p2), %v5518_v58  ;;  %v4685_v22 = vld [vmem:[#allocation29] ss:$0 sm:$0xff] (!%p4684_p2) }
0x1487   : > { %4129 = vst.msk [vmem:[#allocation2 + $0x20] sm:$0xff] %vm1149_vm3, %v4121_v17  ;;  %v4122_v12 = vadd.f32 %v4106_v14, %v7494_v6 }
0x1488   : > { %4132 = vst.msk [vmem:[#allocation2 + $0x38] sm:$0xff] %vm1149_vm3, %v4124_v29  ;;  %v4140_v5 = vpack.c.bf16 (!%p4684_p2), %v4124_v29, %v4123_v41 }
0x1489   : > { %4130 = vst.msk [vmem:[#allocation2 + $0x28] sm:$0xff] %vm1149_vm3, %v4122_v12  ;;  %v4139_v21 = vpack.c.bf16 (!%p4684_p2), %v4122_v12, %v4121_v17  ;;  %5047 = vmatmul.mubr.msk.bf16.vlgmr.msra.gmra.mrb[0].mxu0 (!%p4684_p2), %vm1149_vm3, %v4138_v62 }
0x148b   : > { %5050 = vmatprep.mubr.msk.bf16.mxu1 %vm1149_vm3, %v4139_v21 }
0x148c   : > { %5051 = vmatmul.mubr.msk.bf16.vlgmr.msra.gmra.mrb[0].mxu1 %vm1149_vm3, %v4140_v5 }
0x155c   : > { %v5048_v6 = vpop.f32.mrb[0].mxu0 }
0x155d   : > { %v4211_v35 = vadd.f32 %v5048_v6, %v4685_v22  ;;  %v4202_v45 = vpop.f32.mrb[1].mxu0 }
0x155e   : > { %v4203_v59 = vadd.f32 %v4685_v22, %v4202_v45  ;;  %v5049_v3 = vpop.f32.mrb[2].mxu0 }
0x155f   : > { %v5052_v51 = vpop.f32.mrb[0].mxu1  ;;  %4235 = vst.msk [vmem:[#allocation30 + $0x10] sm:$0xff] %vm1386_vm5, %v4211_v35  ;;  %v4214_v9 = vadd.f32 %v5049_v3, %v4685_v22  ;;  %v4205_v20 = vpop.f32.mrb[3].mxu0 }
0x1560   : > { %v4227_v44 = vadd.f32 %v5052_v51, %v4685_v22  ;;  %v4218_v40 = vpop.f32.mrb[1].mxu1  ;;  %4233 = vst.msk [vmem:[#allocation30] sm:$0xff] %vm1386_vm5, %v4203_v59  ;;  %v4206_v39 = vadd.f32 %v4685_v22, %v4205_v20 }
0x1561   : > { %v4219_v47 = vadd.f32 %v4685_v22, %v4218_v40  ;;  %v5053_v30 = vpop.f32.mrb[2].mxu1  ;;  %4236 = vst.msk [vmem:[#allocation30 + $0x18] sm:$0xff] %vm1386_vm5, %v4214_v9 }
0x1562   : > { %4239 = vst.msk [vmem:[#allocation30 + $0x30] sm:$0xff] %vm1386_vm5, %v4227_v44  ;;  %v4230_v0 = vadd.f32 %v5053_v30, %v4685_v22  ;;  %v4221_v34 = vpop.f32.mrb[3].mxu1  ;;  %4234 = vst.msk [vmem:[#allocation30 + $0x8] sm:$0xff] %vm1386_vm5, %v4206_v39 }
0x1563   : > { %4237 = vst.msk [vmem:[#allocation30 + $0x20] sm:$0xff] %vm1386_vm5, %v4219_v47  ;;  %v4222_v50 = vadd.f32 %v4685_v22, %v4221_v34 }
0x1564   : > { %4240 = vst.msk [vmem:[#allocation30 + $0x38] sm:$0xff] %vm1386_vm5, %v4230_v0 }
0x1565   : > { %4238 = vst.msk [vmem:[#allocation30 + $0x28] sm:$0xff] %vm1386_vm5, %v4222_v50 }
0x1566 PF: > { %s7861_s0 = sld [smem:[#allocation45_spill]]  ;;  %s6170_s19 = smov [#allocation30]  }
0x1567   : > { %s4250_s23 = sshll.u32 %s6170_s19, 4  ;;  %s4251_s23 = int_to_ptr.vmem [resolvable:$true] %s4250_s23 }
0x1568   : > { %s6019_s29 = scalar_lea.vmem %s4251_s23, 1024  ;;  %p6026_p7 = scmp.lt.s32.totalorder %s4251_s23, %s4251_s23 }
0x1569   : > { %p6020_p10 = scmp.ne.s32.totalorder %s4251_s23, %s6019_s29  ;;  %p6027_p11 = scmp.lt.s32.totalorder %s6019_s29, %s6019_s29 }
0x156b   : > { %p6028_p3 = por %p6027_p11, %p6026_p7 }
0x156c   : > { %p5174_p13 = scmp.eq.s32.totalorder %s7861_s0, 2 }
0x156e   : > { %p6021_p5 = pnand %p6020_p10, %p5174_p13 }
0x1570   : > { %p6022_p12 = pneg %p6021_p5 }
0x1572   : > { %p6029_p9 = pnand %p6028_p3, %p6022_p12 }
0x1574   : > { %6032 = shalt.err (!%p6029_p9)
}
0x1575   : > { %s7862_s5 = sld [smem:[#allocation61_spill]] }
0x157b   : > { %s6033_s12 = scalar_lea.hbm %s7862_s5, 1024 }
0x157c   : > { %p6034_p8 = scmp.ne.s32.totalorder %s7862_s5, %s6033_s12  ;;  %p6039_p6 = scmp.lt.u32.totalorder %s6033_s12, %s7862_s5 }
0x157e   : > { %p6035_p0 = pnand %p6034_p8, %p5174_p13 }
0x1580   : > { %p6036_p4 = pneg %p6035_p0 }
0x1582   : > { %p6041_p1 = pnand %p6039_p6, %p6036_p4 }
0x1584   : > { %6044 = shalt.err (!%p6041_p1)
}
0x1585   : > { %s6171_s22 = smov 128  }
0x1586   : > { %5107 = dma.vmem_to_hbm [thread:$0]  (%p5174_p13), %s4251_s23, 1024, %s7862_s5, [#allocation5], %s6171_s22, %s6171_s22, %s6168_s7  }
0x1587   : > { %6106 = dma.done.wait (%p5174_p13), [#allocation5], 1024  }
0x1588   : > { %6108 = vsyncadd (%p5174_p13), [#allocation5], 4294966272 }
0x1589 PF: > { %s7863_s17 = sld [smem:[#allocation44_spill]]  ;;  %s7864_s24 = sld [smem:[#allocation41_spill]] }
0x158a   : > { %s7865_s25 = sld [smem:[#allocation42_spill]]  ;;  %s7866_s26 = sld [smem:[#allocation49_spill]] }
0x158b   : > { %s7867_s30 = sld [smem:[#allocation48_spill]]  ;;  %s7868_s27 = smov %s6127_s28 }
0x158f   : > { %s49_s29 = sadd.s32 1, %s7863_s17  }
0x1590   : > { %p46_p2 = scmp.ge.s32.totalorder %s49_s29, 5  }
0x1591   : > { %s7869_s28 = smov %s7867_s30 }
0x1592   :  { %48 = sbr.rel (!%p46_p2) target bundleno = 31 (0x1f), region = 287 }
0x1599   :  { %4266 = vsyncpa [#allocation4], 1 }
0x159a   :  { %4268 = vsyncpa [#allocation4 + $0x1], 1 }
0x159b   :  { %4269 = vsyncpa [#allocation7], 1 }
0x159c   :  { %4270 = vsyncpa [#allocation10], 1 }
0x159d   :  { %4272 = vsyncpa [#allocation10 + $0x1], 1 }
0x159e   :  { %4273 = vsyncpa [#allocation13], 1 }
0x159f   :  { %4275 = vsyncpa [#allocation13 + $0x1], 1 }
0x15a0   :  { %4276 = vsyncpa [#allocation16], 1 }
0x15a1   :  { %4278 = vsyncpa [#allocation16 + $0x1], 1 }
0x15a2   :  { %4279 = vsyncpa [#allocation19], 1 }
0x15a3   :  { %4281 = vsyncpa [#allocation19 + $0x1], 1 }
0x15a4   :  { %4282 = vsyncpa [#allocation22], 1 }
0x15a5   :  { %4284 = vsyncpa [#allocation22 + $0x1], 1 }
0x15a6   :  { %4285 = vsyncpa [#allocation25], 1 }
0x15a7   :  { %4287 = vsyncpa [#allocation25 + $0x1], 1 }
0x15a8   :  { %4288 = vsyncpa [#allocation28], 1 }
0x15a9   :  { %4289 = vsyncpa [#allocation5], 1 }
0x15aa   :  { %4291 = vsyncpa [#allocation5 + $0x1], 1 }

</bundles_post_ra>
